<compile_context>
chip_gen: v5e
topology: v5e:2x2
jax: 0.10.0
libtpu: 0.0.40
codegen_flags: <defaults>
</compile_context>

<pallas_src>
import jax
import jax.numpy as jnp
from jax import lax
from jax.experimental import pallas as pl
from jax.experimental.pallas import tpu as pltpu

EPS = 1e-5
LEAKY_SLOPE = 0.01  # PyTorch nn.LeakyReLU default


def _leaky_relu(x):
    return jnp.where(x >= 0, x, LEAKY_SLOPE * x)


def _layer_norm(x, gamma, beta):
    mu = jnp.mean(x, axis=-1, keepdims=True)
    var = jnp.mean((x - mu) ** 2, axis=-1, keepdims=True)
    return (x - mu) * lax.rsqrt(var + EPS) * gamma + beta


def gene_embedding_kernel(
    x_ref,        # (TG, 1)        expression scalars for this (gene_tile, batch)
    w1_ref,       # (1, E)         projection Linear(1, E) weight (row)
    b1_ref,       # (1, E)         projection bias
    ln1_g_ref,    # (1, E)         projection LayerNorm gamma
    ln1_b_ref,    # (1, E)         projection LayerNorm beta
    w2_ref,       # (E, BP)        w2 with alpha folded in, bins zero-padded
    mask_ref,     # (1, BP)        0 for real bins, -1e30 for padded bins
    lut_ref,      # (BP, E)        exp_lookup, padded rows are zeros
    wo_ref,       # (E, E)         output_transform Linear weight (in, out)
    bo_ref,       # (1, E)
    ln2_g_ref,    # (1, E)
    ln2_b_ref,    # (1, E)
    g_ref,        # (TG, E)        node2vec G rows (resident across batch axis)
    out_ref,      # (TG, E)
):
    x = x_ref[...]                                            # (TG, 1)

    # projection: Linear(1, E) -> LayerNorm -> LeakyReLU
    v1 = x * w1_ref[...] + b1_ref[...]                        # (TG, E)
    v1 = _leaky_relu(_layer_norm(v1, ln1_g_ref[...], ln1_b_ref[...]))

    # v2 = v1 @ (w2 + alpha)  (alpha*sum(v1) folded into w2), padded bins masked
    v2 = jnp.dot(v1, w2_ref[...], preferred_element_type=jnp.float32)
    v2 = v2 + mask_ref[...]                                   # (TG, BP)

    # softmax over bins
    m = jnp.max(v2, axis=-1, keepdims=True)
    p = jnp.exp(v2 - m)
    bw = p * pl.reciprocal(jnp.sum(p, axis=-1, keepdims=True), approx=True)

    # E = bin_weights @ exp_lookup
    e = jnp.dot(bw, lut_ref[...], preferred_element_type=jnp.float32)

    # output_transform: Linear(E, E) -> LayerNorm -> LeakyReLU
    e = jnp.dot(e, wo_ref[...], preferred_element_type=jnp.float32) + bo_ref[...]
    e = _leaky_relu(_layer_norm(e, ln2_g_ref[...], ln2_b_ref[...]))

    out_ref[...] = e + g_ref[...]


def gene_embedding_forward(x, params, *, tile_genes=512):
    """x: (batch, num_genes) float32 -> (batch, num_genes, emb_dim) float32."""
    b, num_genes = x.shape
    emb_dim = params["w1"].shape[1]
    num_bins = params["w2"].shape[1]

    # --- pad genes to a multiple of tile_genes (no divisibility assert) ---
    n_gtiles = pl.cdiv(num_genes, tile_genes)
    ng_pad = n_gtiles * tile_genes
    pad_g = ng_pad - num_genes

    xf = x.astype(jnp.float32)
    if pad_g:
        xf = jnp.pad(xf, ((0, 0), (0, pad_g)))
        g_all = jnp.pad(params["G"].astype(jnp.float32), ((0, pad_g), (0, 0)))
    else:
        g_all = params["G"].astype(jnp.float32)

    # (batch, n_gtiles, tile_genes, 1) — block equals full array on last 2 dims
    x4 = xf.reshape(b, n_gtiles, tile_genes, 1)
    # (n_gtiles, tile_genes, emb_dim) — block index independent of batch axis
    g3 = g_all.reshape(n_gtiles, tile_genes, emb_dim)

    # --- fold alpha into w2 and pad bins to a multiple of 128 ---
    bins_pad = pl.cdiv(num_bins, 128) * 128
    pad_b = bins_pad - num_bins
    w2_eff = (params["w2"] + params["alpha"]).astype(jnp.float32)     # v1@(w2+a)
    w2_eff = jnp.pad(w2_eff, ((0, 0), (0, pad_b)))
    lut_p = jnp.pad(params["exp_lookup"].astype(jnp.float32), ((0, pad_b), (0, 0)))
    bin_mask = jnp.concatenate(
        [jnp.zeros((1, num_bins), jnp.float32),
         jnp.full((1, pad_b), -1e30, jnp.float32)], axis=1)

    grid = (n_gtiles, b)  # gene tiles outer (parallel), batch innermost

    def full2d(shape):
        return pl.BlockSpec(shape, lambda gi, bi: (0, 0))

    out4 = pl.pallas_call(
        gene_embedding_kernel,
        out_shape=jax.ShapeDtypeStruct((b, n_gtiles, tile_genes, emb_dim),
                                       jnp.float32),
        grid_spec=pltpu.PrefetchScalarGridSpec(
            num_scalar_prefetch=0,
            grid=grid,
            in_specs=[
                pl.BlockSpec((None, None, tile_genes, 1),
                             lambda gi, bi: (bi, gi, 0, 0)),             # x
                full2d((1, emb_dim)),                                    # w1
                full2d((1, emb_dim)),                                    # b1
                full2d((1, emb_dim)),                                    # ln1 gamma
                full2d((1, emb_dim)),                                    # ln1 beta
                full2d((emb_dim, bins_pad)),                             # w2 (+alpha)
                full2d((1, bins_pad)),                                   # bin mask
                full2d((bins_pad, emb_dim)),                             # exp_lookup
                full2d((emb_dim, emb_dim)),                              # wo (in, out)
                full2d((1, emb_dim)),                                    # bo
                full2d((1, emb_dim)),                                    # ln2 gamma
                full2d((1, emb_dim)),                                    # ln2 beta
                pl.BlockSpec((None, tile_genes, emb_dim),
                             lambda gi, bi: (gi, 0, 0)),                 # G rows
            ],
            out_specs=pl.BlockSpec((None, None, tile_genes, emb_dim),
                                   lambda gi, bi: (bi, gi, 0, 0)),
        ),
        compiler_params=pltpu.CompilerParams(
            dimension_semantics=("parallel", "arbitrary"),
        ),
    )(
        x4,
        params["w1"], params["b1"], params["ln1_g"], params["ln1_b"],
        w2_eff, bin_mask, lut_p,
        params["wo"], params["bo"], params["ln2_g"], params["ln2_b"],
        g3,
    )

    out = out4.reshape(b, ng_pad, emb_dim)
    if pad_g:
        out = out[:, :num_genes, :]
    return out


def init_params(key, num_genes, emb_dim, num_bins):
    """Deterministic synthetic init matching the module's parameter shapes."""
    k = jax.random.split(key, 6)
    sqrt_e = jnp.sqrt(jnp.float32(emb_dim))

    # exp_lookup ~ randn / sqrt(emb_dim)
    exp_lookup = jax.random.normal(k[0], (num_bins, emb_dim), jnp.float32) / sqrt_e
    # projection Linear(1, emb_dim): xavier_uniform weight (emb_dim, 1), zero bias
    lim1 = jnp.sqrt(6.0 / (1 + emb_dim))
    w1 = jax.random.uniform(k[1], (1, emb_dim), jnp.float32, -lim1, lim1)  # row form
    b1 = jnp.zeros((1, emb_dim), jnp.float32)
    # w2 ~ randn(emb_dim, num_bins) / sqrt(emb_dim)
    w2 = jax.random.normal(k[2], (emb_dim, num_bins), jnp.float32) / sqrt_e
    alpha = jnp.full((1, 1), 0.1, jnp.float32)
    # output_transform Linear(emb_dim, emb_dim): xavier_uniform; stored as (in, out)
    lim2 = jnp.sqrt(6.0 / (emb_dim + emb_dim))
    wo = jax.random.uniform(k[3], (emb_dim, emb_dim), jnp.float32, -lim2, lim2)
    bo = jnp.zeros((1, emb_dim), jnp.float32)
    # LayerNorm affine params (default init: ones / zeros)
    ln1_g = jnp.ones((1, emb_dim), jnp.float32)
    ln1_b = jnp.zeros((1, emb_dim), jnp.float32)
    ln2_g = jnp.ones((1, emb_dim), jnp.float32)
    ln2_b = jnp.zeros((1, emb_dim), jnp.float32)
    # node2vec buffer G: zeros by default in the module; small randn so the
    # residual add is actually exercised.
    G = jax.random.normal(k[4], (num_genes, emb_dim), jnp.float32) * 0.01

    return dict(
        exp_lookup=exp_lookup, w1=w1, b1=b1, ln1_g=ln1_g, ln1_b=ln1_b,
        w2=w2, alpha=alpha, wo=wo, bo=bo, ln2_g=ln2_g, ln2_b=ln2_b, G=G,
    )


def reference_forward(x, params):
    """Pure-JAX reference of the PyTorch forward (un-padded, un-folded)."""
    xc = x[..., None].astype(jnp.float32)                          # (B, G, 1)
    v1 = xc * params["w1"][0] + params["b1"][0]
    v1 = _leaky_relu(_layer_norm(v1, params["ln1_g"][0], params["ln1_b"][0]))
    v2 = v1 @ params["w2"] + params["alpha"][0, 0] * jnp.sum(v1, -1, keepdims=True)
    bw = jax.nn.softmax(v2, axis=-1)
    e = bw @ params["exp_lookup"]
    e = e @ params["wo"] + params["bo"][0]
    e = _leaky_relu(_layer_norm(e, params["ln2_g"][0], params["ln2_b"][0]))
    return e + params["G"][None, :, :]


if __name__ == "__main__":
    # Small but representative: genes pad 500->512, bins pad 100->128.
    batch, num_genes, emb_dim, num_bins = 2, 500, 128, 100

    key = jax.random.PRNGKey(0)
    kx, kp = jax.random.split(key)
    x = jax.random.normal(kx, (batch, num_genes), jnp.float32)
    params = init_params(kp, num_genes, emb_dim, num_bins)

    out = gene_embedding_forward(x, params, tile_genes=256)
    out = jax.block_until_ready(out)

    ref = reference_forward(x, params)
    assert out.shape == (batch, num_genes, emb_dim)
    # approx reciprocal in the softmax denominator -> slightly looser tolerance
    assert jnp.allclose(out, ref, atol=2e-3, rtol=2e-3), "mismatch vs JAX reference"

    print("KERNEL_OK")
</pallas_src>

<mosaic_0001>
module attributes {stable_mosaic.version = 11 : i64} {
  func.func @gene_embedding_kernel(%arg0: i32, %arg1: i32, %arg2: memref<1x1x256x1xf32, #tpu.memory_space<vmem>>, %arg3: memref<1x128xf32, #tpu.memory_space<vmem>>, %arg4: memref<1x128xf32, #tpu.memory_space<vmem>>, %arg5: memref<1x128xf32, #tpu.memory_space<vmem>>, %arg6: memref<1x128xf32, #tpu.memory_space<vmem>>, %arg7: memref<128x128xf32, #tpu.memory_space<vmem>>, %arg8: memref<1x128xf32, #tpu.memory_space<vmem>>, %arg9: memref<128x128xf32, #tpu.memory_space<vmem>>, %arg10: memref<128x128xf32, #tpu.memory_space<vmem>>, %arg11: memref<1x128xf32, #tpu.memory_space<vmem>>, %arg12: memref<1x128xf32, #tpu.memory_space<vmem>>, %arg13: memref<1x128xf32, #tpu.memory_space<vmem>>, %arg14: memref<1x256x128xf32, #tpu.memory_space<vmem>>, %arg15: memref<1x1x256x128xf32, #tpu.memory_space<vmem>>) attributes {dimension_semantics = [#tpu.dimension_semantics<parallel>, #tpu.dimension_semantics<arbitrary>], iteration_bounds = array<i64: 2, 2>, scalar_prefetch = 0 : i64, scratch_operands = 0 : i64, tpu.core_type = #tpu.core_type<tc>, window_params = [{transform_indices = @transform_0, window_bounds = array<i64: 1, 1, 256, 1>}, {pipeline_mode = #tpu.pipeline_mode<synchronous>, transform_indices = @transform_1, window_bounds = array<i64: 1, 128>}, {pipeline_mode = #tpu.pipeline_mode<synchronous>, transform_indices = @transform_2, window_bounds = array<i64: 1, 128>}, {pipeline_mode = #tpu.pipeline_mode<synchronous>, transform_indices = @transform_3, window_bounds = array<i64: 1, 128>}, {pipeline_mode = #tpu.pipeline_mode<synchronous>, transform_indices = @transform_4, window_bounds = array<i64: 1, 128>}, {pipeline_mode = #tpu.pipeline_mode<synchronous>, transform_indices = @transform_5, window_bounds = array<i64: 128, 128>}, {pipeline_mode = #tpu.pipeline_mode<synchronous>, transform_indices = @transform_6, window_bounds = array<i64: 1, 128>}, {pipeline_mode = #tpu.pipeline_mode<synchronous>, transform_indices = @transform_7, window_bounds = array<i64: 128, 128>}, {pipeline_mode = #tpu.pipeline_mode<synchronous>, transform_indices = @transform_8, window_bounds = array<i64: 128, 128>}, {pipeline_mode = #tpu.pipeline_mode<synchronous>, transform_indices = @transform_9, window_bounds = array<i64: 1, 128>}, {pipeline_mode = #tpu.pipeline_mode<synchronous>, transform_indices = @transform_10, window_bounds = array<i64: 1, 128>}, {pipeline_mode = #tpu.pipeline_mode<synchronous>, transform_indices = @transform_11, window_bounds = array<i64: 1, 128>}, {transform_indices = @transform_12, window_bounds = array<i64: 1, 256, 128>}, {transform_indices = @transform_13, window_bounds = array<i64: 1, 1, 256, 128>}]} {
    %c0 = arith.constant 0 : index
    %c0_0 = arith.constant 0 : index
    %c0_1 = arith.constant 0 : index
    %c0_2 = arith.constant 0 : index
    %0 = vector.load %arg2[%c0, %c0_0, %c0_1, %c0_2] : memref<1x1x256x1xf32, #tpu.memory_space<vmem>>, vector<1x1x256x1xf32>
    %1 = vector.shape_cast %0 : vector<1x1x256x1xf32> to vector<256x1xf32>
    %c0_3 = arith.constant 0 : index
    %c0_4 = arith.constant 0 : index
    %2 = vector.load %arg3[%c0_3, %c0_4] : memref<1x128xf32, #tpu.memory_space<vmem>>, vector<1x128xf32>
    %3 = vector.broadcast %1 : vector<256x1xf32> to vector<256x128xf32>
    %4 = vector.broadcast %2 : vector<1x128xf32> to vector<256x128xf32>
    %5 = arith.mulf %3, %4 : vector<256x128xf32>
    %c0_5 = arith.constant 0 : index
    %c0_6 = arith.constant 0 : index
    %6 = vector.load %arg4[%c0_5, %c0_6] : memref<1x128xf32, #tpu.memory_space<vmem>>, vector<1x128xf32>
    %7 = vector.broadcast %6 : vector<1x128xf32> to vector<256x128xf32>
    %8 = arith.addf %5, %7 : vector<256x128xf32>
    %c0_7 = arith.constant 0 : index
    %c0_8 = arith.constant 0 : index
    %9 = vector.load %arg5[%c0_7, %c0_8] : memref<1x128xf32, #tpu.memory_space<vmem>>, vector<1x128xf32>
    %c0_9 = arith.constant 0 : index
    %c0_10 = arith.constant 0 : index
    %10 = vector.load %arg6[%c0_9, %c0_10] : memref<1x128xf32, #tpu.memory_space<vmem>>, vector<1x128xf32>
    %cst = arith.constant dense<0.000000e+00> : vector<256xf32>
    %11 = vector.multi_reduction <add>, %8, %cst [1] : vector<256x128xf32> to vector<256xf32>
    %12 = vector.shape_cast %11 : vector<256xf32> to vector<256x1xf32>
    %cst_11 = arith.constant 1.280000e+02 : f32
    %13 = vector.broadcast %cst_11 : f32 to vector<256x1xf32>
    %14 = arith.divf %12, %13 : vector<256x1xf32>
    %15 = vector.broadcast %14 : vector<256x1xf32> to vector<256x128xf32>
    %16 = arith.subf %8, %15 : vector<256x128xf32>
    %17 = arith.mulf %16, %16 : vector<256x128xf32>
    %cst_12 = arith.constant dense<0.000000e+00> : vector<256xf32>
    %18 = vector.multi_reduction <add>, %17, %cst_12 [1] : vector<256x128xf32> to vector<256xf32>
    %19 = vector.shape_cast %18 : vector<256xf32> to vector<256x1xf32>
    %cst_13 = arith.constant 1.280000e+02 : f32
    %20 = vector.broadcast %cst_13 : f32 to vector<256x1xf32>
    %21 = arith.divf %19, %20 : vector<256x1xf32>
    %22 = vector.broadcast %14 : vector<256x1xf32> to vector<256x128xf32>
    %23 = arith.subf %8, %22 : vector<256x128xf32>
    %cst_14 = arith.constant 9.99999974E-6 : f32
    %24 = vector.broadcast %cst_14 : f32 to vector<256x1xf32>
    %25 = arith.addf %21, %24 : vector<256x1xf32>
    %26 = math.rsqrt %25 : vector<256x1xf32>
    %27 = vector.broadcast %26 : vector<256x1xf32> to vector<256x128xf32>
    %28 = arith.mulf %23, %27 : vector<256x128xf32>
    %29 = vector.broadcast %9 : vector<1x128xf32> to vector<256x128xf32>
    %30 = arith.mulf %28, %29 : vector<256x128xf32>
    %31 = vector.broadcast %10 : vector<1x128xf32> to vector<256x128xf32>
    %32 = arith.addf %30, %31 : vector<256x128xf32>
    %cst_15 = arith.constant 0.000000e+00 : f32
    %33 = vector.broadcast %cst_15 : f32 to vector<256x128xf32>
    %34 = arith.cmpf oge, %32, %33 : vector<256x128xf32>
    %cst_16 = arith.constant 0.00999999977 : f32
    %35 = vector.broadcast %cst_16 : f32 to vector<256x128xf32>
    %36 = arith.mulf %35, %32 : vector<256x128xf32>
    %37 = arith.select %34, %32, %36 : vector<256x128xi1>, vector<256x128xf32>
    %c0_17 = arith.constant 0 : index
    %c0_18 = arith.constant 0 : index
    %38 = vector.load %arg7[%c0_17, %c0_18] : memref<128x128xf32, #tpu.memory_space<vmem>>, vector<128x128xf32>
    %cst_19 = arith.constant dense<0.000000e+00> : vector<256x128xf32>
    %39 = tpu.matmul %37, %38, %cst_19 {dimension_numbers = #tpu.dot_dimension_numbers<[1], [0], [0], [1], [0, 0, 1, 1], [], []>} : vector<256x128xf32>, vector<128x128xf32>, vector<256x128xf32> -> vector<256x128xf32>
    %c0_20 = arith.constant 0 : index
    %c0_21 = arith.constant 0 : index
    %40 = vector.load %arg8[%c0_20, %c0_21] : memref<1x128xf32, #tpu.memory_space<vmem>>, vector<1x128xf32>
    %41 = vector.broadcast %40 : vector<1x128xf32> to vector<256x128xf32>
    %42 = arith.addf %39, %41 : vector<256x128xf32>
    %cst_22 = arith.constant dense<0xFF800000> : vector<256xf32>
    %43 = vector.multi_reduction <maximumf>, %42, %cst_22 [1] : vector<256x128xf32> to vector<256xf32>
    %44 = vector.shape_cast %43 : vector<256xf32> to vector<256x1xf32>
    %45 = vector.broadcast %44 : vector<256x1xf32> to vector<256x128xf32>
    %46 = arith.subf %42, %45 : vector<256x128xf32>
    %47 = math.exp %46 : vector<256x128xf32>
    %cst_23 = arith.constant dense<0.000000e+00> : vector<256xf32>
    %48 = vector.multi_reduction <add>, %47, %cst_23 [1] : vector<256x128xf32> to vector<256xf32>
    %49 = vector.shape_cast %48 : vector<256xf32> to vector<256x1xf32>
    %50 = tpu.reciprocal %49 {approx = true} : vector<256x1xf32> -> vector<256x1xf32>
    %51 = vector.broadcast %50 : vector<256x1xf32> to vector<256x128xf32>
    %52 = arith.mulf %47, %51 : vector<256x128xf32>
    %c0_24 = arith.constant 0 : index
    %c0_25 = arith.constant 0 : index
    %53 = vector.load %arg9[%c0_24, %c0_25] : memref<128x128xf32, #tpu.memory_space<vmem>>, vector<128x128xf32>
    %cst_26 = arith.constant dense<0.000000e+00> : vector<256x128xf32>
    %54 = tpu.matmul %52, %53, %cst_26 {dimension_numbers = #tpu.dot_dimension_numbers<[1], [0], [0], [1], [0, 0, 1, 1], [], []>} : vector<256x128xf32>, vector<128x128xf32>, vector<256x128xf32> -> vector<256x128xf32>
    %c0_27 = arith.constant 0 : index
    %c0_28 = arith.constant 0 : index
    %55 = vector.load %arg10[%c0_27, %c0_28] : memref<128x128xf32, #tpu.memory_space<vmem>>, vector<128x128xf32>
    %cst_29 = arith.constant dense<0.000000e+00> : vector<256x128xf32>
    %56 = tpu.matmul %54, %55, %cst_29 {dimension_numbers = #tpu.dot_dimension_numbers<[1], [0], [0], [1], [0, 0, 1, 1], [], []>} : vector<256x128xf32>, vector<128x128xf32>, vector<256x128xf32> -> vector<256x128xf32>
    %c0_30 = arith.constant 0 : index
    %c0_31 = arith.constant 0 : index
    %57 = vector.load %arg11[%c0_30, %c0_31] : memref<1x128xf32, #tpu.memory_space<vmem>>, vector<1x128xf32>
    %58 = vector.broadcast %57 : vector<1x128xf32> to vector<256x128xf32>
    %59 = arith.addf %56, %58 : vector<256x128xf32>
    %c0_32 = arith.constant 0 : index
    %c0_33 = arith.constant 0 : index
    %60 = vector.load %arg12[%c0_32, %c0_33] : memref<1x128xf32, #tpu.memory_space<vmem>>, vector<1x128xf32>
    %c0_34 = arith.constant 0 : index
    %c0_35 = arith.constant 0 : index
    %61 = vector.load %arg13[%c0_34, %c0_35] : memref<1x128xf32, #tpu.memory_space<vmem>>, vector<1x128xf32>
    %cst_36 = arith.constant dense<0.000000e+00> : vector<256xf32>
    %62 = vector.multi_reduction <add>, %59, %cst_36 [1] : vector<256x128xf32> to vector<256xf32>
    %63 = vector.shape_cast %62 : vector<256xf32> to vector<256x1xf32>
    %cst_37 = arith.constant 1.280000e+02 : f32
    %64 = vector.broadcast %cst_37 : f32 to vector<256x1xf32>
    %65 = arith.divf %63, %64 : vector<256x1xf32>
    %66 = vector.broadcast %65 : vector<256x1xf32> to vector<256x128xf32>
    %67 = arith.subf %59, %66 : vector<256x128xf32>
    %68 = arith.mulf %67, %67 : vector<256x128xf32>
    %cst_38 = arith.constant dense<0.000000e+00> : vector<256xf32>
    %69 = vector.multi_reduction <add>, %68, %cst_38 [1] : vector<256x128xf32> to vector<256xf32>
    %70 = vector.shape_cast %69 : vector<256xf32> to vector<256x1xf32>
    %cst_39 = arith.constant 1.280000e+02 : f32
    %71 = vector.broadcast %cst_39 : f32 to vector<256x1xf32>
    %72 = arith.divf %70, %71 : vector<256x1xf32>
    %73 = vector.broadcast %65 : vector<256x1xf32> to vector<256x128xf32>
    %74 = arith.subf %59, %73 : vector<256x128xf32>
    %cst_40 = arith.constant 9.99999974E-6 : f32
    %75 = vector.broadcast %cst_40 : f32 to vector<256x1xf32>
    %76 = arith.addf %72, %75 : vector<256x1xf32>
    %77 = math.rsqrt %76 : vector<256x1xf32>
    %78 = vector.broadcast %77 : vector<256x1xf32> to vector<256x128xf32>
    %79 = arith.mulf %74, %78 : vector<256x128xf32>
    %80 = vector.broadcast %60 : vector<1x128xf32> to vector<256x128xf32>
    %81 = arith.mulf %79, %80 : vector<256x128xf32>
    %82 = vector.broadcast %61 : vector<1x128xf32> to vector<256x128xf32>
    %83 = arith.addf %81, %82 : vector<256x128xf32>
    %cst_41 = arith.constant 0.000000e+00 : f32
    %84 = vector.broadcast %cst_41 : f32 to vector<256x128xf32>
    %85 = arith.cmpf oge, %83, %84 : vector<256x128xf32>
    %cst_42 = arith.constant 0.00999999977 : f32
    %86 = vector.broadcast %cst_42 : f32 to vector<256x128xf32>
    %87 = arith.mulf %86, %83 : vector<256x128xf32>
    %88 = arith.select %85, %83, %87 : vector<256x128xi1>, vector<256x128xf32>
    %c0_43 = arith.constant 0 : index
    %c0_44 = arith.constant 0 : index
    %c0_45 = arith.constant 0 : index
    %89 = vector.load %arg14[%c0_43, %c0_44, %c0_45] : memref<1x256x128xf32, #tpu.memory_space<vmem>>, vector<1x256x128xf32>
    %90 = vector.shape_cast %89 : vector<1x256x128xf32> to vector<256x128xf32>
    %91 = arith.addf %88, %90 : vector<256x128xf32>
    %c0_46 = arith.constant 0 : index
    %c0_47 = arith.constant 0 : index
    %c0_48 = arith.constant 0 : index
    %c0_49 = arith.constant 0 : index
    %92 = vector.load %arg15[%c0_46, %c0_47, %c0_48, %c0_49] : memref<1x1x256x128xf32, #tpu.memory_space<vmem>>, vector<1x1x256x128xf32>
    %93 = vector.shape_cast %92 : vector<1x1x256x128xf32> to vector<256x128xf32>
    %94 = vector.shape_cast %91 : vector<256x128xf32> to vector<1x1x256x128xf32>
    tpu.vector_store %arg15[%c0_46, %c0_47, %c0_48, %c0_49], %94 {strides = array<i32>} : memref<1x1x256x128xf32, #tpu.memory_space<vmem>>, vector<1x1x256x128xf32>,
    return
  }
  func.func @transform_0(%arg0: i32, %arg1: i32) -> (i32, i32, i32, i32) {
    %c0_i32 = arith.constant 0 : i32
    %c0_i32_0 = arith.constant 0 : i32
    %c0_i32_1 = arith.constant 0 : i32
    return %arg1, %arg0, %c0_i32, %c0_i32_0 : i32, i32, i32, i32
  }
  func.func @transform_1(%arg0: i32, %arg1: i32) -> (i32, i32) {
    %c0_i32 = arith.constant 0 : i32
    %c0_i32_0 = arith.constant 0 : i32
    %c0_i32_1 = arith.constant 0 : i32
    return %c0_i32, %c0_i32_0 : i32, i32
  }
  func.func @transform_2(%arg0: i32, %arg1: i32) -> (i32, i32) {
    %c0_i32 = arith.constant 0 : i32
    %c0_i32_0 = arith.constant 0 : i32
    %c0_i32_1 = arith.constant 0 : i32
    return %c0_i32, %c0_i32_0 : i32, i32
  }
  func.func @transform_3(%arg0: i32, %arg1: i32) -> (i32, i32) {
    %c0_i32 = arith.constant 0 : i32
    %c0_i32_0 = arith.constant 0 : i32
    %c0_i32_1 = arith.constant 0 : i32
    return %c0_i32, %c0_i32_0 : i32, i32
  }
  func.func @transform_4(%arg0: i32, %arg1: i32) -> (i32, i32) {
    %c0_i32 = arith.constant 0 : i32
    %c0_i32_0 = arith.constant 0 : i32
    %c0_i32_1 = arith.constant 0 : i32
    return %c0_i32, %c0_i32_0 : i32, i32
  }
  func.func @transform_5(%arg0: i32, %arg1: i32) -> (i32, i32) {
    %c0_i32 = arith.constant 0 : i32
    %c0_i32_0 = arith.constant 0 : i32
    %c0_i32_1 = arith.constant 0 : i32
    return %c0_i32, %c0_i32_0 : i32, i32
  }
  func.func @transform_6(%arg0: i32, %arg1: i32) -> (i32, i32) {
    %c0_i32 = arith.constant 0 : i32
    %c0_i32_0 = arith.constant 0 : i32
    %c0_i32_1 = arith.constant 0 : i32
    return %c0_i32, %c0_i32_0 : i32, i32
  }
  func.func @transform_7(%arg0: i32, %arg1: i32) -> (i32, i32) {
    %c0_i32 = arith.constant 0 : i32
    %c0_i32_0 = arith.constant 0 : i32
    %c0_i32_1 = arith.constant 0 : i32
    return %c0_i32, %c0_i32_0 : i32, i32
  }
  func.func @transform_8(%arg0: i32, %arg1: i32) -> (i32, i32) {
    %c0_i32 = arith.constant 0 : i32
    %c0_i32_0 = arith.constant 0 : i32
    %c0_i32_1 = arith.constant 0 : i32
    return %c0_i32, %c0_i32_0 : i32, i32
  }
  func.func @transform_9(%arg0: i32, %arg1: i32) -> (i32, i32) {
    %c0_i32 = arith.constant 0 : i32
    %c0_i32_0 = arith.constant 0 : i32
    %c0_i32_1 = arith.constant 0 : i32
    return %c0_i32, %c0_i32_0 : i32, i32
  }
  func.func @transform_10(%arg0: i32, %arg1: i32) -> (i32, i32) {
    %c0_i32 = arith.constant 0 : i32
    %c0_i32_0 = arith.constant 0 : i32
    %c0_i32_1 = arith.constant 0 : i32
    return %c0_i32, %c0_i32_0 : i32, i32
  }
  func.func @transform_11(%arg0: i32, %arg1: i32) -> (i32, i32) {
    %c0_i32 = arith.constant 0 : i32
    %c0_i32_0 = arith.constant 0 : i32
    %c0_i32_1 = arith.constant 0 : i32
    return %c0_i32, %c0_i32_0 : i32, i32
  }
  func.func @transform_12(%arg0: i32, %arg1: i32) -> (i32, i32, i32) {
    %c0_i32 = arith.constant 0 : i32
    %c0_i32_0 = arith.constant 0 : i32
    %c0_i32_1 = arith.constant 0 : i32
    return %arg0, %c0_i32, %c0_i32_0 : i32, i32, i32
  }
  func.func @transform_13(%arg0: i32, %arg1: i32) -> (i32, i32, i32, i32) {
    %c0_i32 = arith.constant 0 : i32
    %c0_i32_0 = arith.constant 0 : i32
    %c0_i32_1 = arith.constant 0 : i32
    return %arg1, %arg0, %c0_i32, %c0_i32_0 : i32, i32, i32, i32
  }
}

</mosaic_0001>

<bundles_post_ra>
// kernel: tpu_custom_call.1
= control target key start
LH: loop header
LB: loop body
LE: loop exit
PB: predicated region body
PF: predicated region fallthrough
CT: control target
= control target key end

     0   :  { %s5918_s0 = inlined_call_operand.vmem [shape: f32[2,2,256,1], index: 0, kind: input, shape index: {}]   ;;  %s5919_s1 = inlined_call_operand.vmem [shape: f32[1,128], index: 1, kind: input, shape index: {}]   ;;  %s5920_s2 = inlined_call_operand.vmem [shape: f32[1,128], index: 2, kind: input, shape index: {}]   ;;  %s5921_s3 = inlined_call_operand.vmem [shape: f32[1,128], index: 3, kind: input, shape index: {}]   ;;  %s5922_s4 = inlined_call_operand.vmem [shape: f32[1,128], index: 4, kind: input, shape index: {}]   ;;  %s5923_s5 = inlined_call_operand.vmem [shape: f32[128,128], index: 5, kind: input, shape index: {}]   ;;  %s5924_s6 = inlined_call_operand.vmem [shape: f32[1,128], index: 6, kind: input, shape index: {}]   ;;  %s5925_s7 = inlined_call_operand.vmem [shape: f32[128,128], index: 7, kind: input, shape index: {}]   ;;  %s5926_s8 = inlined_call_operand.vmem [shape: f32[128,128], index: 8, kind: input, shape index: {}]   ;;  %s5927_s9 = inlined_call_operand.vmem [shape: f32[1,128], index: 9, kind: input, shape index: {}]   ;;  %s5928_s10 = inlined_call_operand.vmem [shape: f32[1,128], index: 10, kind: input, shape index: {}]   ;;  %s5929_s11 = inlined_call_operand.vmem [shape: f32[1,128], index: 11, kind: input, shape index: {}]   ;;  %s5930_s12 = inlined_call_operand.vmem [shape: f32[2,256,128], index: 12, kind: input, shape index: {}]   ;;  %s5931_s13 = inlined_call_operand.hbm [shape: f32[2,2,256,128], index: 13, kind: output, shape index: {}]  }
   0x1   :  { %5936 = sst [smem:[#allocation10_spill]] %s5918_s0 }
   0x2   :  { %18 = vsyncpa [#allocation3], 0 }
   0x3   :  { %20 = vsyncpa [#allocation3 + $0x1], 0  ;;  %s3855_s25 = smov 0   ;;  %s3857_s26 = smov 0  }
   0x4   :  { %s3859_s27 = smov 0   ;;  %s3861_s28 = smov 0  }
   0x5   :  { %s3863_s29 = smov 0   ;;  %s3865_s30 = smov 0  }
   0x6   :  { %s3867_s14 = smov 0   ;;  %s3869_s15 = smov 0  }
   0x7 LB: > { %5937 = sst [smem:[#allocation5_spill]] %s3771_s30  ;;  %s3268_s16 = sadd.s32 4294967295, %s3779_s15   ;;  %s3779_s15 = sphi %s3869_s15, %s26_s15   ;;  %s3775_s14 = sphi %s3867_s14, %s5963_s14   ;;  %s3771_s30 = sphi %s3865_s30, %s5962_s30   ;;  %s3767_s29 = sphi %s3863_s29, %s5961_s29   ;;  %s3763_s28 = sphi %s3861_s28, %s5960_s28   ;;  %s3759_s27 = sphi %s3859_s27, %s5966_s27   ;;  %s3755_s26 = sphi %s3857_s26, %s5965_s26   ;;  %s3751_s25 = sphi %s3855_s25, %s5964_s25  }
   0x8   : > { %5938 = sst [smem:[#allocation6_spill]] %s3775_s14  ;;  %s3269_s17 = sadd.s32 4294967294, %s3779_s15  }
   0x9   : > { %s35_s18 = sadd.s32 1, %s3771_s30  ;;  %s38_s19 = sadd.s32 1, %s3775_s14 }
   0xa   : > { %p36_p0 = scmp.ge.s32.totalorder %s35_s18, 2  ;;  %p342_p1 = scmp.ne.s32.totalorder %s3759_s27, %s3755_s26 }
   0xb   : > { %p343_p2 = scmp.eq.s32.totalorder %s3268_s16, 3  ;;  %p348_p5 = scmp.ne.s32.totalorder %s3755_s26, %s3751_s25 }
   0xc   : > { %s5968_s18 = smov (%p36_p0, %s35_s18), 0  ;;  %s5970_s19 = smov (!%p36_p0, %s38_s19), %s3775_s14 }
   0xd   : > { %5939 = sst [smem:[#allocation7_spill]] %s5968_s18  ;;  %s327_s20 = ssub.s32 %s3771_s30, %s5968_s18 }
   0xe   : > { %p3906_p3 = por %p343_p2, %p342_p1  ;;  %p40_p4 = scmp.ge.s32.totalorder %s5970_s19, 2 }
   0xf   : > { %p349_p6 = scmp.eq.s32.totalorder %s3269_s17, 3  ;;  %p3272_p7 = scmp.ge.s32.totalorder %s3779_s15, 1 }
  0x10   : > { %s5972_s19 = smov (%p40_p4, %s5970_s19), 0  ;;  %p420_p9 = scmp.lt.s32.totalorder %s3779_s15, 5 }
  0x11   : > { %5941 = sst [smem:[#allocation8_spill]] %s5972_s19  ;;  %p3915_p8 = por %p349_p6, %p348_p5 }
  0x12   : > { %s328_s23 = ssub.s32 %s3775_s14, %s5972_s19  ;;  %s332_s24 = sadd.s32 1, %s3759_s27 }
  0x13   : > { %s329_s16 = sor.u32 %s328_s23, %s327_s20  ;;  %p421_p10 = pnand %p3272_p7, %p420_p9 }
  0x14   : > { %p330_p11 = scmp.eq.s32.totalorder %s329_s16, 0  ;;  %p473_p12 = scmp.lt.s32.totalorder (!%p421_p10), %s3763_s28, 1 }
  0x15   : > { %424 = sbr.rel (%p421_p10) target bundleno = 1988 (0x7c4), region = 72  ;;  %p475_p13 = scmp.lt.s32.totalorder (!%p421_p10), %s3767_s29, 1 }
  0x16   : > { %s3924_s18 = scalar_select %p330_p11, %s3759_s27, %s332_s24  }
  0x17   : > { %s5944_s0 = sld [smem:[#allocation10_spill]] (!%p421_p10) }
  0x18   : > { %5943 = sst [smem:[#allocation9_spill]] %s3924_s18 }
  0x1a   : > { %v3781_v0 = vmov 0   ;;  %s474_s17 = scalar_select %p473_p12, %s3763_s28, 1  ;;  %v3954_v14 = vld [vmem:[%s5919_s1] ss:$0 sm:$0xff]  ;;  %v3782_v53 = vmov 128.0  }
  0x1b   : > { %3410 = vset.pattern.permute.xlu1 %v3781_v0  ;;  %3409 = vset.pattern.permute.xlu0 %v3781_v0  ;;  %s3930_s30 = scalar_select %p475_p13, %s3767_s29, 1  ;;  %v3959_v15 = vld [vmem:[%s5920_s2] ss:$0 sm:$0xff]  ;;  %3420 = vrcp.f32 %v3782_v53 }
  0x1c   : > { %3411 = vset.pattern.permute.xlu2 %v3781_v0  ;;  %s3275_s20 = sshll.u32 %s474_s17, 6 }
  0x1d   : > { %s3274_s23 = sshll.u32 %s3930_s30, 5  ;;  %s3285_s17 = sshll.u32 %s3930_s30, 8 }
  0x1e   : > { %s479_s16 = sadd.s32 %s3275_s20, %s3274_s23  ;;  %s3280_s23 = sshll.u32 %s3767_s29, 5 }
  0x1f   : > { %s3276_s24 = sshll.u32 %s479_s16, 3  ;;  %s3281_s16 = sshll.u32 %s3763_s28, 6 }
  0x20   : > { %s3936_s18 = scalar_lea.vmem %s5944_s0, %s3276_s24  ;;  %s470_s0 = sand.u32 1, %s3755_s26  }
  0x21   : > { %v489_v1 = vld [vmem:[%s3936_s18 + $0x10] sm:$0xff]  ;;  %v487_v2 = vld [vmem:[%s3936_s18] sm:$0xff]  ;;  %v490_v4 = vld [vmem:[%s3936_s18 + $0x18] sm:$0xff]  ;;  %v3421_v54 = vpop.eup %3420  ;;  %s5421_s24 = scalar_lea.vmem %s5930_s12, %s3285_s17  ;;  %s3273_s30 = sshll.u32 %s470_s0, 8 }
  0x22   : > { %v491_v3 = vld [vmem:[%s3936_s18 + $0x20] sm:$0xff]  ;;  %532 = vperm.xlu1 %3410, %v489_v1   ;;  %522 = vperm.xlu0 %3409, %v487_v2   ;;  %v488_v5 = vld [vmem:[%s3936_s18 + $0x8] sm:$0xff]  ;;  %v493_v7 = vld [vmem:[%s3936_s18 + $0x30] sm:$0xff]  ;;  %v818_v56 = vmul.f32 128.0, %v3421_v54  ;;  %vm822_vm0 = vweird.f32 %v3421_v54  ;;  %s5429_s14 = scalar_lea.vmem [#allocation2], %s3273_s30  ;;  %s3165_s30 = sadd.s32 %s3281_s16, %s3280_s23 }
  0x23   : > { %542 = vperm.xlu2 %3411, %v491_v3   ;;  %v492_v6 = vld [vmem:[%s3936_s18 + $0x28] sm:$0xff]  ;;  %v495_v9 = vld [vmem:[%s3936_s18 + $0x40] sm:$0xff]  ;;  %v494_v10 = vld [vmem:[%s3936_s18 + $0x38] sm:$0xff]  ;;  %s3282_s28 = sshll.u32 %s3165_s30, 3  ;;  %s3154_s23 = scalar_lea.sflag [#allocation3], %s470_s0 }
  0x24   : > { %v496_v8 = vld [vmem:[%s3936_s18 + $0x48] sm:$0xff]  ;;  %v498_v11 = vld [vmem:[%s3936_s18 + $0x58] sm:$0xff]  ;;  %v497_v12 = vld [vmem:[%s3936_s18 + $0x50] sm:$0xff]  ;;  %v819_v57 = vsub.f32 1.0, %v818_v56  ;;  %s3167_s17 = scalar_lea.hbm %s5931_s13, %s3282_s28 }
  0x25   : > { %v499_v13 = vld [vmem:[%s3936_s18 + $0x60] sm:$0xff]  ;;  %v501_v45 = vld [vmem:[%s3936_s18 + $0x70] sm:$0xff]  ;;  %v502_v50 = vld [vmem:[%s3936_s18 + $0x78] sm:$0xff]  ;;  %s3170_s20 = sshll.u32 %s3167_s17, 4  ;;  %s3171_s20 = int_to_ptr.hbm [resolvable:$true] %s3170_s20 }
  0x26   : > { %v500_v51 = vld [vmem:[%s3936_s18 + $0x68] sm:$0xff]  ;;  %v503_v52 = vld [vmem:[%s3936_s18 + $0x80] sm:$0xff]  ;;  %v820_v58 = vmul.f32 %v3421_v54, %v819_v57  ;;  %s3699_s16 = sshra.s32 %s3171_s20, 4  ;;  %s3700_s16 = int_to_ptr.hbm [resolvable:$true] %s3699_s16 }
  0x27   : > { %v516_v56 = vld [vmem:[%s3936_s18 + $0xe8] sm:$0xff]  ;;  %s3701_s30 = scalar_lea.hbm %s3700_s16, 256  ;;  %p3706_p4 = scmp.lt.s32.totalorder %s3700_s16, %s5931_s13 }
  0x28   : > { %v821_v61 = vadd.f32 %v3421_v54, %v820_v58  ;;  %p3702_p0 = scmp.ne.s32.totalorder %s3700_s16, %s3701_s30 }
  0x2a   : > { %537 = vperm.xlu1 %3410, %v490_v4   ;;  %527 = vperm.xlu0 %3409, %v488_v5   ;;  %v4021_v62 = vsel %vm822_vm0, %v3421_v54, %v821_v61  ;;  %v1579_v61 = vld [vmem:[%s5923_s5 + $0x68] sm:$0xff]  ;;  %p3703_p1 = pnand %p3702_p0, %p3906_p3 }
  0x2b   : > { %547 = vperm.xlu2 %3411, %v492_v6  }
  0x2c   : > { %p3704_p2 = pneg %p3703_p1 }
  0x32   : > { %552 = vperm.xlu1 %3410, %v493_v7   ;;  %567 = vperm.xlu0 %3409, %v496_v8  }
  0x33   : > { %562 = vperm.xlu2 %3411, %v495_v9  }
  0x3a   : > { %557 = vperm.xlu1 %3410, %v494_v10   ;;  %577 = vperm.xlu0 %3409, %v498_v11  }
  0x3b   : > { %572 = vperm.xlu2 %3411, %v497_v12  }
  0x42   : > { %582 = vperm.xlu0 %3409, %v499_v13  }
  0x7d   : > { %v543_v22 = vpop.permute.xlu2 %542 }
  0x7e   : > { %v687_v23 = vmul.f32 %v3954_v14, %v543_v22 }
  0x80   : > { %v3975_v28 = vadd.f32 %v3959_v15, %v687_v23 }
  0x85   : > { %v548_v31 = vpop.permute.xlu2 %547 }
  0x86   : > { %v688_v32 = vmul.f32 %v3954_v14, %v548_v31 }
  0x88   : > { %v3988_v34 = vadd.f32 %v3959_v15, %v688_v32 }
  0x8d   : > { %v563_v38 = vpop.permute.xlu2 %562 }
  0x8e   : > { %v691_v42 = vmul.f32 %v3954_v14, %v563_v38 }
  0x90   : > { %v4004_v44 = vadd.f32 %v3959_v15, %v691_v42 }
  0x94   : > { %v533_v16 = vpop.permute.xlu1 %532  ;;  %v523_v17 = vpop.permute.xlu0 %522 }
  0x95   : > { %v685_v18 = vmul.f32 %v3954_v14, %v533_v16  ;;  %v683_v19 = vmul.f32 %v3954_v14, %v523_v17  ;;  %v573_v47 = vpop.permute.xlu2 %572 }
  0x96   : > { %v693_v48 = vmul.f32 %v3954_v14, %v573_v47  ;;  %v512_v47 = vld [vmem:[%s3936_s18 + $0xc8] sm:$0xff] }
  0x97   : > { %v3964_v20 = vadd.f32 %v3959_v15, %v685_v18  ;;  %v3967_v21 = vadd.f32 %v3959_v15, %v683_v19 }
  0x98   : > { %v4014_v49 = vadd.f32 %v3959_v15, %v693_v48 }
  0x99   : > { %757 = vadd.xlane.f32.xlu1 %v3964_v20  ;;  %753 = vadd.xlane.f32.xlu0 %v3967_v21 }
  0x9c   : > { %v538_v24 = vpop.permute.xlu1 %537  ;;  %v528_v25 = vpop.permute.xlu0 %527 }
  0x9d   : > { %v686_v26 = vmul.f32 %v3954_v14, %v538_v24  ;;  %v684_v27 = vmul.f32 %v3954_v14, %v528_v25 }
  0x9f   : > { %v3978_v29 = vadd.f32 %v3959_v15, %v686_v26  ;;  %v3981_v30 = vadd.f32 %v3959_v15, %v684_v27 }
  0xa1   : > { %761 = vadd.xlane.f32.xlu1 %v3975_v28  ;;  %759 = vadd.xlane.f32.xlu0 %v3978_v29 }
  0xa2   : > { %755 = vadd.xlane.f32.xlu2 %v3981_v30 }
  0xa4   : > { %v553_v33 = vpop.permute.xlu1 %552  ;;  %v568_v41 = vpop.permute.xlu0 %567 }
  0xa5   : > { %v689_v35 = vmul.f32 %v3954_v14, %v553_v33  ;;  %v692_v43 = vmul.f32 %v3954_v14, %v568_v41  ;;  %v515_v41 = vld [vmem:[%s3936_s18 + $0xe0] sm:$0xff] }
  0xa7   : > { %v3994_v39 = vadd.f32 %v3959_v15, %v689_v35  ;;  %v4008_v46 = vadd.f32 %v3959_v15, %v692_v43  ;;  %v511_v43 = vld [vmem:[%s3936_s18 + $0xc0] sm:$0xff] }
  0xa9   : > { %763 = vadd.xlane.f32.xlu1 %v3988_v34 }
  0xac   : > { %v558_v36 = vpop.permute.xlu1 %557  ;;  %v578_v55 = vpop.permute.xlu0 %577 }
  0xad   : > { %v690_v37 = vmul.f32 %v3954_v14, %v558_v36  ;;  %v694_v60 = vmul.f32 %v3954_v14, %v578_v55 }
  0xaf   : > { %v3997_v40 = vadd.f32 %v3959_v15, %v690_v37  ;;  %v4024_v63 = vadd.f32 %v3959_v15, %v694_v60 }
  0xb1   : > { %765 = vadd.xlane.f32.xlu1 %v3994_v39  ;;  %767 = vadd.xlane.f32.xlu0 %v3997_v40 }
  0xb4   : > { %v583_v59 = vpop.permute.xlu0 %582 }
  0xb5   : > { %v695_v3 = vmul.f32 %v3954_v14, %v583_v59  ;;  %v1581_v59 = vld [vmem:[%s5923_s5 + $0x78] sm:$0xff] }
  0xb6   : > { %1586 = vmatpush.msra.mxu0 %v1581_v59  ;;  %3286 = vmatpush.msra.mxu3 %v1581_v59 }
  0xb7   : > { %v4036_v7 = vadd.f32 %v3959_v15, %v695_v3  ;;  %v1577_v3 = vld [vmem:[%s5923_s5 + $0x58] sm:$0xff] }
  0xb9   : > { %769 = vadd.xlane.f32.xlu1 %v4004_v44  ;;  %771 = vadd.xlane.f32.xlu0 %v4008_v46 }
  0xba   : > { %592 = vperm.xlu2 %3411, %v501_v45  }
  0xc1   : > { %773 = vadd.xlane.f32.xlu1 %v4014_v49 }
  0xc2   : > { %597 = vperm.xlu2 %3411, %v502_v50  }
  0xda   : > { %587 = vperm.xlu1 %3410, %v500_v51   ;;  %v504_v51 = vld [vmem:[%s3936_s18 + $0x88] sm:$0xff] }
  0xe2   : > { %602 = vperm.xlu1 %3410, %v503_v52   ;;  %v514_v52 = vld [vmem:[%s3936_s18 + $0xd8] sm:$0xff] }
 0x10c   : > { %v758_v0 = vpop.xlane.xlu1 %757  ;;  %775 = vadd.xlane.f32.xlu1 %v4024_v63  ;;  %v754_v1 = vpop.xlane.xlu0 %753 }
 0x10d   : > { %v824_v2 = vmul.f32 %v4021_v62, %v754_v1  ;;  %v826_v5 = vmul.f32 %v4021_v62, %v758_v0  ;;  %v507_v0 = vld [vmem:[%s3936_s18 + $0xa0] sm:$0xff] }
 0x10f   : > { %v4030_v4 = vsub.f32 %v3967_v21, %v824_v2  ;;  %v4041_v12 = vsub.f32 %v3964_v20, %v826_v5 }
 0x111   : > { %v888_v6 = vmul.f32 %v4030_v4, %v4030_v4  ;;  %v890_v19 = vmul.f32 %v4041_v12, %v4041_v12 }
 0x113   : > { %920 = vadd.xlane.f32.xlu2 %v888_v6  ;;  %v1576_v6 = vld [vmem:[%s5923_s5 + $0x50] sm:$0xff] }
 0x114   : > { %v762_v8 = vpop.xlane.xlu1 %761  ;;  %777 = vadd.xlane.f32.xlu1 %v4036_v7  ;;  %v760_v9 = vpop.xlane.xlu0 %759 }
 0x115   : > { %v756_v10 = vpop.xlane.xlu2 %755  ;;  %v827_v11 = vmul.f32 %v4021_v62, %v760_v9  ;;  %v828_v18 = vmul.f32 %v4021_v62, %v762_v8  ;;  %v1575_v8 = vld [vmem:[%s5923_s5 + $0x48] sm:$0xff] }
 0x116   : > { %v825_v13 = vmul.f32 %v4021_v62, %v756_v10 }
 0x117   : > { %v4045_v16 = vsub.f32 %v3978_v29, %v827_v11  ;;  %v4059_v24 = vsub.f32 %v3975_v28, %v828_v18  ;;  %v1573_v11 = vld [vmem:[%s5923_s5 + $0x38] sm:$0xff]  ;;  %v1571_v18 = vld [vmem:[%s5923_s5 + $0x28] sm:$0xff] }
 0x118   : > { %v4048_v17 = vsub.f32 %v3981_v30, %v825_v13  ;;  %v1572_v13 = vld [vmem:[%s5923_s5 + $0x30] sm:$0xff] }
 0x119   : > { %v891_v21 = vmul.f32 %v4045_v16, %v4045_v16  ;;  %v892_v26 = vmul.f32 %v4059_v24, %v4059_v24 }
 0x11a   : > { %v889_v20 = vmul.f32 %v4048_v17, %v4048_v17 }
 0x11b   : > { %924 = vadd.xlane.f32.xlu2 %v890_v19  ;;  %926 = vadd.xlane.f32.xlu0 %v891_v21  ;;  %v1570_v21 = vld [vmem:[%s5923_s5 + $0x20] sm:$0xff] }
 0x11c   : > { %v764_v22 = vpop.xlane.xlu1 %763  ;;  %922 = vadd.xlane.f32.xlu1 %v889_v20 }
 0x11d   : > { %v829_v23 = vmul.f32 %v4021_v62, %v764_v22  ;;  %v593_v36 = vpop.permute.xlu2 %592  ;;  %v1569_v22 = vld [vmem:[%s5923_s5 + $0x18] sm:$0xff] }
 0x11e   : > { %v697_v37 = vmul.f32 %v3954_v14, %v593_v36 }
 0x11f   : > { %v4062_v25 = vsub.f32 %v3988_v34, %v829_v23  ;;  %v1568_v23 = vld [vmem:[%s5923_s5 + $0x10] sm:$0xff] }
 0x120   : > { %v4082_v38 = vadd.f32 %v3959_v15, %v697_v37 }
 0x121   : > { %v893_v27 = vmul.f32 %v4062_v25, %v4062_v25 }
 0x123   : > { %928 = vadd.xlane.f32.xlu2 %v892_v26  ;;  %930 = vadd.xlane.f32.xlu0 %v893_v27  ;;  %v1567_v26 = vld [vmem:[%s5923_s5 + $0x8] sm:$0xff] }
 0x124   : > { %v766_v29 = vpop.xlane.xlu1 %765  ;;  %v768_v30 = vpop.xlane.xlu0 %767 }
 0x125   : > { %v830_v31 = vmul.f32 %v4021_v62, %v766_v29  ;;  %v831_v28 = vmul.f32 %v4021_v62, %v768_v30  ;;  %v598_v19 = vpop.permute.xlu2 %597  ;;  %v1566_v29 = vld [vmem:[%s5923_s5] sm:$0xff] }
 0x127   : > { %v4071_v32 = vsub.f32 %v3994_v39, %v830_v31  ;;  %v4074_v33 = vsub.f32 %v3997_v40, %v831_v28  ;;  %v505_v39 = vld [vmem:[%s3936_s18 + $0x90] sm:$0xff] }
 0x129   : > { %v894_v34 = vmul.f32 %v4071_v32, %v4071_v32  ;;  %v895_v35 = vmul.f32 %v4074_v33, %v4074_v33 }
 0x12b   : > { %932 = vadd.xlane.f32.xlu2 %v894_v34  ;;  %934 = vadd.xlane.f32.xlu0 %v895_v35  ;;  %v517_v34 = vld [vmem:[%s3936_s18 + $0xf0] sm:$0xff] }
 0x12c   : > { %v770_v40 = vpop.xlane.xlu1 %769  ;;  %v772_v55 = vpop.xlane.xlu0 %771 }
 0x12d   : > { %v832_v53 = vmul.f32 %v4021_v62, %v770_v40  ;;  %v833_v57 = vmul.f32 %v4021_v62, %v772_v55 }
 0x12f   : > { %v4098_v54 = vsub.f32 %v4004_v44, %v832_v53  ;;  %v4108_v60 = vsub.f32 %v4008_v46, %v833_v57  ;;  %v1580_v44 = vld [vmem:[%s5923_s5 + $0x70] sm:$0xff]  ;;  %v1578_v46 = vld [vmem:[%s5923_s5 + $0x60] sm:$0xff]  ;;  %v510_v53 = vld [vmem:[%s3936_s18 + $0xb8] sm:$0xff] }
 0x130   : > { %1587 = vmatpush.msra.mxu0 %v1580_v44  ;;  %3287 = vmatpush.msra.mxu3 %v1580_v44 }
 0x131   : > { %v896_v58 = vmul.f32 %v4098_v54, %v4098_v54  ;;  %v897_v2 = vmul.f32 %v4108_v60, %v4108_v60 }
 0x132   : > { %1588 = vmatpush.msra.mxu0 %v1579_v61  ;;  %3288 = vmatpush.msra.mxu3 %v1579_v61 }
 0x133   : > { %781 = vadd.xlane.f32.xlu0 %v4082_v38 }
 0x134   : > { %v774_v42 = vpop.xlane.xlu1 %773  ;;  %1589 = vmatpush.msra.mxu0 %v1578_v46  ;;  %3289 = vmatpush.msra.mxu3 %v1578_v46 }
 0x135   : > { %612 = vperm.xlu1 %3410, %v505_v39   ;;  %v834_v1 = vmul.f32 %v4021_v62, %v774_v42 }
 0x136   : > { %1590 = vmatpush.msra.mxu0 %v1577_v3  ;;  %3290 = vmatpush.msra.mxu3 %v1577_v3 }
 0x137   : > { %v4127_v5 = vsub.f32 %v4014_v49, %v834_v1  ;;  %v1574_v49 = vld [vmem:[%s5923_s5 + $0x40] sm:$0xff] }
 0x138   : > { %1591 = vmatpush.msra.mxu0 %v1576_v6  ;;  %3291 = vmatpush.msra.mxu3 %v1576_v6 }
 0x139   : > { %v898_v9 = vmul.f32 %v4127_v5, %v4127_v5 }
 0x13a   : > { %1592 = vmatpush.msra.mxu0 %v1575_v8  ;;  %3292 = vmatpush.msra.mxu3 %v1575_v8 }
 0x13c   : > { %1593 = vmatpush.msra.mxu0 %v1574_v49  ;;  %3293 = vmatpush.msra.mxu3 %v1574_v49 }
 0x13d   : > { %662 = vperm.xlu1 %3410, %v515_v41  }
 0x13e   : > { %1594 = vmatpush.msra.mxu0 %v1573_v11  ;;  %3294 = vmatpush.msra.mxu3 %v1573_v11 }
 0x140   : > { %1595 = vmatpush.msra.mxu0 %v1572_v13  ;;  %3295 = vmatpush.msra.mxu3 %v1572_v13 }
 0x142   : > { %1596 = vmatpush.msra.mxu0 %v1571_v18  ;;  %3296 = vmatpush.msra.mxu3 %v1571_v18 }
 0x144   : > { %1597 = vmatpush.msra.mxu0 %v1570_v21  ;;  %3297 = vmatpush.msra.mxu3 %v1570_v21 }
 0x146   : > { %1598 = vmatpush.msra.mxu0 %v1569_v22  ;;  %3298 = vmatpush.msra.mxu3 %v1569_v22 }
 0x147   : > { %642 = vperm.xlu0 %3409, %v511_v43  }
 0x148   : > { %1599 = vmatpush.msra.mxu0 %v1568_v23  ;;  %3299 = vmatpush.msra.mxu3 %v1568_v23 }
 0x14a   : > { %1600 = vmatpush.msra.mxu0 %v1567_v26  ;;  %3300 = vmatpush.msra.mxu3 %v1567_v26 }
 0x14c   : > { %v588_v45 = vpop.permute.xlu1 %587  ;;  %1601 = vmatpush.msra.mxu0 %v1566_v29  ;;  %3301 = vmatpush.msra.mxu3 %v1566_v29 }
 0x14d   : > { %v696_v48 = vmul.f32 %v3954_v14, %v588_v45 }
 0x14f   : > { %647 = vperm.xlu0 %3409, %v512_v47   ;;  %v4091_v50 = vadd.f32 %v3959_v15, %v696_v48 }
 0x151   : > { %779 = vadd.xlane.f32.xlu2 %v4091_v50 }
 0x154   : > { %v4140_v10 = vpop.permute.xlu1 %602 }
 0x155   : > { %v699_v8 = vmul.f32 %v3954_v14, %v4140_v10 }
 0x157   : > { %607 = vperm.xlu0 %3409, %v504_v51   ;;  %v698_v51 = vmul.f32 %v3954_v14, %v598_v19  ;;  %v4200_v19 = vld [vmem:[%s5921_s3] ss:$0 sm:$0xff] }
 0x159   : > { %v4182_v59 = vadd.f32 %v3959_v15, %v698_v51 }
 0x15f   : > { %657 = vperm.xlu0 %3409, %v514_v52  }
 0x167   : > { %936 = vadd.xlane.f32.xlu1 %v896_v58  ;;  %667 = vperm.xlu0 %3409, %v516_v56  }
 0x16f   : > { %622 = vperm.xlu0 %3409, %v507_v0   ;;  %938 = vadd.xlane.f32.xlu1 %v897_v2 }
 0x177   : > { %940 = vadd.xlane.f32.xlu1 %v898_v9 }
 0x17f   : > { %v4154_v20 = vpop.xlane.xlu1 %775 }
 0x186   : > { %v921_v27 = vpop.xlane.xlu2 %920 }
 0x187   : > { %v984_v30 = vmul.f32 %v921_v27, %v4021_v62  ;;  %v4169_v31 = vpop.xlane.xlu1 %777  ;;  %v4205_v27 = vadd.f32 %v3959_v15, %v699_v8 }
 0x189   : > { %v1016_v28 = vadd.f32 1e-05, %v984_v30 }
 0x18b   : > { %3422 = vrsqrt.f32 %v1016_v28  ;;  %vm1054_vm2 = vweird.f32 %v1016_v28 }
 0x18e   : > { %v925_v35 = vpop.xlane.xlu2 %924  ;;  %v927_v36 = vpop.xlane.xlu0 %926 }
 0x18f   : > { %v986_v37 = vmul.f32 %v925_v35, %v4021_v62  ;;  %v987_v39 = vmul.f32 %v927_v36, %v4021_v62  ;;  %v923_v40 = vpop.xlane.xlu1 %922 }
 0x190   : > { %v985_v41 = vmul.f32 %v923_v40, %v4021_v62  ;;  %672 = vperm.xlu1 %3410, %v517_v34  }
 0x191   : > { %v3423_v42 = vpop.eup %3422  ;;  %v1018_v43 = vadd.f32 1e-05, %v986_v37  ;;  %v4175_v45 = vadd.f32 1e-05, %v987_v39 }
 0x192   : > { %v1049_v47 = vmul.f32 %v3423_v42, %v1016_v28  ;;  %v1017_v48 = vadd.f32 1e-05, %v985_v41  ;;  %vm1055_vm1 = vweird.f32 %v3423_v42 }
 0x193   : > { %3424 = vrsqrt.f32 %v1018_v43  ;;  %vm1056_vm3 = vmor %vm1054_vm2, %vm1055_vm1  ;;  %vm1074_vm6 = vweird.f32 %v1018_v43  ;;  %vm1084_vm12 = vweird.f32 %v4175_v45 }
 0x194   : > { %v1050_v52 = vmul.f32 %v3423_v42, %v1049_v47  ;;  %3426 = vrsqrt.f32 %v4175_v45  ;;  %vm1064_vm8 = vweird.f32 %v1017_v48 }
 0x195   : > { %3428 = vrsqrt.f32 %v1017_v48 }
 0x196   : > { %v1051_v55 = vmul.f32 0.5, %v1050_v52  ;;  %v929_v56 = vpop.xlane.xlu2 %928  ;;  %v931_v57 = vpop.xlane.xlu0 %930 }
 0x197   : > { %v988_v58 = vmul.f32 %v929_v56, %v4021_v62  ;;  %v989_v61 = vmul.f32 %v931_v57, %v4021_v62 }
 0x198   : > { %v1052_v44 = vsub.f32 1.5, %v1051_v55  ;;  %637 = vperm.xlu1 %3410, %v510_v53  }
 0x199   : > { %v3425_v0 = vpop.eup %3424  ;;  %v4185_v1 = vadd.f32 1e-05, %v988_v58  ;;  %783 = vadd.xlane.f32.xlu0 %v4182_v59  ;;  %v4195_v13 = vadd.f32 1e-05, %v989_v61 }
 0x19a   : > { %v4188_v2 = vpop.eup %3426  ;;  %v1053_v46 = vmul.f32 %v3423_v42, %v1052_v44  ;;  %v1069_v3 = vmul.f32 %v3425_v0, %v1018_v43  ;;  %vm1075_vm4 = vweird.f32 %v3425_v0 }
 0x19b   : > { %v3429_v6 = vpop.eup %3428  ;;  %v1079_v9 = vmul.f32 %v4188_v2, %v4175_v45  ;;  %3430 = vrsqrt.f32 %v4185_v1  ;;  %vm4220_vm7 = vmor %vm1074_vm6, %vm1075_vm4  ;;  %vm1085_vm11 = vweird.f32 %v4188_v2  ;;  %vm1094_vm0 = vweird.f32 %v4185_v1 }
 0x19c   : > { %v1070_v49 = vmul.f32 %v3425_v0, %v1069_v3  ;;  %v1059_v11 = vmul.f32 %v3429_v6, %v1017_v48  ;;  %v1057_v18 = vsel %vm1056_vm3, %v3423_v42, %v1053_v46  ;;  %3432 = vrsqrt.f32 %v4195_v13  ;;  %vm1086_vm13 = vmor %vm1084_vm12, %vm1085_vm11 }
 0x19d   : > { %v1080_v10 = vmul.f32 %v4188_v2, %v1079_v9  ;;  %v1368_v26 = vmul.f32 %v1057_v18, %v4030_v4  ;;  %vm1065_vm5 = vweird.f32 %v3429_v6  ;;  %v4216_v4 = vld [vmem:[%s5922_s4] ss:$0 sm:$0xff]  ;;  %vm1104_vm4 = vweird.f32 %v4195_v13 }
 0x19e   : > { %v1071_v21 = vmul.f32 0.5, %v1070_v49  ;;  %v1060_v22 = vmul.f32 %v3429_v6, %v1059_v11  ;;  %v933_v23 = vpop.xlane.xlu2 %932  ;;  %vm1066_vm9 = vmor %vm1064_vm8, %vm1065_vm5  ;;  %v935_v51 = vpop.xlane.xlu0 %934 }
 0x19f   : > { %v990_v34 = vmul.f32 %v933_v23, %v4021_v62  ;;  %v1403_v35 = vmul.f32 %v4200_v19, %v1368_v26  ;;  %v1081_v37 = vmul.f32 0.5, %v1080_v10  ;;  %v991_v44 = vmul.f32 %v935_v51, %v4021_v62 }
 0x1a0   : > { %v1072_v29 = vsub.f32 1.5, %v1071_v21  ;;  %v1061_v30 = vmul.f32 0.5, %v1060_v22 }
 0x1a1   : > { %v4208_v28 = vpop.eup %3430  ;;  %785 = vadd.xlane.f32.xlu0 %v4205_v27  ;;  %v4224_v47 = vadd.f32 1e-05, %v990_v34  ;;  %v1438_v52 = vadd.f32 %v4216_v4, %v1403_v35  ;;  %v1082_v55 = vsub.f32 1.5, %v1081_v37  ;;  %v4244_v49 = vadd.f32 1e-05, %v991_v44 }
 0x1a2   : > { %v1073_v36 = vmul.f32 %v3425_v0, %v1072_v29  ;;  %v1062_v39 = vsub.f32 1.5, %v1061_v30  ;;  %v1089_v40 = vmul.f32 %v4208_v28, %v4185_v1  ;;  %v4227_v53 = vpop.eup %3432  ;;  %vm1095_vm15 = vweird.f32 %v4208_v28 }
 0x1a3   : > { %vm1470_vm10 = vcmp.ge.f32.partialorder %v1438_v52, 0.0  ;;  %v1502_v58 = vmul.f32 0.01, %v1438_v52  ;;  %v1099_v61 = vmul.f32 %v4227_v53, %v4195_v13  ;;  %3434 = vrsqrt.f32 %v4224_v47  ;;  %vm1096_vm1 = vmor %vm1094_vm0, %vm1095_vm15 }
 0x1a4   : > { %v1063_v42 = vmul.f32 %v3429_v6, %v1062_v39  ;;  %v1090_v56 = vmul.f32 %v4208_v28, %v1089_v40  ;;  %v1077_v43 = vsel %vm4220_vm7, %v3425_v0, %v1073_v36  ;;  %v1083_v8 = vmul.f32 %v4188_v2, %v1082_v55 }
 0x1a5   : > { %v1534_v46 = vsel %vm1470_vm10, %v1438_v52, %v1502_v58  ;;  %v1370_v3 = vmul.f32 %v1077_v43, %v4041_v12  ;;  %v1100_v9 = vmul.f32 %v4227_v53, %v1099_v61  ;;  %3436 = vrsqrt.f32 %v4244_v49 }
 0x1a6   : > { %v1067_v57 = vsel %vm1066_vm9, %v3429_v6, %v1063_v42  ;;  %v1091_v6 = vmul.f32 0.5, %v1090_v56  ;;  %1602 = vmatmul.f32.vlgmr.msra.gmra.mxu0 %v1534_v46  ;;  %v1087_v21 = vsel %vm1086_vm13, %v4188_v2, %v1083_v8  ;;  %v4251_v45 = vpop.xlane.xlu0 %781  ;;  %vm1105_vm3 = vweird.f32 %v4227_v53 }
 0x1a7   : > { %v1369_v48 = vmul.f32 %v1067_v57, %v4048_v17  ;;  %v1405_v11 = vmul.f32 %v4200_v19, %v1370_v3  ;;  %v1371_v26 = vmul.f32 %v1087_v21, %v4045_v16  ;;  %v1101_v30 = vmul.f32 0.5, %v1100_v9  ;;  %vm1106_vm5 = vmor %vm1104_vm4, %vm1105_vm3 }
 0x1a8   : > { %v1092_v12 = vsub.f32 1.5, %v1091_v6  ;;  %vm1114_vm8 = vweird.f32 %v4224_v47  ;;  %vm1124_vm12 = vweird.f32 %v4244_v49 }
 0x1a9   : > { %v1404_v0 = vmul.f32 %v4200_v19, %v1369_v48  ;;  %v4248_v10 = vpop.eup %3434  ;;  %v1440_v23 = vadd.f32 %v4216_v4, %v1405_v11  ;;  %v1406_v35 = vmul.f32 %v4200_v19, %v1371_v26  ;;  %v1102_v36 = vsub.f32 1.5, %v1101_v30 }
 0x1aa   : > { %v1093_v29 = vmul.f32 %v4208_v28, %v1092_v12  ;;  %v1109_v34 = vmul.f32 %v4248_v10, %v4224_v47  ;;  %vm1115_vm7 = vweird.f32 %v4248_v10  ;;  %v4292_v47 = vpop.permute.xlu1 %612 }
 0x1ab   : > { %v1439_v17 = vadd.f32 %v4216_v4, %v1404_v0  ;;  %v1504_v2 = vmul.f32 0.01, %v1440_v23  ;;  %vm1472_vm2 = vcmp.ge.f32.partialorder %v1440_v23, 0.0  ;;  %v3437_v39 = vpop.eup %3436  ;;  %v1441_v42 = vadd.f32 %v4216_v4, %v1406_v35  ;;  %vm1116_vm9 = vmor %vm1114_vm8, %vm1115_vm7 }
 0x1ac   : > { %v1110_v37 = vmul.f32 %v4248_v10, %v1109_v34  ;;  %v1097_v16 = vsel %vm1096_vm1, %v4208_v28, %v1093_v29  ;;  %v1103_v1 = vmul.f32 %v4227_v53, %v1102_v36  ;;  %v1119_v55 = vmul.f32 %v3437_v39, %v4244_v49 }
 0x1ad   : > { %vm1471_vm14 = vcmp.ge.f32.partialorder %v1439_v17, 0.0  ;;  %v1503_v18 = vmul.f32 0.01, %v1439_v17  ;;  %v1536_v40 = vsel %vm1472_vm2, %v1440_v23, %v1504_v2  ;;  %v1372_v51 = vmul.f32 %v1097_v16, %v4059_v24 }
 0x1ae   : > { %v1111_v52 = vmul.f32 0.5, %v1110_v37  ;;  %v1505_v57 = vmul.f32 0.01, %v1441_v42  ;;  %v1120_v44 = vmul.f32 %v3437_v39, %v1119_v55  ;;  %vm1473_vm6 = vcmp.ge.f32.partialorder %v1441_v42, 0.0  ;;  %v506_v55 = vld [vmem:[%s3936_s18 + $0x98] sm:$0xff] }
 0x1af   : > { %v1535_v22 = vsel %vm1471_vm14, %v1439_v17, %v1503_v18  ;;  %v1407_v43 = vmul.f32 %v4200_v19, %v1372_v51  ;;  %v1107_v24 = vsel %vm1106_vm5, %v4227_v53, %v1103_v1  ;;  %vm1125_vm11 = vweird.f32 %v3437_v39 }
 0x1b0   : > { %1605 = vmatmul.f32.gmra.mxu0 %v1535_v22  ;;  %v1112_v58 = vsub.f32 1.5, %v1111_v52  ;;  %v1537_v48 = vsel %vm1473_vm6, %v1441_v42, %v1505_v57  ;;  %v1373_v13 = vmul.f32 %v1107_v24, %v4062_v25  ;;  %v1121_v8 = vmul.f32 0.5, %v1120_v44  ;;  %vm1126_vm13 = vmor %vm1124_vm12, %vm1125_vm11 }
 0x1b1   : > { %v1442_v46 = vadd.f32 %v4216_v4, %v1407_v43 }
 0x1b2   : > { %v1113_v3 = vmul.f32 %v4248_v10, %v1112_v58  ;;  %v1408_v25 = vmul.f32 %v4200_v19, %v1373_v13  ;;  %v1122_v11 = vsub.f32 1.5, %v1121_v8  ;;  %v4302_v36 = vpop.permute.xlu1 %662 }
 0x1b3   : > { %v1506_v9 = vmul.f32 0.01, %v1442_v46  ;;  %vm1474_vm10 = vcmp.ge.f32.partialorder %v1442_v46, 0.0 }
 0x1b4   : > { %v1117_v12 = vsel %vm1116_vm9, %v4248_v10, %v1113_v3  ;;  %v1443_v23 = vadd.f32 %v4216_v4, %v1408_v25  ;;  %v1123_v29 = vmul.f32 %v3437_v39, %v1122_v11 }
 0x1b5   : > { %v1538_v21 = vsel %vm1474_vm10, %v1442_v46, %v1506_v9  ;;  %v1374_v26 = vmul.f32 %v1117_v12, %v4071_v32  ;;  %v508_v46 = vld [vmem:[%s3936_s18 + $0xa8] sm:$0xff] }
 0x1b6   : > { %v1507_v10 = vmul.f32 0.01, %v1443_v23  ;;  %vm1475_vm14 = vcmp.ge.f32.partialorder %v1443_v23, 0.0  ;;  %v1127_v30 = vsel %vm1126_vm13, %v3437_v39, %v1123_v29 }
 0x1b7   : > { %v1375_v35 = vmul.f32 %v1127_v30, %v4074_v33 }
 0x1b8   : > { %1608 = vmatmul.f32.gmra.mxu0 %v1536_v40  ;;  %v1539_v34 = vsel %vm1475_vm14, %v1443_v23, %v1507_v10 }
 0x1b9   : > { %v643_v41 = vpop.permute.xlu0 %642  ;;  %v1410_v37 = vmul.f32 %v4200_v19, %v1375_v35 }
 0x1ba   : > { %v707_v56 = vmul.f32 %v3954_v14, %v643_v41  ;;  %v513_v41 = vld [vmem:[%s3936_s18 + $0xd0] sm:$0xff] }
 0x1bb   : > { %v1445_v16 = vadd.f32 %v4216_v4, %v1410_v37 }
 0x1bc   : > { %v4271_v28 = vadd.f32 %v3959_v15, %v707_v56 }
 0x1bd   : > { %v1509_v51 = vmul.f32 0.01, %v1445_v16  ;;  %vm1477_vm0 = vcmp.ge.f32.partialorder %v1445_v16, 0.0 }
 0x1be   : > { %801 = vadd.xlane.f32.xlu2 %v4271_v28 }
 0x1bf   : > { %v1541_v33 = vsel %vm1477_vm0, %v1445_v16, %v1509_v51 }
 0x1c0   : > { %1611 = vmatmul.f32.gmra.mxu0 %v1537_v48 }
 0x1c1   : > { %v648_v61 = vpop.permute.xlu0 %647 }
 0x1c2   : > { %v708_v6 = vmul.f32 %v3954_v14, %v648_v61 }
 0x1c4   : > { %v780_v0 = vpop.xlane.xlu2 %779  ;;  %v4283_v17 = vadd.f32 %v3959_v15, %v708_v6 }
 0x1c5   : > { %v837_v53 = vmul.f32 %v4021_v62, %v780_v0 }
 0x1c6   : > { %803 = vadd.xlane.f32.xlu2 %v4283_v17 }
 0x1c7   : > { %v4290_v18 = vsub.f32 %v4091_v50, %v837_v53  ;;  %v1409_v50 = vmul.f32 %v4200_v19, %v1374_v26 }
 0x1c8   : > { %1614 = vmatmul.f32.gmra.mxu0 %v1538_v21  ;;  %v518_v21 = vld [vmem:[%s3936_s18 + $0xf8] sm:$0xff] }
 0x1c9   : > { %v901_v22 = vmul.f32 %v4290_v18, %v4290_v18  ;;  %v1444_v2 = vadd.f32 %v4216_v4, %v1409_v50  ;;  %v4310_v43 = vpop.permute.xlu0 %607 }
 0x1cb   : > { %946 = vadd.xlane.f32.xlu1 %v901_v22  ;;  %v1508_v32 = vmul.f32 0.01, %v1444_v2  ;;  %vm1476_vm15 = vcmp.ge.f32.partialorder %v1444_v2, 0.0 }
 0x1cd   : > { %v1540_v49 = vsel %vm1476_vm15, %v1444_v2, %v1508_v32 }
 0x1d0   : > { %1617 = vmatmul.f32.gmra.mxu0 %v1539_v34 }
 0x1d1   : > { %v4314_v53 = vpop.permute.xlu0 %657 }
 0x1d8   : > { %1620 = vmatmul.f32.gmra.mxu0 %v1540_v49  ;;  %v509_v49 = vld [vmem:[%s3936_s18 + $0xb0] sm:$0xff]  ;;  %s3168_s18 = sshll.u32 %s5429_s14, 4  ;;  %s3169_s18 = int_to_ptr.vmem [resolvable:$true] %s3168_s18 }
 0x1d9   : > { %v668_v32 = vpop.permute.xlu0 %667 }
 0x1da   : > { %v937_v40 = vpop.xlane.xlu1 %936 }
 0x1db   : > { %v992_v39 = vmul.f32 %v937_v40, %v4021_v62 }
 0x1dd   : > { %v1024_v42 = vadd.f32 1e-05, %v992_v39 }
 0x1de   : > { %652 = vperm.xlu2 %3411, %v513_v41  }
 0x1df   : > { %3438 = vrsqrt.f32 %v1024_v42  ;;  %vm1134_vm2 = vweird.f32 %v1024_v42 }
 0x1e0   : > { %1623 = vmatmul.f32.gmra.mxu0 %v1541_v33 }
 0x1e2   : > { %v939_v1 = vpop.xlane.xlu1 %938 }
 0x1e3   : > { %v993_v52 = vmul.f32 %v939_v1, %v4021_v62 }
 0x1e5   : > { %v3439_v56 = vpop.eup %3438  ;;  %v1025_v57 = vadd.f32 1e-05, %v993_v52  ;;  %v623_v52 = vpop.permute.xlu0 %622 }
 0x1e6   : > { %v1129_v58 = vmul.f32 %v3439_v56, %v1024_v42  ;;  %617 = vperm.xlu2 %3411, %v506_v55   ;;  %vm1135_vm1 = vweird.f32 %v3439_v56 }
 0x1e7   : > { %3440 = vrsqrt.f32 %v1025_v57  ;;  %vm1136_vm3 = vmor %vm1134_vm2, %vm1135_vm1  ;;  %vm1144_vm5 = vweird.f32 %v1025_v57 }
 0x1e8   : > { %v1130_v44 = vmul.f32 %v3439_v56, %v1129_v58 }
 0x1ea   : > { %v1131_v24 = vmul.f32 0.5, %v1130_v44  ;;  %v941_v48 = vpop.xlane.xlu1 %940 }
 0x1eb   : > { %v994_v61 = vmul.f32 %v941_v48, %v4021_v62 }
 0x1ec   : > { %v1132_v13 = vsub.f32 1.5, %v1131_v24 }
 0x1ed   : > { %v3441_v3 = vpop.eup %3440  ;;  %v1026_v8 = vadd.f32 1e-05, %v994_v61  ;;  %v700_v61 = vmul.f32 %v3954_v14, %v4310_v43 }
 0x1ee   : > { %v1133_v6 = vmul.f32 %v3439_v56, %v1132_v13  ;;  %v1139_v0 = vmul.f32 %v3441_v3, %v1025_v57  ;;  %627 = vperm.xlu2 %3411, %v508_v46   ;;  %vm1145_vm4 = vweird.f32 %v3441_v3  ;;  %v712_v13 = vmul.f32 %v3954_v14, %v668_v32 }
 0x1ef   : > { %3442 = vrsqrt.f32 %v1026_v8  ;;  %vm1146_vm6 = vmor %vm1144_vm5, %vm1145_vm4  ;;  %vm1154_vm9 = vweird.f32 %v1026_v8  ;;  %v4336_v46 = vadd.f32 %v3959_v15, %v700_v61 }
 0x1f0   : > { %v1140_v9 = vmul.f32 %v3441_v3, %v1139_v0  ;;  %v1137_v25 = vsel %vm1136_vm3, %v3439_v56, %v1133_v6 }
 0x1f1   : > { %v1376_v11 = vmul.f32 %v1137_v25, %v4098_v54 }
 0x1f2   : > { %v1141_v12 = vmul.f32 0.5, %v1140_v9 }
 0x1f3   : > { %v1411_v22 = vmul.f32 %v4200_v19, %v1376_v11 }
 0x1f4   : > { %v1142_v23 = vsub.f32 1.5, %v1141_v12 }
 0x1f5   : > { %v3443_v26 = vpop.eup %3442  ;;  %v1446_v29 = vadd.f32 %v4216_v4, %v1411_v22 }
 0x1f6   : > { %v1143_v10 = vmul.f32 %v3441_v3, %v1142_v23  ;;  %v1149_v50 = vmul.f32 %v3443_v26, %v1026_v8  ;;  %677 = vperm.xlu2 %3411, %v518_v21   ;;  %vm1155_vm8 = vweird.f32 %v3443_v26  ;;  %v835_v21 = vmul.f32 %v4021_v62, %v4154_v20 }
 0x1f7   : > { %vm1478_vm7 = vcmp.ge.f32.partialorder %v1446_v29, 0.0  ;;  %v1510_v30 = vmul.f32 0.01, %v1446_v29  ;;  %vm1156_vm10 = vmor %vm1154_vm9, %vm1155_vm8  ;;  %v836_v20 = vmul.f32 %v4021_v62, %v4169_v31 }
 0x1f8   : > { %v1150_v34 = vmul.f32 %v3443_v26, %v1149_v50  ;;  %v1147_v2 = vsel %vm1146_vm6, %v3441_v3, %v1143_v10  ;;  %v4341_v3 = vadd.f32 %v3959_v15, %v712_v13  ;;  %v4362_v23 = vsub.f32 %v4024_v63, %v835_v21 }
 0x1f9   : > { %v1542_v54 = vsel %vm1478_vm7, %v1446_v29, %v1510_v30  ;;  %v1377_v35 = vmul.f32 %v1147_v2, %v4108_v60  ;;  %v710_v10 = vmul.f32 %v3954_v14, %v4314_v53  ;;  %v4380_v2 = vsub.f32 %v4036_v7, %v836_v20 }
 0x1fa   : > { %v1151_v37 = vmul.f32 0.5, %v1150_v34  ;;  %1626 = vmatmul.f32.gmra.mxu0 %v1542_v54  ;;  %v899_v29 = vmul.f32 %v4362_v23, %v4362_v23 }
 0x1fb   : > { %v1412_v16 = vmul.f32 %v4200_v19, %v1377_v35  ;;  %v4372_v34 = vadd.f32 %v3959_v15, %v710_v10  ;;  %v900_v31 = vmul.f32 %v4380_v2, %v4380_v2 }
 0x1fc   : > { %v1152_v40 = vsub.f32 1.5, %v1151_v37 }
 0x1fd   : > { %v1447_v39 = vadd.f32 %v4216_v4, %v1412_v16 }
 0x1fe   : > { %v1153_v41 = vmul.f32 %v3443_v26, %v1152_v40  ;;  %632 = vperm.xlu2 %3411, %v509_v49   ;;  %v838_v40 = vmul.f32 %v4021_v62, %v4251_v45 }
 0x1ff   : > { %vm1479_vm11 = vcmp.ge.f32.partialorder %v1447_v39, 0.0  ;;  %v1511_v42 = vmul.f32 0.01, %v1447_v39 }
 0x200   : > { %v1157_v51 = vsel %vm1156_vm10, %v3443_v26, %v1153_v41 }
 0x201   : > { %v1543_v33 = vsel %vm1479_vm11, %v1447_v39, %v1511_v42  ;;  %v1378_v60 = vmul.f32 %v1157_v51, %v4127_v5 }
 0x202   : > { %1629 = vmatmul.f32.gmra.mxu0 %v1543_v33  ;;  %v673_v0 = vpop.permute.xlu1 %672 }
 0x203   : > { %v1413_v1 = vmul.f32 %v4200_v19, %v1378_v60  ;;  %v713_v43 = vmul.f32 %v3954_v14, %v673_v0 }
 0x205   : > { %v1448_v55 = vadd.f32 %v4216_v4, %v1413_v1  ;;  %v4351_v25 = vadd.f32 %v3959_v15, %v713_v43 }
 0x207   : > { %vm1480_vm12 = vcmp.ge.f32.partialorder %v1448_v55, 0.0  ;;  %v1512_v56 = vmul.f32 0.01, %v1448_v55 }
 0x209   : > { %v1544_v57 = vsel %vm1480_vm12, %v1448_v55, %v1512_v56 }
 0x20a   : > { %1632 = vmatmul.f32.gmra.mxu0 %v1544_v57 }
 0x20c   : > { %v784_v58 = vpop.xlane.xlu0 %783 }
 0x20d   : > { %v839_v51 = vmul.f32 %v4021_v62, %v784_v58  ;;  %v638_v58 = vpop.permute.xlu1 %637 }
 0x20f   : > { %v4419_v33 = vsub.f32 %v4182_v59, %v839_v51 }
 0x211   : > { %v903_v60 = vmul.f32 %v4419_v33, %v4419_v33 }
 0x214   : > { %v786_v44 = vpop.xlane.xlu0 %785 }
 0x215   : > { %v840_v24 = vmul.f32 %v4021_v62, %v786_v44 }
 0x217   : > { %v4329_v48 = vsub.f32 %v4205_v27, %v840_v24  ;;  %v703_v27 = vmul.f32 %v3954_v14, %v623_v52 }
 0x219   : > { %v904_v5 = vmul.f32 %v4329_v48, %v4329_v48  ;;  %v4346_v6 = vadd.f32 %v3959_v15, %v703_v27 }
 0x21b   : > { %952 = vadd.xlane.f32.xlu1 %v904_v5 }
 0x223   : > { %v4455_v20 = vpop.f32.mrf.mxu0 }
 0x227   : > { %787 = vadd.xlane.f32.xlu2 %v4336_v46 }
 0x22d   : > { %v4462_v51 = vpop.f32.mrf.mxu0 }
 0x22f   : > { %811 = vadd.xlane.f32.xlu2 %v4341_v3 }
 0x231   : > { %v802_v8 = vpop.xlane.xlu2 %801 }
 0x232   : > { %v848_v41 = vmul.f32 %v4021_v62, %v802_v8 }
 0x234   : > { %v4413_v42 = vsub.f32 %v4271_v28, %v848_v41 }
 0x236   : > { %v912_v45 = vmul.f32 %v4413_v42, %v4413_v42 }
 0x237   : > { %793 = vadd.xlane.f32.xlu2 %v4346_v6 }
 0x239   : > { %v804_v9 = vpop.xlane.xlu2 %803 }
 0x23e   : > { %v947_v27 = vpop.xlane.xlu1 %946 }
 0x23f   : > { %813 = vadd.xlane.f32.xlu2 %v4351_v25  ;;  %v997_v0 = vmul.f32 %v947_v27, %v4021_v62 }
 0x241   : > { %v653_v11 = vpop.permute.xlu2 %652 }
 0x242   : > { %v709_v12 = vmul.f32 %v3954_v14, %v653_v11  ;;  %v1029_v11 = vadd.f32 1e-05, %v997_v0 }
 0x244   : > { %v4358_v22 = vadd.f32 %v3959_v15, %v709_v12  ;;  %vm1184_vm2 = vweird.f32 %v1029_v11 }
 0x246   : > { %805 = vadd.xlane.f32.xlu0 %v4358_v22 }
 0x249   : > { %v618_v26 = vpop.permute.xlu2 %617 }
 0x24e   : > { %942 = vadd.xlane.f32.xlu0 %v899_v29 }
 0x251   : > { %v628_v50 = vpop.permute.xlu2 %627 }
 0x252   : > { %v704_v30 = vmul.f32 %v3954_v14, %v628_v50  ;;  %v3678_v14 = vld [vmem:[%s5919_s1] ss:$0 sm:$0xff] }
 0x253   : > { %v701_v7 = vmul.f32 %v3678_v14, %v4292_v47  ;;  %v711_v37 = vmul.f32 %v3678_v14, %v4302_v36  ;;  %v702_v16 = vmul.f32 %v3678_v14, %v618_v26  ;;  %v4407_v47 = vsub.f32 %v4082_v38, %v838_v40 }
 0x254   : > { %v4375_v63 = vadd.f32 %v3959_v15, %v704_v30  ;;  %v3679_v15 = vld [vmem:[%s5920_s2] ss:$0 sm:$0xff]  ;;  %v849_v38 = vmul.f32 %v4021_v62, %v804_v9  ;;  %v706_v24 = vmul.f32 %v3678_v14, %v638_v58 }
 0x255   : > { %v4394_v32 = vadd.f32 %v3679_v15, %v701_v7  ;;  %v4398_v49 = vadd.f32 %v3679_v15, %v711_v37  ;;  %v4403_v39 = vadd.f32 %v3679_v15, %v702_v16  ;;  %v902_v36 = vmul.f32 %v4407_v47, %v4407_v47 }
 0x256   : > { %807 = vadd.xlane.f32.xlu0 %v4372_v34  ;;  %795 = vadd.xlane.f32.xlu2 %v4375_v63  ;;  %v4425_v1 = vsub.f32 %v4283_v17, %v849_v38  ;;  %v4438_v5 = vadd.f32 %v3679_v15, %v706_v24 }
 0x258   : > { %v913_v52 = vmul.f32 %v4425_v1, %v4425_v1 }
 0x259   : > { %v678_v53 = vpop.permute.xlu2 %677 }
 0x25a   : > { %v714_v54 = vmul.f32 %v3678_v14, %v678_v53 }
 0x25c   : > { %v4390_v35 = vadd.f32 %v3679_v15, %v714_v54 }
 0x25e   : > { %944 = vadd.xlane.f32.xlu0 %v900_v31  ;;  %815 = vadd.xlane.f32.xlu2 %v4390_v35 }
 0x261   : > { %v633_v28 = vpop.permute.xlu2 %632 }
 0x262   : > { %v705_v55 = vmul.f32 %v3678_v14, %v633_v28 }
 0x264   : > { %v4430_v59 = vadd.f32 %v3679_v15, %v705_v55 }
 0x266   : > { %789 = vadd.xlane.f32.xlu0 %v4394_v32 }
 0x26e   : > { %809 = vadd.xlane.f32.xlu0 %v4398_v49 }
 0x276   : > { %791 = vadd.xlane.f32.xlu0 %v4403_v39 }
 0x27e   : > { %948 = vadd.xlane.f32.xlu0 %v902_v36 }
 0x286   : > { %968 = vadd.xlane.f32.xlu0 %v912_v45 }
 0x28e   : > { %950 = vadd.xlane.f32.xlu0 %v903_v60 }
 0x296   : > { %970 = vadd.xlane.f32.xlu0 %v913_v52 }
 0x29a   : > { %v788_v56 = vpop.xlane.xlu2 %787 }
 0x29b   : > { %v841_v57 = vmul.f32 %v4021_v62, %v788_v56 }
 0x29d   : > { %v4433_v44 = vsub.f32 %v4336_v46, %v841_v57 }
 0x29e   : > { %797 = vadd.xlane.f32.xlu0 %v4430_v59 }
 0x29f   : > { %v905_v17 = vmul.f32 %v4433_v44, %v4433_v44 }
 0x2a1   : > { %954 = vadd.xlane.f32.xlu1 %v905_v17 }
 0x2a2   : > { %v812_v21 = vpop.xlane.xlu2 %811 }
 0x2a6   : > { %799 = vadd.xlane.f32.xlu0 %v4438_v5 }
 0x2aa   : > { %v794_v14 = vpop.xlane.xlu2 %793 }
 0x2b2   : > { %v814_v60 = vpop.xlane.xlu2 %813 }
 0x2b9   : > { %v806_v61 = vpop.xlane.xlu0 %805 }
 0x2ba   : > { %v850_v13 = vmul.f32 %v4021_v62, %v806_v61  ;;  %v853_v61 = vmul.f32 %v4021_v62, %v812_v21 }
 0x2bc   : > { %v4443_v8 = vsub.f32 %v4358_v22, %v850_v13  ;;  %v4478_v21 = vsub.f32 %v4341_v3, %v853_v61 }
 0x2be   : > { %v914_v46 = vmul.f32 %v4443_v8, %v4443_v8 }
 0x2c0   : > { %972 = vadd.xlane.f32.xlu2 %v914_v46 }
 0x2c1   : > { %v943_v43 = vpop.xlane.xlu0 %942 }
 0x2c2   : > { %v995_v9 = vmul.f32 %v943_v43, %v4021_v62 }
 0x2c4   : > { %v1027_v12 = vadd.f32 1e-05, %v995_v9 }
 0x2c6   : > { %3444 = vrsqrt.f32 %v1027_v12  ;;  %vm1164_vm14 = vweird.f32 %v1027_v12 }
 0x2c7   : > { %3446 = vrsqrt.f32 %v1029_v11 }
 0x2c9   : > { %v808_v26 = vpop.xlane.xlu0 %807  ;;  %v796_v43 = vpop.xlane.xlu2 %795 }
 0x2ca   : > { %v851_v29 = vmul.f32 %v4021_v62, %v808_v26  ;;  %v4480_v26 = vpop.f32.mrf.mxu0  ;;  %v845_v3 = vmul.f32 %v4021_v62, %v796_v43 }
 0x2cc   : > { %v3445_v10 = vpop.eup %3444  ;;  %v4451_v22 = vsub.f32 %v4372_v34, %v851_v29 }
 0x2cd   : > { %v4453_v50 = vpop.eup %3446  ;;  %v1159_v30 = vmul.f32 %v3445_v10, %v1027_v12  ;;  %vm1165_vm13 = vweird.f32 %v3445_v10 }
 0x2ce   : > { %v915_v53 = vmul.f32 %v4451_v22, %v4451_v22  ;;  %v1179_v31 = vmul.f32 %v4453_v50, %v1029_v11  ;;  %vm1166_vm15 = vmor %vm1164_vm14, %vm1165_vm13  ;;  %vm1185_vm1 = vweird.f32 %v4453_v50  ;;  %v844_v11 = vmul.f32 %v4021_v62, %v794_v14 }
 0x2cf   : > { %v1160_v54 = vmul.f32 %v3445_v10, %v1159_v30  ;;  %vm4482_vm3 = vmor %vm1184_vm2, %vm1185_vm1  ;;  %v4501_v14 = vsub.f32 %v4375_v63, %v845_v3 }
 0x2d0   : > { %974 = vadd.xlane.f32.xlu2 %v915_v53  ;;  %v1180_v34 = vmul.f32 %v4453_v50, %v1179_v31  ;;  %v917_v31 = vmul.f32 %v4478_v21, %v4478_v21 }
 0x2d1   : > { %v1161_v15 = vmul.f32 0.5, %v1160_v54  ;;  %v945_v7 = vpop.xlane.xlu0 %944  ;;  %v909_v63 = vmul.f32 %v4501_v14, %v4501_v14 }
 0x2d2   : > { %v996_v37 = vmul.f32 %v945_v7, %v4021_v62  ;;  %v1181_v45 = vmul.f32 0.5, %v1180_v34 }
 0x2d3   : > { %v1162_v16 = vsub.f32 1.5, %v1161_v15 }
 0x2d4   : > { %v1028_v40 = vadd.f32 1e-05, %v996_v37  ;;  %v1182_v57 = vsub.f32 1.5, %v1181_v45 }
 0x2d5   : > { %v1163_v41 = vmul.f32 %v3445_v10, %v1162_v16  ;;  %v4504_v16 = vsub.f32 %v4346_v6, %v844_v11 }
 0x2d6   : > { %3448 = vrsqrt.f32 %v1028_v40  ;;  %v1183_v46 = vmul.f32 %v4453_v50, %v1182_v57  ;;  %vm1174_vm5 = vweird.f32 %v1028_v40 }
 0x2d7   : > { %v1167_v36 = vsel %vm1166_vm15, %v3445_v10, %v1163_v41  ;;  %v816_v41 = vpop.xlane.xlu2 %815  ;;  %v908_v6 = vmul.f32 %v4504_v16, %v4504_v16 }
 0x2d8   : > { %v1379_v38 = vmul.f32 %v1167_v36, %v4362_v23  ;;  %v1187_v30 = vsel %vm4482_vm3, %v4453_v50, %v1183_v46  ;;  %v953_v36 = vpop.xlane.xlu1 %952 }
 0x2d9   : > { %v790_v28 = vpop.xlane.xlu0 %789 }
 0x2da   : > { %v842_v52 = vmul.f32 %v4021_v62, %v790_v28  ;;  %v1414_v55 = vmul.f32 %v4200_v19, %v1379_v38  ;;  %v1612_v38 = vpop.f32.mrf.mxu0  ;;  %v855_v28 = vmul.f32 %v4021_v62, %v816_v41 }
 0x2dc   : > { %v3449_v56 = vpop.eup %3448  ;;  %v4468_v58 = vsub.f32 %v4394_v32, %v842_v52  ;;  %v1449_v17 = vadd.f32 %v4216_v4, %v1414_v55  ;;  %v4524_v61 = vsub.f32 %v4390_v35, %v855_v28 }
 0x2dd   : > { %v1169_v24 = vmul.f32 %v3449_v56, %v1028_v40  ;;  %vm1175_vm4 = vweird.f32 %v3449_v56 }
 0x2de   : > { %v906_v13 = vmul.f32 %v4468_v58, %v4468_v58  ;;  %vm1481_vm0 = vcmp.ge.f32.partialorder %v1449_v17, 0.0  ;;  %v1513_v23 = vmul.f32 0.01, %v1449_v17  ;;  %vm1176_vm6 = vmor %vm1174_vm5, %vm1175_vm4 }
 0x2df   : > { %v1170_v27 = vmul.f32 %v3449_v56, %v1169_v24 }
 0x2e0   : > { %956 = vadd.xlane.f32.xlu1 %v906_v13  ;;  %v1545_v0 = vsel %vm1481_vm0, %v1449_v17, %v1513_v23 }
 0x2e1   : > { %v1171_v32 = vmul.f32 0.5, %v1170_v27  ;;  %1635 = vmatmul.f32.gmra.mxu0 %v1545_v0  ;;  %v810_v9 = vpop.xlane.xlu0 %809  ;;  %v919_v0 = vmul.f32 %v4524_v61, %v4524_v61 }
 0x2e2   : > { %v852_v12 = vmul.f32 %v4021_v62, %v810_v9  ;;  %v4534_v43 = vpop.f32.mrf.mxu0  ;;  %v4542_v9 = vld [vmem:[%s5924_s6] ss:$0 sm:$0xff] }
 0x2e3   : > { %v1172_v10 = vsub.f32 1.5, %v1171_v32  ;;  %v4549_v3 = vadd.f32 %v4542_v9, %v4455_v20 }
 0x2e4   : > { %v4490_v53 = vsub.f32 %v4398_v49, %v852_v12  ;;  %v1381_v49 = vmul.f32 %v1187_v30, %v4290_v18 }
 0x2e5   : > { %v1173_v54 = vmul.f32 %v3449_v56, %v1172_v10 }
 0x2e6   : > { %v916_v15 = vmul.f32 %v4490_v53, %v4490_v53  ;;  %v1416_v18 = vmul.f32 %v4200_v19, %v1381_v49 }
 0x2e7   : > { %v1177_v7 = vsel %vm1176_vm6, %v3449_v56, %v1173_v54  ;;  %v854_v56 = vmul.f32 %v4021_v62, %v814_v60 }
 0x2e8   : > { %978 = vadd.xlane.f32.xlu1 %v917_v31  ;;  %976 = vadd.xlane.f32.xlu0 %v916_v15  ;;  %v1380_v50 = vmul.f32 %v1177_v7, %v4380_v2  ;;  %v1451_v17 = vadd.f32 %v4216_v4, %v1416_v18 }
 0x2e9   : > { %v792_v37 = vpop.xlane.xlu0 %791  ;;  %v4530_v27 = vsub.f32 %v4351_v25, %v854_v56 }
 0x2ea   : > { %v843_v34 = vmul.f32 %v4021_v62, %v792_v37  ;;  %v1415_v40 = vmul.f32 %v4200_v19, %v1380_v50  ;;  %v1515_v60 = vmul.f32 0.01, %v1451_v17  ;;  %vm1483_vm8 = vcmp.ge.f32.partialorder %v1451_v17, 0.0  ;;  %v4554_v15 = vpop.f32.mrf.mxu0 }
 0x2eb   : > { %v918_v35 = vmul.f32 %v4530_v27, %v4530_v27 }
 0x2ec   : > { %v4509_v45 = vsub.f32 %v4403_v39, %v843_v34  ;;  %v1450_v2 = vadd.f32 %v4216_v4, %v1415_v40  ;;  %v1000_v39 = vmul.f32 %v953_v36, %v4021_v62  ;;  %v1547_v32 = vsel %vm1483_vm8, %v1451_v17, %v1515_v60 }
 0x2ee   : > { %v907_v52 = vmul.f32 %v4509_v45, %v4509_v45  ;;  %vm1482_vm7 = vcmp.ge.f32.partialorder %v1450_v2, 0.0  ;;  %v1514_v55 = vmul.f32 0.01, %v1450_v2  ;;  %v4527_v23 = vadd.f32 1e-05, %v1000_v39 }
 0x2f0   : > { %962 = vadd.xlane.f32.xlu1 %v909_v63  ;;  %960 = vadd.xlane.f32.xlu0 %v908_v6  ;;  %v1546_v57 = vsel %vm1482_vm7, %v1450_v2, %v1514_v55  ;;  %v4559_v2 = vadd.f32 %v4542_v9, %v1612_v38  ;;  %vm1214_vm1 = vweird.f32 %v4527_v23 }
 0x2f1   : > { %958 = vadd.xlane.f32.xlu2 %v907_v52  ;;  %1638 = vmatmul.f32.gmra.mxu0 %v1546_v57  ;;  %v949_v24 = vpop.xlane.xlu0 %948 }
 0x2f2   : > { %v998_v13 = vmul.f32 %v949_v24, %v4021_v62  ;;  %v1621_v57 = vpop.f32.mrf.mxu0 }
 0x2f4   : > { %v1030_v46 = vadd.f32 1e-05, %v998_v13 }
 0x2f6   : > { %3450 = vrsqrt.f32 %v1030_v46  ;;  %vm1194_vm10 = vweird.f32 %v1030_v46 }
 0x2f7   : > { %3452 = vrsqrt.f32 %v4527_v23 }
 0x2f8   : > { %982 = vadd.xlane.f32.xlu0 %v919_v0 }
 0x2f9   : > { %980 = vadd.xlane.f32.xlu2 %v918_v35  ;;  %1641 = vmatmul.f32.gmra.mxu0 %v1547_v32  ;;  %v969_v25 = vpop.xlane.xlu0 %968  ;;  %v4567_v35 = vadd.f32 %v4542_v9, %v1621_v57 }
 0x2fa   : > { %v1008_v12 = vmul.f32 %v969_v25, %v4021_v62 }
 0x2fc   : > { %v3451_v29 = vpop.eup %3450  ;;  %v1040_v10 = vadd.f32 1e-05, %v1008_v12 }
 0x2fd   : > { %v4545_v30 = vpop.eup %3452  ;;  %v1189_v11 = vmul.f32 %v3451_v29, %v1030_v46  ;;  %vm1195_vm9 = vweird.f32 %v3451_v29 }
 0x2fe   : > { %3454 = vrsqrt.f32 %v1040_v10  ;;  %v1209_v31 = vmul.f32 %v4545_v30, %v4527_v23  ;;  %vm1196_vm11 = vmor %vm1194_vm10, %vm1195_vm9  ;;  %vm1294_vm13 = vweird.f32 %v1040_v10  ;;  %vm1215_vm0 = vweird.f32 %v4545_v30 }
 0x2ff   : > { %v1190_v54 = vmul.f32 %v3451_v29, %v1189_v11  ;;  %vm4576_vm2 = vmor %vm1214_vm1, %vm1215_vm0 }
 0x300   : > { %1699 = vmax.xlane.f32.xlu0 %v4549_v3  ;;  %v1210_v40 = vmul.f32 %v4545_v30, %v1209_v31 }
 0x301   : > { %v1191_v7 = vmul.f32 0.5, %v1190_v54  ;;  %v951_v50 = vpop.xlane.xlu0 %950 }
 0x302   : > { %v999_v49 = vmul.f32 %v951_v50, %v4021_v62  ;;  %v1211_v6 = vmul.f32 0.5, %v1210_v40  ;;  %v4626_v50 = vadd.f32 %v4542_v9, %v4534_v43 }
 0x303   : > { %v1192_v37 = vsub.f32 1.5, %v1191_v7 }
 0x304   : > { %v3455_v34 = vpop.eup %3454  ;;  %v1031_v20 = vadd.f32 1e-05, %v999_v49  ;;  %v1212_v24 = vsub.f32 1.5, %v1211_v6 }
 0x305   : > { %v1193_v41 = vmul.f32 %v3451_v29, %v1192_v37  ;;  %v1289_v36 = vmul.f32 %v3455_v34, %v1040_v10  ;;  %vm1295_vm12 = vweird.f32 %v3455_v34 }
 0x306   : > { %3456 = vrsqrt.f32 %v1031_v20  ;;  %vm1296_vm14 = vmor %vm1294_vm13, %vm1295_vm12  ;;  %v1213_v12 = vmul.f32 %v4545_v30, %v1212_v24  ;;  %vm1204_vm4 = vweird.f32 %v1031_v20 }
 0x307   : > { %v1290_v18 = vmul.f32 %v3455_v34, %v1289_v36  ;;  %v1197_v63 = vsel %vm1196_vm11, %v3451_v29, %v1193_v41 }
 0x308   : > { %1705 = vmax.xlane.f32.xlu0 %v4559_v2  ;;  %v1382_v28 = vmul.f32 %v1197_v63, %v4407_v47 }
 0x309   : > { %v1291_v52 = vmul.f32 0.5, %v1290_v18  ;;  %v971_v55 = vpop.xlane.xlu0 %970 }
 0x30a   : > { %v1009_v39 = vmul.f32 %v971_v55, %v4021_v62  ;;  %v1417_v56 = vmul.f32 %v4200_v19, %v1382_v28 }
 0x30b   : > { %v1292_v17 = vsub.f32 1.5, %v1291_v52 }
 0x30c   : > { %v3457_v38 = vpop.eup %3456  ;;  %v1041_v13 = vadd.f32 1e-05, %v1009_v39  ;;  %v1452_v46 = vadd.f32 %v4216_v4, %v1417_v56  ;;  %v4596_v56 = vld [vmem:[%s5921_s3] ss:$0 sm:$0xff] }
 0x30d   : > { %v1293_v60 = vmul.f32 %v3455_v34, %v1292_v17  ;;  %v1199_v0 = vmul.f32 %v3457_v38, %v1031_v20  ;;  %vm1205_vm3 = vweird.f32 %v3457_v38 }
 0x30e   : > { %3458 = vrsqrt.f32 %v1041_v13  ;;  %vm1484_vm15 = vcmp.ge.f32.partialorder %v1452_v46, 0.0  ;;  %v1516_v47 = vmul.f32 0.01, %v1452_v46  ;;  %vm1206_vm5 = vmor %vm1204_vm4, %vm1205_vm3  ;;  %vm1304_vm8 = vweird.f32 %v1041_v13 }
 0x30f   : > { %v1200_v32 = vmul.f32 %v3457_v38, %v1199_v0  ;;  %v1297_v25 = vsel %vm1296_vm14, %v3455_v34, %v1293_v60  ;;  %v4611_v60 = vadd.f32 %v4542_v9, %v4462_v51 }
 0x310   : > { %1711 = vmax.xlane.f32.xlu0 %v4567_v35  ;;  %v1548_v29 = vsel %vm1484_vm15, %v1452_v46, %v1516_v47  ;;  %v1392_v11 = vmul.f32 %v1297_v25, %v4413_v42  ;;  %v1217_v42 = vsel %vm4576_vm2, %v4545_v30, %v1213_v12 }
 0x311   : > { %v1201_v10 = vmul.f32 0.5, %v1200_v32  ;;  %1644 = vmatmul.f32.gmra.mxu0 %v1548_v29  ;;  %v798_v54 = vpop.xlane.xlu0 %797 }
 0x312   : > { %v846_v31 = vmul.f32 %v4021_v62, %v798_v54  ;;  %v1427_v7 = vmul.f32 %v4200_v19, %v1392_v11 }
 0x313   : > { %v1202_v49 = vsub.f32 1.5, %v1201_v10 }
 0x314   : > { %v3459_v37 = vpop.eup %3458  ;;  %v4584_v34 = vsub.f32 %v4430_v59, %v846_v31  ;;  %v955_v40 = vpop.xlane.xlu1 %954  ;;  %v1462_v23 = vadd.f32 %v4216_v4, %v1427_v7  ;;  %v1384_v59 = vmul.f32 %v1217_v42, %v4329_v48  ;;  %v4622_v7 = vadd.f32 %v4542_v9, %v4480_v26 }
 0x315   : > { %v1203_v41 = vmul.f32 %v3457_v38, %v1202_v49  ;;  %v1299_v19 = vmul.f32 %v3459_v37, %v1041_v13  ;;  %v1001_v36 = vmul.f32 %v955_v40, %v4021_v62  ;;  %vm1305_vm7 = vweird.f32 %v3459_v37 }
 0x316   : > { %v910_v18 = vmul.f32 %v4584_v34, %v4584_v34  ;;  %vm1494_vm6 = vcmp.ge.f32.partialorder %v1462_v23, 0.0  ;;  %v1526_v63 = vmul.f32 0.01, %v1462_v23  ;;  %v1419_v48 = vmul.f32 %v4596_v56, %v1384_v59  ;;  %vm1306_vm9 = vmor %vm1304_vm8, %vm1305_vm7 }
 0x317   : > { %v1300_v6 = vmul.f32 %v3459_v37, %v1299_v19  ;;  %v1033_v28 = vadd.f32 1e-05, %v1001_v36  ;;  %v1207_v30 = vsel %vm1206_vm5, %v3457_v38, %v1203_v41  ;;  %v4634_v41 = vadd.f32 %v4542_v9, %v4554_v15 }
 0x318   : > { %964 = vadd.xlane.f32.xlu2 %v910_v18  ;;  %v1558_v52 = vsel %vm1494_vm6, %v1462_v23, %v1526_v63  ;;  %v1383_v4 = vmul.f32 %v1207_v30, %v4419_v33  ;;  %v4606_v33 = vld [vmem:[%s5922_s4] ss:$0 sm:$0xff]  ;;  %v1624_v18 = vpop.f32.mrf.mxu0 }
 0x319   : > { %v1301_v55 = vmul.f32 0.5, %v1300_v6  ;;  %3460 = vrsqrt.f32 %v1033_v28  ;;  %1674 = vmatmul.f32.vlgmr.msra.gmra.mxu3 %v1558_v52  ;;  %v800_v20 = vpop.xlane.xlu0 %799  ;;  %v1454_v25 = vadd.f32 %v4606_v33, %v1419_v48  ;;  %vm1224_vm14 = vweird.f32 %v1033_v28 }
 0x31a   : > { %v847_v39 = vmul.f32 %v4021_v62, %v800_v20  ;;  %v1418_v57 = vmul.f32 %v4596_v56, %v1383_v4 }
 0x31b   : > { %v1302_v17 = vsub.f32 1.5, %v1301_v55  ;;  %v1518_v54 = vmul.f32 0.01, %v1454_v25  ;;  %vm1486_vm11 = vcmp.ge.f32.partialorder %v1454_v25, 0.0 }
 0x31c   : > { %v4601_v38 = vsub.f32 %v4438_v5, %v847_v39  ;;  %v1453_v24 = vadd.f32 %v4606_v33, %v1418_v57 }
 0x31d   : > { %v1303_v46 = vmul.f32 %v3459_v37, %v1302_v17  ;;  %v1550_v42 = vsel %vm1486_vm11, %v1454_v25, %v1518_v54 }
 0x31e   : > { %v911_v0 = vmul.f32 %v4601_v38, %v4601_v38  ;;  %vm1485_vm10 = vcmp.ge.f32.partialorder %v1453_v24, 0.0  ;;  %v1517_v5 = vmul.f32 0.01, %v1453_v24 }
 0x31f   : > { %v3461_v47 = vpop.eup %3460  ;;  %v1307_v32 = vsel %vm1306_vm9, %v3459_v37, %v1303_v46 }
 0x320   : > { %v1219_v12 = vmul.f32 %v3461_v47, %v1033_v28  ;;  %1701 = vmax.xlane.f32.xlu2 %v4611_v60  ;;  %966 = vadd.xlane.f32.xlu1 %v911_v0  ;;  %v1549_v29 = vsel %vm1485_vm10, %v1453_v24, %v1517_v5  ;;  %v1393_v13 = vmul.f32 %v1307_v32, %v4425_v1  ;;  %vm1225_vm12 = vweird.f32 %v3461_v47 }
 0x321   : > { %1647 = vmatmul.f32.gmra.mxu0 %v1549_v29  ;;  %vm1226_vm15 = vmor %vm1224_vm14, %vm1225_vm12 }
 0x322   : > { %v1220_v51 = vmul.f32 %v3461_v47, %v1219_v12  ;;  %v1428_v11 = vmul.f32 %v4596_v56, %v1393_v13 }
 0x324   : > { %v1221_v10 = vmul.f32 0.5, %v1220_v51  ;;  %v1463_v31 = vadd.f32 %v4606_v33, %v1428_v11 }
 0x326   : > { %v1222_v49 = vsub.f32 1.5, %v1221_v10  ;;  %vm1495_vm13 = vcmp.ge.f32.partialorder %v1463_v31, 0.0  ;;  %v1527_v1 = vmul.f32 0.01, %v1463_v31 }
 0x328   : > { %v1223_v37 = vmul.f32 %v3461_v47, %v1222_v49  ;;  %1707 = vmax.xlane.f32.xlu2 %v4626_v50  ;;  %1703 = vmax.xlane.f32.xlu1 %v4622_v7  ;;  %v1559_v40 = vsel %vm1495_vm13, %v1463_v31, %v1527_v1 }
 0x329   : > { %1650 = vmatmul.f32.gmra.mxu0 %v1550_v42  ;;  %1677 = vmatmul.f32.gmra.mxu3 %v1559_v40 }
 0x32a   : > { %v1227_v26 = vsel %vm1226_vm15, %v3461_v47, %v1223_v37 }
 0x32b   : > { %v1385_v43 = vmul.f32 %v1227_v26, %v4433_v44  ;;  %v4640_v44 = vadd.f32 %v4542_v9, %v1624_v18 }
 0x32d   : > { %v1420_v23 = vmul.f32 %v4596_v56, %v1385_v43 }
 0x32f   : > { %v1455_v19 = vadd.f32 %v4606_v33, %v1420_v23 }
 0x330   : > { %1709 = vmax.xlane.f32.xlu1 %v4634_v41 }
 0x331   : > { %vm1487_vm0 = vcmp.ge.f32.partialorder %v1455_v19, 0.0  ;;  %v1519_v36 = vmul.f32 0.01, %v1455_v19 }
 0x333   : > { %v973_v63 = vpop.xlane.xlu2 %972  ;;  %v1551_v6 = vsel %vm1487_vm0, %v1455_v19, %v1519_v36 }
 0x334   : > { %v1010_v28 = vmul.f32 %v973_v63, %v4021_v62  ;;  %1653 = vmatmul.f32.gmra.mxu0 %v1551_v6 }
 0x336   : > { %v1042_v30 = vadd.f32 1e-05, %v1010_v28 }
 0x338   : > { %3462 = vrsqrt.f32 %v1042_v30  ;;  %1713 = vmax.xlane.f32.xlu1 %v4640_v44  ;;  %vm1314_vm2 = vweird.f32 %v1042_v30 }
 0x33e   : > { %v3463_v15 = vpop.eup %3462 }
 0x33f   : > { %v1309_v59 = vmul.f32 %v3463_v15, %v1042_v30  ;;  %vm1315_vm1 = vweird.f32 %v3463_v15 }
 0x340   : > { %vm1316_vm3 = vmor %vm1314_vm2, %vm1315_vm1 }
 0x341   : > { %v1310_v52 = vmul.f32 %v3463_v15, %v1309_v59 }
 0x343   : > { %v1311_v4 = vmul.f32 0.5, %v1310_v52  ;;  %v975_v55 = vpop.xlane.xlu2 %974 }
 0x344   : > { %v1011_v20 = vmul.f32 %v975_v55, %v4021_v62 }
 0x345   : > { %v1312_v39 = vsub.f32 1.5, %v1311_v4 }
 0x346   : > { %v1043_v57 = vadd.f32 1e-05, %v1011_v20 }
 0x347   : > { %v1313_v17 = vmul.f32 %v3463_v15, %v1312_v39 }
 0x348   : > { %3464 = vrsqrt.f32 %v1043_v57  ;;  %vm1324_vm6 = vweird.f32 %v1043_v57 }
 0x349   : > { %v1317_v48 = vsel %vm1316_vm3, %v3463_v15, %v1313_v17 }
 0x34a   : > { %v1394_v24 = vmul.f32 %v1317_v48, %v4443_v8 }
 0x34c   : > { %v1429_v46 = vmul.f32 %v4596_v56, %v1394_v24 }
 0x34e   : > { %v3465_v0 = vpop.eup %3464  ;;  %v1464_v5 = vadd.f32 %v4606_v33, %v1429_v46 }
 0x34f   : > { %v1319_v47 = vmul.f32 %v3465_v0, %v1043_v57  ;;  %vm1325_vm5 = vweird.f32 %v3465_v0 }
 0x350   : > { %vm1496_vm4 = vcmp.ge.f32.partialorder %v1464_v5, 0.0  ;;  %v1528_v32 = vmul.f32 0.01, %v1464_v5  ;;  %vm1326_vm7 = vmor %vm1324_vm6, %vm1325_vm5 }
 0x351   : > { %v1320_v25 = vmul.f32 %v3465_v0, %v1319_v47 }
 0x352   : > { %v1560_v12 = vsel %vm1496_vm4, %v1464_v5, %v1528_v32 }
 0x353   : > { %v1321_v29 = vmul.f32 0.5, %v1320_v25  ;;  %v957_v13 = vpop.xlane.xlu1 %956  ;;  %1680 = vmatmul.f32.gmra.mxu3 %v1560_v12 }
 0x354   : > { %v1002_v51 = vmul.f32 %v957_v13, %v4021_v62  ;;  %v4674_v13 = vpop.f32.mrf.mxu0 }
 0x355   : > { %v1322_v11 = vsub.f32 1.5, %v1321_v29 }
 0x356   : > { %v1034_v10 = vadd.f32 1e-05, %v1002_v51 }
 0x357   : > { %v1323_v54 = vmul.f32 %v3465_v0, %v1322_v11 }
 0x358   : > { %3466 = vrsqrt.f32 %v1034_v10  ;;  %vm1234_vm10 = vweird.f32 %v1034_v10 }
 0x359   : > { %v1327_v8 = vsel %vm1326_vm7, %v3465_v0, %v1323_v54 }
 0x35a   : > { %v1395_v31 = vmul.f32 %v1327_v8, %v4451_v22 }
 0x35b   : > { %v979_v49 = vpop.xlane.xlu1 %978  ;;  %v977_v1 = vpop.xlane.xlu0 %976 }
 0x35c   : > { %v1013_v37 = vmul.f32 %v979_v49, %v4021_v62  ;;  %v1012_v42 = vmul.f32 %v977_v1, %v4021_v62  ;;  %v1430_v40 = vmul.f32 %v4596_v56, %v1395_v31 }
 0x35e   : > { %v3467_v26 = vpop.eup %3466  ;;  %v4652_v43 = vadd.f32 1e-05, %v1013_v37  ;;  %v1044_v23 = vadd.f32 1e-05, %v1012_v42  ;;  %v1465_v19 = vadd.f32 %v4606_v33, %v1430_v40 }
 0x35f   : > { %v1229_v36 = vmul.f32 %v3467_v26, %v1034_v10  ;;  %vm1235_vm9 = vweird.f32 %v3467_v26 }
 0x360   : > { %3468 = vrsqrt.f32 %v4652_v43  ;;  %vm1497_vm8 = vcmp.ge.f32.partialorder %v1465_v19, 0.0  ;;  %v1529_v22 = vmul.f32 0.01, %v1465_v19  ;;  %vm1236_vm11 = vmor %vm1234_vm10, %vm1235_vm9  ;;  %vm1334_vm12 = vweird.f32 %v1044_v23 }
 0x361   : > { %v1230_v18 = vmul.f32 %v3467_v26, %v1229_v36  ;;  %3470 = vrsqrt.f32 %v1044_v23  ;;  %vm1344_vm15 = vweird.f32 %v4652_v43 }
 0x362   : > { %v1561_v28 = vsel %vm1497_vm8, %v1465_v19, %v1529_v22 }
 0x363   : > { %v1231_v63 = vmul.f32 0.5, %v1230_v18  ;;  %v963_v6 = vpop.xlane.xlu1 %962  ;;  %v961_v30 = vpop.xlane.xlu0 %960  ;;  %1683 = vmatmul.f32.gmra.mxu3 %v1561_v28 }
 0x364   : > { %v1005_v15 = vmul.f32 %v963_v6, %v4021_v62  ;;  %v959_v59 = vpop.xlane.xlu2 %958  ;;  %v1004_v52 = vmul.f32 %v961_v30, %v4021_v62 }
 0x365   : > { %v1232_v4 = vsub.f32 1.5, %v1231_v63  ;;  %v1003_v55 = vmul.f32 %v959_v59, %v4021_v62 }
 0x366   : > { %v4659_v20 = vpop.eup %3468  ;;  %v4661_v39 = vadd.f32 1e-05, %v1005_v15  ;;  %v4663_v57 = vadd.f32 1e-05, %v1004_v52 }
 0x367   : > { %v3471_v17 = vpop.eup %3470  ;;  %v1233_v48 = vmul.f32 %v3467_v26, %v1232_v4  ;;  %v1339_v24 = vmul.f32 %v4659_v20, %v4652_v43  ;;  %v4667_v46 = vadd.f32 1e-05, %v1003_v55  ;;  %vm1345_vm14 = vweird.f32 %v4659_v20 }
 0x368   : > { %v1329_v0 = vmul.f32 %v3471_v17, %v1044_v23  ;;  %3472 = vrsqrt.f32 %v4661_v39  ;;  %vm1335_vm13 = vweird.f32 %v3471_v17  ;;  %vm4699_vm1 = vmor %vm1344_vm15, %vm1345_vm14  ;;  %vm1254_vm8 = vweird.f32 %v4663_v57 }
 0x369   : > { %v1237_v5 = vsel %vm1236_vm11, %v3467_v26, %v1233_v48  ;;  %v1340_v47 = vmul.f32 %v4659_v20, %v1339_v24  ;;  %3474 = vrsqrt.f32 %v4667_v46  ;;  %vm4693_vm0 = vmor %vm1334_vm12, %vm1335_vm13  ;;  %vm1244_vm5 = vweird.f32 %v4667_v46 }
 0x36a   : > { %v1330_v32 = vmul.f32 %v3471_v17, %v1329_v0  ;;  %3476 = vrsqrt.f32 %v4663_v57  ;;  %v1386_v25 = vmul.f32 %v1237_v5, %v4468_v58  ;;  %vm1264_vm11 = vweird.f32 %v4661_v39 }
 0x36b   : > { %v1341_v12 = vmul.f32 0.5, %v1340_v47  ;;  %v983_v29 = vpop.xlane.xlu0 %982  ;;  %v4713_v47 = vpop.f32.mrf.mxu0 }
 0x36c   : > { %v1331_v51 = vmul.f32 0.5, %v1330_v32  ;;  %v981_v11 = vpop.xlane.xlu2 %980  ;;  %v1015_v10 = vmul.f32 %v983_v29, %v4021_v62  ;;  %v1421_v54 = vmul.f32 %v4596_v56, %v1386_v25 }
 0x36d   : > { %v1342_v8 = vsub.f32 1.5, %v1341_v12  ;;  %v1014_v31 = vmul.f32 %v981_v11, %v4021_v62 }
 0x36e   : > { %v4679_v49 = vpop.eup %3472  ;;  %v1332_v1 = vsub.f32 1.5, %v1331_v51  ;;  %v4681_v37 = vadd.f32 1e-05, %v1015_v10  ;;  %v1456_v23 = vadd.f32 %v4606_v33, %v1421_v54 }
 0x36f   : > { %v3475_v58 = vpop.eup %3474  ;;  %v1343_v42 = vmul.f32 %v4659_v20, %v1342_v8  ;;  %v1259_v40 = vmul.f32 %v4679_v49, %v4661_v39  ;;  %v4687_v26 = vadd.f32 1e-05, %v1014_v31  ;;  %vm1265_vm6 = vweird.f32 %v4679_v49 }
 0x370   : > { %v3477_v19 = vpop.eup %3476  ;;  %v1333_v36 = vmul.f32 %v3471_v17, %v1332_v1  ;;  %v1239_v18 = vmul.f32 %v3475_v58, %v4667_v46  ;;  %3478 = vrsqrt.f32 %v4681_v37  ;;  %vm1488_vm2 = vcmp.ge.f32.partialorder %v1456_v23, 0.0  ;;  %vm4736_vm12 = vmor %vm1264_vm11, %vm1265_vm6 }
 0x371   : > { %v1260_v63 = vmul.f32 %v4679_v49, %v1259_v40  ;;  %v1249_v6 = vmul.f32 %v3477_v19, %v4663_v57  ;;  %3480 = vrsqrt.f32 %v4687_v26  ;;  %v1347_v43 = vsel %vm4699_vm1, %v4659_v20, %v1343_v42 }
 0x372   : > { %v1337_v30 = vsel %vm4693_vm0, %v3471_v17, %v1333_v36  ;;  %v1240_v15 = vmul.f32 %v3475_v58, %v1239_v18  ;;  %v1520_v48 = vmul.f32 0.01, %v1456_v23  ;;  %vm1245_vm3 = vweird.f32 %v3475_v58 }
 0x373   : > { %v1261_v59 = vmul.f32 0.5, %v1260_v63  ;;  %v1250_v52 = vmul.f32 %v3477_v19, %v1249_v6  ;;  %v1700_v4 = vpop.xlane.xlu0 %1699  ;;  %v1396_v5 = vmul.f32 %v1337_v30, %v4490_v53  ;;  %v1397_v20 = vmul.f32 %v1347_v43, %v4478_v21  ;;  %vm1246_vm7 = vmor %vm1244_vm5, %vm1245_vm3 }
 0x374   : > { %v1241_v55 = vmul.f32 0.5, %v1240_v15  ;;  %v1763_v24 = vsub.f32 %v4549_v3, %v1700_v4  ;;  %v1552_v25 = vsel %vm1488_vm2, %v1456_v23, %v1520_v48  ;;  %vm1255_vm4 = vweird.f32 %v3477_v19 }
 0x375   : > { %v1251_v0 = vmul.f32 0.5, %v1250_v52  ;;  %v1262_v29 = vsub.f32 1.5, %v1261_v59  ;;  %1656 = vmatmul.f32.gmra.mxu0 %v1552_v25  ;;  %v1431_v53 = vmul.f32 %v4596_v56, %v1396_v5  ;;  %vm1256_vm9 = vmor %vm1254_vm8, %vm1255_vm4  ;;  %v1432_v46 = vmul.f32 %v4596_v56, %v1397_v20  ;;  %v4747_v59 = vpop.f32.mrf.mxu0 }
 0x376   : > { %v4711_v17 = vpop.eup %3478  ;;  %v1242_v32 = vsub.f32 1.5, %v1241_v55  ;;  %v1795_v12 = vmul.f32 1.442695, %v1763_v24  ;;  %vm1364_vm15 = vweird.f32 %v4681_v37  ;;  %vm1354_vm0 = vweird.f32 %v4687_v26 }
 0x377   : > { %v1252_v51 = vsub.f32 1.5, %v1251_v0  ;;  %v1359_v11 = vmul.f32 %v4711_v17, %v4681_v37  ;;  %v3481_v3 = vpop.eup %3480  ;;  %v1466_v1 = vadd.f32 %v4606_v33, %v1431_v53  ;;  %v1263_v42 = vmul.f32 %v4679_v49, %v1262_v29 }
 0x378   : > { %v1243_v10 = vmul.f32 %v3475_v58, %v1242_v32  ;;  %3482 = vpow2.f32 %v1795_v12  ;;  %v1349_v21 = vmul.f32 %v3481_v3, %v4687_v26  ;;  %vm1365_vm13 = vweird.f32 %v4711_v17 }
 0x379   : > { %v1253_v54 = vmul.f32 %v3477_v19, %v1252_v51  ;;  %v1360_v31 = vmul.f32 %v4711_v17, %v1359_v11  ;;  %vm1498_vm10 = vcmp.ge.f32.partialorder %v1466_v1, 0.0  ;;  %v1530_v22 = vmul.f32 0.01, %v1466_v1  ;;  %vm4756_vm1 = vmor %vm1364_vm15, %vm1365_vm13 }
 0x37a   : > { %v1247_v8 = vsel %vm1246_vm7, %v3475_v58, %v1243_v10  ;;  %v1350_v36 = vmul.f32 %v3481_v3, %v1349_v21  ;;  %v1467_v39 = vadd.f32 %v4606_v33, %v1432_v46  ;;  %v1267_v15 = vsel %vm4736_vm12, %v4679_v49, %v1263_v42 }
 0x37b   : > { %v1257_v40 = vsel %vm1256_vm9, %v3477_v19, %v1253_v54  ;;  %v1387_v18 = vmul.f32 %v1247_v8, %v4509_v45  ;;  %v1361_v23 = vmul.f32 0.5, %v1360_v31  ;;  %v1706_v58 = vpop.xlane.xlu0 %1705  ;;  %v1562_v30 = vsel %vm1498_vm10, %v1466_v1, %v1530_v22 }
 0x37c   : > { %v1351_v57 = vmul.f32 0.5, %v1350_v36  ;;  %v1388_v6 = vmul.f32 %v1257_v40, %v4504_v16  ;;  %vm1355_vm14 = vweird.f32 %v3481_v3  ;;  %1686 = vmatmul.f32.gmra.mxu3 %v1562_v30  ;;  %v1766_v4 = vsub.f32 %v4559_v2, %v1706_v58 }
 0x37d   : > { %v1422_v63 = vmul.f32 %v4596_v56, %v1387_v18  ;;  %v1362_v45 = vsub.f32 1.5, %v1361_v23  ;;  %vm1356_vm3 = vmor %vm1354_vm0, %vm1355_vm14  ;;  %vm1499_vm4 = vcmp.ge.f32.partialorder %v1467_v39, 0.0  ;;  %v1531_v0 = vmul.f32 0.01, %v1467_v39 }
 0x37e   : > { %v4732_v28 = vpop.eup %3482  ;;  %v1352_v43 = vsub.f32 1.5, %v1351_v57  ;;  %v1423_v55 = vmul.f32 %v4596_v56, %v1388_v6  ;;  %v1389_v37 = vmul.f32 %v1267_v15, %v4501_v14  ;;  %v1801_v25 = vmul.f32 1.442695, %v1766_v4 }
 0x37f   : > { %1859 = vadd.xlane.f32.xlu2 %v4732_v28  ;;  %v1457_v16 = vadd.f32 %v4606_v33, %v1422_v63  ;;  %v1363_v52 = vmul.f32 %v4711_v17, %v1362_v45  ;;  %v4768_v20 = vadd.f32 %v4542_v9, %v4674_v13  ;;  %v1563_v29 = vsel %vm1499_vm4, %v1467_v39, %v1531_v0 }
 0x380   : > { %v1353_v48 = vmul.f32 %v3481_v3, %v1352_v43  ;;  %v1458_v26 = vadd.f32 %v4606_v33, %v1423_v55  ;;  %v1424_v11 = vmul.f32 %v4596_v56, %v1389_v37  ;;  %3484 = vpow2.f32 %v1801_v25 }
 0x381   : > { %vm1489_vm2 = vcmp.ge.f32.partialorder %v1457_v16, 0.0  ;;  %v1521_v24 = vmul.f32 0.01, %v1457_v16  ;;  %v1367_v2 = vsel %vm4756_vm1, %v4711_v17, %v1363_v52 }
 0x382   : > { %v1357_v5 = vsel %vm1356_vm3, %v3481_v3, %v1353_v48  ;;  %v1399_v14 = vmul.f32 %v1367_v2, %v4524_v61  ;;  %v1522_v17 = vmul.f32 0.01, %v1458_v26  ;;  %v1636_v3 = vpop.f32.mrf.mxu0  ;;  %vm1490_vm5 = vcmp.ge.f32.partialorder %v1458_v26, 0.0 }
 0x383   : > { %v1553_v32 = vsel %vm1489_vm2, %v1457_v16, %v1521_v24  ;;  %v1398_v12 = vmul.f32 %v1357_v5, %v4530_v27  ;;  %v1459_v21 = vadd.f32 %v4606_v33, %v1424_v11  ;;  %v1712_v61 = vpop.xlane.xlu0 %1711 }
 0x384   : > { %1659 = vmatmul.f32.gmra.mxu0 %v1553_v32  ;;  %1689 = vmatmul.f32.gmra.mxu3 %v1563_v29  ;;  %v1434_v13 = vmul.f32 %v4596_v56, %v1399_v14  ;;  %v1554_v54 = vsel %vm1490_vm5, %v1458_v26, %v1522_v17  ;;  %v1769_v40 = vsub.f32 %v4567_v35, %v1712_v61 }
 0x385   : > { %v1433_v51 = vmul.f32 %v4596_v56, %v1398_v12  ;;  %v1523_v36 = vmul.f32 0.01, %v1459_v21  ;;  %vm1491_vm7 = vcmp.ge.f32.partialorder %v1459_v21, 0.0  ;;  %v4788_v35 = vadd.f32 %v4542_v9, %v1636_v3 }
 0x386   : > { %v4778_v1 = vpop.eup %3484  ;;  %v1469_v42 = vadd.f32 %v4606_v33, %v1434_v13  ;;  %v1807_v22 = vmul.f32 1.442695, %v1769_v40  ;;  %v4805_v3 = vadd.f32 %v4542_v9, %v4713_v47 }
 0x387   : > { %1715 = vmax.xlane.f32.xlu2 %v4768_v20  ;;  %v1468_v27 = vadd.f32 %v4606_v33, %v1433_v51  ;;  %v1555_v63 = vsel %vm1491_vm7, %v1459_v21, %v1523_v36 }
 0x388   : > { %v1533_v23 = vmul.f32 0.01, %v1469_v42  ;;  %vm1501_vm8 = vcmp.ge.f32.partialorder %v1469_v42, 0.0 }
 0x389   : > { %vm1500_vm6 = vcmp.ge.f32.partialorder %v1468_v27, 0.0  ;;  %v1532_v10 = vmul.f32 0.01, %v1468_v27 }
 0x38a   : > { %v4783_v18 = vpop.f32.mrf.mxu0  ;;  %v1565_v15 = vsel %vm1501_vm8, %v1469_v42, %v1533_v23  ;;  %v4826_v23 = vadd.f32 %v4542_v9, %v4747_v59 }
 0x38b   : > { %v965_v53 = vpop.xlane.xlu2 %964  ;;  %v1564_v31 = vsel %vm1500_vm6, %v1468_v27, %v1532_v10  ;;  %v4835_v59 = vadd.f32 %v4542_v9, %v4783_v18  ;;  %v2000_v18 = vld [vmem:[%s5925_s7 + $0x68] sm:$0xff] }
 0x38c   : > { %v1006_v8 = vmul.f32 %v965_v53, %v4021_v62  ;;  %1662 = vmatmul.f32.gmra.mxu0 %v1554_v54  ;;  %1692 = vmatmul.f32.gmra.mxu3 %v1564_v31 }
 0x38e   : > { %v1038_v46 = vadd.f32 1e-05, %v1006_v8 }
 0x38f   : > { %1865 = vadd.xlane.f32.xlu2 %v4778_v1 }
 0x390   : > { %3486 = vrsqrt.f32 %v1038_v46  ;;  %vm1274_vm10 = vweird.f32 %v1038_v46 }
 0x391   : > { %3488 = vpow2.f32 %v1807_v22 }
 0x392   : > { %v4791_v52 = vpop.f32.mrf.mxu0 }
 0x393   : > { %v1702_v57 = vpop.xlane.xlu2 %1701  ;;  %v967_v58 = vpop.xlane.xlu1 %966 }
 0x394   : > { %v1764_v6 = vsub.f32 %v4611_v60, %v1702_v57  ;;  %v1007_v19 = vmul.f32 %v967_v58, %v4021_v62  ;;  %1665 = vmatmul.f32.gmra.mxu0 %v1555_v63  ;;  %1695 = vmatmul.f32.gmra.mxu3 %v1565_v15 }
 0x396   : > { %v3487_v45 = vpop.eup %3486  ;;  %v1797_v30 = vmul.f32 1.442695, %v1764_v6  ;;  %v1039_v39 = vadd.f32 1e-05, %v1007_v19  ;;  %v1999_v19 = vld [vmem:[%s5925_s7 + $0x60] sm:$0xff] }
 0x397   : > { %v1269_v43 = vmul.f32 %v3487_v45, %v1038_v46  ;;  %1721 = vmax.xlane.f32.xlu2 %v4788_v35  ;;  %v4794_v48 = vpop.eup %3488  ;;  %vm1275_vm9 = vweird.f32 %v3487_v45 }
 0x398   : > { %3490 = vpow2.f32 %v1797_v30  ;;  %vm1276_vm11 = vmor %vm1274_vm10, %vm1275_vm9  ;;  %vm1284_vm13 = vweird.f32 %v1039_v39  ;;  %v4861_v30 = vadd.f32 %v4542_v9, %v4791_v52  ;;  %v1996_v52 = vld [vmem:[%s5925_s7 + $0x48] sm:$0xff] }
 0x399   : > { %v1270_v16 = vmul.f32 %v3487_v45, %v1269_v43  ;;  %3492 = vrsqrt.f32 %v1039_v39 }
 0x39a   : > { %v1645_v25 = vpop.f32.mrf.mxu0 }
 0x39b   : > { %v1271_v60 = vmul.f32 0.5, %v1270_v16  ;;  %v1704_v4 = vpop.xlane.xlu1 %1703  ;;  %v1708_v24 = vpop.xlane.xlu2 %1707  ;;  %v4808_v27 = vadd.f32 %v4542_v9, %v1645_v25  ;;  %v1997_v16 = vld [vmem:[%s5925_s7 + $0x50] sm:$0xff] }
 0x39c   : > { %v1765_v55 = vsub.f32 %v4622_v7, %v1704_v4  ;;  %v1767_v26 = vsub.f32 %v4626_v50, %v1708_v24  ;;  %v1675_v21 = vpop.f32.mrf.mxu3  ;;  %v1995_v4 = vld [vmem:[%s5925_s7 + $0x40] sm:$0xff]  ;;  %v1993_v24 = vld [vmem:[%s5925_s7 + $0x30] sm:$0xff] }
 0x39d   : > { %v1272_v49 = vsub.f32 1.5, %v1271_v60  ;;  %v4819_v31 = vadd.f32 %v4542_v9, %v1675_v21 }
 0x39e   : > { %v4796_v0 = vpop.eup %3490  ;;  %v1799_v37 = vmul.f32 1.442695, %v1765_v55  ;;  %v1803_v17 = vmul.f32 1.442695, %v1767_v26  ;;  %v1994_v55 = vld [vmem:[%s5925_s7 + $0x38] sm:$0xff] }
 0x39f   : > { %v3493_v5 = vpop.eup %3492  ;;  %v1273_v2 = vmul.f32 %v3487_v45, %v1272_v49  ;;  %1861 = vadd.xlane.f32.xlu0 %v4796_v0  ;;  %1871 = vadd.xlane.f32.xlu2 %v4794_v48 }
 0x3a0   : > { %v1279_v32 = vmul.f32 %v3493_v5, %v1039_v39  ;;  %3494 = vpow2.f32 %v1799_v37  ;;  %vm1285_vm12 = vweird.f32 %v3493_v5  ;;  %v1998_v39 = vld [vmem:[%s5925_s7 + $0x58] sm:$0xff] }
 0x3a1   : > { %v1277_v7 = vsel %vm1276_vm11, %v3487_v45, %v1273_v2  ;;  %3496 = vpow2.f32 %v1803_v17  ;;  %vm1286_vm15 = vmor %vm1284_vm13, %vm1285_vm12  ;;  %v1992_v2 = vld [vmem:[%s5925_s7 + $0x28] sm:$0xff] }
 0x3a2   : > { %v1280_v12 = vmul.f32 %v3493_v5, %v1279_v32  ;;  %v1390_v29 = vmul.f32 %v1277_v7, %v4584_v34  ;;  %v1648_v15 = vpop.f32.mrf.mxu0  ;;  %v1991_v32 = vld [vmem:[%s5925_s7 + $0x20] sm:$0xff] }
 0x3a3   : > { %v1710_v51 = vpop.xlane.xlu1 %1709  ;;  %v4869_v43 = vadd.f32 %v4542_v9, %v1648_v15  ;;  %v4903_v7 = vld [vmem:[%s5924_s6] ss:$0 sm:$0xff] }
 0x3a4   : > { %v1281_v14 = vmul.f32 0.5, %v1280_v12  ;;  %v1425_v11 = vmul.f32 %v4596_v56, %v1390_v29  ;;  %v1768_v53 = vsub.f32 %v4634_v41, %v1710_v51  ;;  %v1989_v12 = vld [vmem:[%s5925_s7 + $0x10] sm:$0xff]  ;;  %v1988_v29 = vld [vmem:[%s5925_s7 + $0x8] sm:$0xff]  ;;  %v1987_v51 = vld [vmem:[%s5925_s7] sm:$0xff] }
 0x3a6   : > { %v1282_v10 = vsub.f32 1.5, %v1281_v14  ;;  %v1460_v50 = vadd.f32 %v4606_v33, %v1425_v11  ;;  %v4811_v13 = vpop.eup %3494  ;;  %v1805_v46 = vmul.f32 1.442695, %v1768_v53 }
 0x3a7   : > { %1717 = vmax.xlane.f32.xlu0 %v4805_v3  ;;  %1727 = vmax.xlane.f32.xlu2 %v4808_v27  ;;  %v4822_v36 = vpop.eup %3496 }
 0x3a8   : > { %v1283_v34 = vmul.f32 %v3493_v5, %v1282_v10  ;;  %1863 = vadd.xlane.f32.xlu1 %v4811_v13  ;;  %vm1492_vm14 = vcmp.ge.f32.partialorder %v1460_v50, 0.0  ;;  %v1524_v47 = vmul.f32 0.01, %v1460_v50  ;;  %3498 = vpow2.f32 %v1805_v46 }
 0x3aa   : > { %v1287_v54 = vsel %vm1286_vm15, %v3493_v5, %v1283_v34  ;;  %v1556_v61 = vsel %vm1492_vm14, %v1460_v50, %v1524_v47  ;;  %v1651_v60 = vpop.f32.mrf.mxu0 }
 0x3ab   : > { %1668 = vmatmul.f32.gmra.mxu0 %v1556_v61  ;;  %v1391_v8 = vmul.f32 %v1287_v54, %v4601_v38  ;;  %v1714_v42 = vpop.xlane.xlu1 %1713  ;;  %v4885_v49 = vadd.f32 %v4542_v9, %v1651_v60 }
 0x3ac   : > { %v1770_v38 = vsub.f32 %v4640_v44, %v1714_v42  ;;  %v2001_v44 = vld [vmem:[%s5925_s7 + $0x70] sm:$0xff] }
 0x3ad   : > { %v1426_v40 = vmul.f32 %v4596_v56, %v1391_v8  ;;  %v1678_v56 = vpop.f32.mrf.mxu3 }
 0x3ae   : > { %v1809_v58 = vmul.f32 1.442695, %v1770_v38  ;;  %v4838_v63 = vadd.f32 %v4542_v9, %v1678_v56  ;;  %v4840_v6 = vpop.eup %3498 }
 0x3af   : > { %1867 = vadd.xlane.f32.xlu0 %v4822_v36  ;;  %1747 = vmax.xlane.f32.xlu2 %v4819_v31  ;;  %v1461_v41 = vadd.f32 %v4606_v33, %v1426_v40  ;;  %v2002_v33 = vld [vmem:[%s5925_s7 + $0x78] sm:$0xff] }
 0x3b0   : > { %1719 = vmax.xlane.f32.xlu1 %v4826_v23  ;;  %3500 = vpow2.f32 %v1809_v58  ;;  %2003 = vmatpush.msra.mxu1 %v2002_v33 }
 0x3b1   : > { %vm1493_vm0 = vcmp.ge.f32.partialorder %v1461_v41, 0.0  ;;  %v1525_v22 = vmul.f32 0.01, %v1461_v41  ;;  %3302 = vmatpush.msrb.mxu3 %v2002_v33 }
 0x3b2   : > { %2004 = vmatpush.msra.mxu1 %v2001_v44  ;;  %v1654_v37 = vpop.f32.mrf.mxu0 }
 0x3b3   : > { %v1557_v57 = vsel %vm1493_vm0, %v1461_v41, %v1525_v22  ;;  %3303 = vmatpush.msrb.mxu3 %v2001_v44  ;;  %v4892_v5 = vadd.f32 %v4542_v9, %v1654_v37  ;;  %v1990_v9 = vld [vmem:[%s5925_s7 + $0x18] sm:$0xff] }
 0x3b4   : > { %1671 = vmatmul.f32.gmra.mxu0 %v1557_v57  ;;  %2005 = vmatpush.msra.mxu1 %v2000_v18 }
 0x3b5   : > { %3304 = vmatpush.msrb.mxu3 %v2000_v18 }
 0x3b6   : > { %v4857_v45 = vpop.eup %3500  ;;  %2006 = vmatpush.msra.mxu1 %v1999_v19 }
 0x3b7   : > { %1723 = vmax.xlane.f32.xlu0 %v4835_v59  ;;  %1749 = vmax.xlane.f32.xlu2 %v4838_v63 }
 0x3b8   : > { %1869 = vadd.xlane.f32.xlu1 %v4840_v6  ;;  %3305 = vmatpush.msrb.mxu3 %v1999_v19 }
 0x3b9   : > { %2007 = vmatpush.msra.mxu1 %v1998_v39 }
 0x3ba   : > { %3306 = vmatpush.msrb.mxu3 %v1998_v39 }
 0x3bb   : > { %2008 = vmatpush.msra.mxu1 %v1997_v16 }
 0x3bc   : > { %3307 = vmatpush.msrb.mxu3 %v1997_v16 }
 0x3bd   : > { %2009 = vmatpush.msra.mxu1 %v1996_v52 }
 0x3be   : > { %3308 = vmatpush.msrb.mxu3 %v1996_v52 }
 0x3bf   : > { %1873 = vadd.xlane.f32.xlu0 %v4857_v45  ;;  %2010 = vmatpush.msra.mxu1 %v1995_v4 }
 0x3c0   : > { %1725 = vmax.xlane.f32.xlu1 %v4861_v30  ;;  %3309 = vmatpush.msrb.mxu3 %v1995_v4 }
 0x3c1   : > { %2011 = vmatpush.msra.mxu1 %v1994_v55 }
 0x3c2   : > { %3310 = vmatpush.msrb.mxu3 %v1994_v55 }
 0x3c3   : > { %2012 = vmatpush.msra.mxu1 %v1993_v24 }
 0x3c4   : > { %3311 = vmatpush.msrb.mxu3 %v1993_v24 }
 0x3c5   : > { %2013 = vmatpush.msra.mxu1 %v1992_v2 }
 0x3c6   : > { %3312 = vmatpush.msrb.mxu3 %v1992_v2 }
 0x3c7   : > { %1729 = vmax.xlane.f32.xlu0 %v4869_v43  ;;  %2014 = vmatpush.msra.mxu1 %v1991_v32 }
 0x3c8   : > { %3313 = vmatpush.msrb.mxu3 %v1991_v32 }
 0x3c9   : > { %2015 = vmatpush.msra.mxu1 %v1990_v9 }
 0x3ca   : > { %3314 = vmatpush.msrb.mxu3 %v1990_v9 }
 0x3cb   : > { %2016 = vmatpush.msra.mxu1 %v1989_v12 }
 0x3cc   : > { %3315 = vmatpush.msrb.mxu3 %v1989_v12 }
 0x3cd   : > { %2017 = vmatpush.msra.mxu1 %v1988_v29 }
 0x3ce   : > { %3316 = vmatpush.msrb.mxu3 %v1988_v29 }
 0x3cf   : > { %1731 = vmax.xlane.f32.xlu0 %v4885_v49  ;;  %2018 = vmatpush.msra.mxu1 %v1987_v51 }
 0x3d0   : > { %3317 = vmatpush.msrb.mxu3 %v1987_v51 }
 0x3d6   : > { %v1681_v26 = vpop.f32.mrf.mxu3 }
 0x3d7   : > { %v4906_v25 = vadd.f32 %v4903_v7, %v1681_v26  ;;  %1733 = vmax.xlane.f32.xlu0 %v4892_v5 }
 0x3d9   : > { %1751 = vmax.xlane.f32.xlu2 %v4906_v25 }
 0x3e6   : > { %v1684_v14 = vpop.f32.mrf.mxu3 }
 0x3e7   : > { %v4923_v17 = vadd.f32 %v4903_v7, %v1684_v14 }
 0x3e9   : > { %1753 = vmax.xlane.f32.xlu2 %v4923_v17 }
 0x3f2   : > { %v1860_v11 = vpop.xlane.xlu2 %1859  ;;  %v1657_v10 = vpop.f32.mrf.mxu0 }
 0x3f3   : > { %3502 = vrcp.f32 %v1860_v11  ;;  %v4927_v50 = vadd.f32 %v4903_v7, %v1657_v10 }
 0x3f5   : > { %1735 = vmax.xlane.f32.xlu0 %v4927_v50 }
 0x3f9   : > { %v3503_v34 = vpop.eup %3502 }
 0x3fa   : > { %v1716_v47 = vpop.xlane.xlu2 %1715  ;;  %v1955_v53 = vmul.f32 %v3503_v34, %v4732_v28 }
 0x3fb   : > { %v1771_v54 = vsub.f32 %v4768_v20, %v1716_v47 }
 0x3fc   : > { %2019 = vmatmul.f32.vlgmr.msra.gmra.mxu1 %v1955_v53 }
 0x3fd   : > { %v1811_v21 = vmul.f32 1.442695, %v1771_v54 }
 0x3ff   : > { %3504 = vpow2.f32 %v1811_v21  ;;  %v1687_v8 = vpop.f32.mrf.mxu3 }
 0x400   : > { %v4936_v40 = vadd.f32 %v4903_v7, %v1687_v8 }
 0x401   : > { %v1660_v61 = vpop.f32.mrf.mxu0 }
 0x402   : > { %v4933_v46 = vadd.f32 %v4903_v7, %v1660_v61  ;;  %v1866_v42 = vpop.xlane.xlu2 %1865  ;;  %1755 = vmax.xlane.f32.xlu2 %v4936_v40 }
 0x404   : > { %1737 = vmax.xlane.f32.xlu0 %v4933_v46 }
 0x405   : > { %v4939_v41 = vpop.eup %3504 }
 0x406   : > { %1875 = vadd.xlane.f32.xlu1 %v4939_v41 }
 0x407   : > { %v1690_v20 = vpop.f32.mrf.mxu3 }
 0x408   : > { %v4947_v56 = vadd.f32 %v4903_v7, %v1690_v20 }
 0x409   : > { %v1663_v28 = vpop.f32.mrf.mxu0 }
 0x40a   : > { %v4944_v38 = vadd.f32 %v4903_v7, %v1663_v28  ;;  %v1722_v22 = vpop.xlane.xlu2 %1721  ;;  %1757 = vmax.xlane.f32.xlu2 %v4947_v56 }
 0x40b   : > { %v1774_v14 = vsub.f32 %v4788_v35, %v1722_v22 }
 0x40c   : > { %1739 = vmax.xlane.f32.xlu0 %v4944_v38 }
 0x40d   : > { %v1817_v53 = vmul.f32 1.442695, %v1774_v14 }
 0x40f   : > { %v1693_v58 = vpop.f32.mrf.mxu3 }
 0x410   : > { %v4957_v18 = vadd.f32 %v4903_v7, %v1693_v58 }
 0x411   : > { %v1666_v57 = vpop.f32.mrf.mxu0 }
 0x412   : > { %v4952_v33 = vadd.f32 %v4903_v7, %v1666_v57  ;;  %v4954_v44 = vpop.xlane.xlu2 %1871  ;;  %v1862_v19 = vpop.xlane.xlu0 %1861  ;;  %1759 = vmax.xlane.f32.xlu2 %v4957_v18 }
 0x413   : > { %3506 = vrcp.f32 %v1862_v19 }
 0x414   : > { %1741 = vmax.xlane.f32.xlu0 %v4952_v33 }
 0x419   : > { %v3507_v39 = vpop.eup %3506 }
 0x41a   : > { %v4961_v15 = vpop.xlane.xlu2 %1727  ;;  %v1718_v52 = vpop.xlane.xlu0 %1717  ;;  %v1956_v60 = vmul.f32 %v3507_v39, %v4796_v0 }
 0x41b   : > { %v1864_v16 = vpop.xlane.xlu1 %1863  ;;  %v1772_v4 = vsub.f32 %v4805_v3, %v1718_v52  ;;  %v1777_v52 = vsub.f32 %v4808_v27, %v4961_v15  ;;  %v2128_v15 = vld [vmem:[%s5926_s8 + $0x60] sm:$0xff] }
 0x41c   : > { %3508 = vrcp.f32 %v1864_v16  ;;  %2022 = vmatmul.f32.gmra.mxu1 %v1956_v60  ;;  %v2130_v60 = vld [vmem:[%s5926_s8 + $0x70] sm:$0xff] }
 0x41d   : > { %v1813_v55 = vmul.f32 1.442695, %v1772_v4 }
 0x41f   : > { %3510 = vpow2.f32 %v1813_v55 }
 0x420   : > { %3512 = vrcp.f32 %v1866_v42 }
 0x422   : > { %v3509_v24 = vpop.eup %3508  ;;  %v1748_v37 = vpop.xlane.xlu2 %1747 }
 0x423   : > { %v1720_v2 = vpop.xlane.xlu1 %1719  ;;  %v1787_v32 = vsub.f32 %v4819_v31, %v1748_v37  ;;  %v1868_v26 = vpop.xlane.xlu0 %1867  ;;  %v1957_v9 = vmul.f32 %v3509_v24, %v4811_v13 }
 0x424   : > { %v1773_v12 = vsub.f32 %v4826_v23, %v1720_v2  ;;  %v2127_v2 = vld [vmem:[%s5926_s8 + $0x58] sm:$0xff] }
 0x425   : > { %v1843_v29 = vmul.f32 1.442695, %v1787_v32  ;;  %2025 = vmatmul.f32.gmra.mxu1 %v1957_v9  ;;  %v4968_v0 = vpop.eup %3510  ;;  %v2126_v32 = vld [vmem:[%s5926_s8 + $0x50] sm:$0xff] }
 0x426   : > { %v1815_v51 = vmul.f32 1.442695, %v1773_v12  ;;  %1877 = vadd.xlane.f32.xlu1 %v4968_v0  ;;  %v3513_v3 = vpop.eup %3512 }
 0x427   : > { %3514 = vpow2.f32 %v1843_v29  ;;  %v1958_v47 = vmul.f32 %v3513_v3, %v4778_v1 }
 0x428   : > { %3516 = vpow2.f32 %v1815_v51  ;;  %v1669_v11 = vpop.f32.mrf.mxu0 }
 0x429   : > { %v4973_v31 = vadd.f32 %v4903_v7, %v1669_v11  ;;  %3518 = vrcp.f32 %v1868_v26 }
 0x42a   : > { %v1750_v13 = vpop.xlane.xlu2 %1749 }
 0x42b   : > { %v1870_v10 = vpop.xlane.xlu1 %1869  ;;  %v1788_v23 = vsub.f32 %v4838_v63, %v1750_v13  ;;  %v1724_v34 = vpop.xlane.xlu0 %1723  ;;  %1743 = vmax.xlane.f32.xlu2 %v4973_v31  ;;  %v2125_v13 = vld [vmem:[%s5926_s8 + $0x48] sm:$0xff] }
 0x42c   : > { %v1775_v63 = vsub.f32 %v4835_v59, %v1724_v34  ;;  %v2131_v59 = vld [vmem:[%s5926_s8 + $0x78] sm:$0xff]  ;;  %v2121_v34 = vld [vmem:[%s5926_s8 + $0x28] sm:$0xff] }
 0x42d   : > { %v4978_v54 = vpop.eup %3514  ;;  %v1845_v21 = vmul.f32 1.442695, %v1788_v23  ;;  %2028 = vmatmul.f32.gmra.mxu1 %v1958_v47  ;;  %2136 = vmatpush.msra.mxu2 %v2131_v59 }
 0x42e   : > { %v4980_v35 = vpop.eup %3516  ;;  %1907 = vadd.xlane.f32.xlu0 %v4978_v54  ;;  %v1819_v42 = vmul.f32 1.442695, %v1775_v63  ;;  %3318 = vmatpush.msra.mxu3 %v2131_v59  ;;  %v1696_v63 = vpop.f32.mrf.mxu3 }
 0x42f   : > { %3520 = vpow2.f32 %v1845_v21  ;;  %1879 = vadd.xlane.f32.xlu1 %v4980_v35  ;;  %v3519_v61 = vpop.eup %3518  ;;  %2137 = vmatpush.msra.mxu2 %v2130_v60  ;;  %v2120_v21 = vld [vmem:[%s5926_s8 + $0x20] sm:$0xff] }
 0x430   : > { %3522 = vpow2.f32 %v1817_v53  ;;  %v1959_v1 = vmul.f32 %v3519_v61, %v4822_v36  ;;  %3319 = vmatpush.msra.mxu3 %v2130_v60  ;;  %v2119_v61 = vld [vmem:[%s5926_s8 + $0x18] sm:$0xff] }
 0x431   : > { %3524 = vrcp.f32 %v1870_v10 }
 0x432   : > { %3526 = vpow2.f32 %v1819_v42 }
 0x433   : > { %v1874_v8 = vpop.xlane.xlu0 %1873  ;;  %v1726_v20 = vpop.xlane.xlu1 %1725  ;;  %3528 = vrcp.f32 %v4954_v44  ;;  %v1823_v44 = vmul.f32 1.442695, %v1777_v52 }
 0x434   : > { %v1776_v58 = vsub.f32 %v4861_v30, %v1726_v20  ;;  %v2117_v20 = vld [vmem:[%s5926_s8 + $0x8] sm:$0xff] }
 0x435   : > { %v4986_v28 = vpop.eup %3520  ;;  %2031 = vmatmul.f32.gmra.mxu1 %v1959_v1  ;;  %v5067_v1 = vadd.f32 %v4903_v7, %v1696_v63 }
 0x436   : > { %v4988_v22 = vpop.eup %3522  ;;  %1909 = vadd.xlane.f32.xlu2 %v4986_v28  ;;  %v1821_v39 = vmul.f32 1.442695, %v1776_v58  ;;  %v2116_v58 = vld [vmem:[%s5926_s8] sm:$0xff] }
 0x437   : > { %1881 = vadd.xlane.f32.xlu1 %v4988_v22  ;;  %v3525_v57 = vpop.eup %3524 }
 0x438   : > { %v1960_v19 = vmul.f32 %v3525_v57, %v4840_v6  ;;  %v4998_v16 = vpop.eup %3526  ;;  %3530 = vpow2.f32 %v1821_v39  ;;  %v2129_v6 = vld [vmem:[%s5926_s8 + $0x68] sm:$0xff] }
 0x439   : > { %v3529_v30 = vpop.eup %3528  ;;  %3532 = vrcp.f32 %v1874_v8  ;;  %2138 = vmatpush.msra.mxu2 %v2129_v6  ;;  %3320 = vmatpush.msra.mxu3 %v2129_v6  ;;  %v2118_v8 = vld [vmem:[%s5926_s8 + $0x10] sm:$0xff] }
 0x43a   : > { %v1961_v55 = vmul.f32 %v3529_v30, %v4794_v48  ;;  %3534 = vpow2.f32 %v1823_v44 }
 0x43b   : > { %v1730_v36 = vpop.xlane.xlu0 %1729  ;;  %2139 = vmatpush.msra.mxu2 %v2128_v15  ;;  %3321 = vmatpush.msra.mxu3 %v2128_v15 }
 0x43c   : > { %v1778_v48 = vsub.f32 %v4869_v43, %v1730_v36  ;;  %v1672_v36 = vpop.f32.mrf.mxu0 }
 0x43d   : > { %2034 = vmatmul.f32.gmra.mxu1 %v1960_v19  ;;  %2140 = vmatpush.msra.mxu2 %v2127_v2  ;;  %v5078_v19 = vadd.f32 %v4903_v7, %v1672_v36 }
 0x43e   : > { %v5014_v24 = vpop.eup %3530  ;;  %3322 = vmatpush.msra.mxu3 %v2127_v2  ;;  %v1825_v26 = vmul.f32 1.442695, %v1778_v48 }
 0x43f   : > { %1883 = vadd.xlane.f32.xlu1 %v4998_v16  ;;  %2141 = vmatpush.msra.mxu2 %v2126_v32 }
 0x440   : > { %3323 = vmatpush.msra.mxu3 %v2126_v32 }
 0x441   : > { %2142 = vmatpush.msra.mxu2 %v2125_v13 }
 0x442   : > { %3324 = vmatpush.msra.mxu3 %v2125_v13 }
 0x443   : > { %v1732_v4 = vpop.xlane.xlu0 %1731 }
 0x444   : > { %v1779_v27 = vsub.f32 %v4885_v49, %v1732_v4  ;;  %v3533_v49 = vpop.eup %3532 }
 0x445   : > { %2037 = vmatmul.f32.gmra.mxu1 %v1961_v55  ;;  %v1962_v12 = vmul.f32 %v3533_v49, %v4857_v45  ;;  %v5026_v51 = vpop.eup %3534  ;;  %v2124_v45 = vld [vmem:[%s5926_s8 + $0x40] sm:$0xff] }
 0x446   : > { %v1827_v37 = vmul.f32 1.442695, %v1779_v27  ;;  %2143 = vmatpush.msra.mxu2 %v2124_v45  ;;  %3325 = vmatpush.msra.mxu3 %v2124_v45 }
 0x447   : > { %1885 = vadd.xlane.f32.xlu1 %v5014_v24 }
 0x448   : > { %3536 = vpow2.f32 %v1827_v37 }
 0x449   : > { %3538 = vpow2.f32 %v1825_v26 }
 0x44b   : > { %v1734_v9 = vpop.xlane.xlu0 %1733 }
 0x44c   : > { %v1780_v29 = vsub.f32 %v4892_v5, %v1734_v9  ;;  %v1752_v43 = vpop.xlane.xlu2 %1751  ;;  %v2123_v5 = vld [vmem:[%s5926_s8 + $0x38] sm:$0xff] }
 0x44d   : > { %v1789_v3 = vsub.f32 %v4906_v25, %v1752_v43  ;;  %2040 = vmatmul.f32.gmra.mxu1 %v1962_v12  ;;  %v2122_v25 = vld [vmem:[%s5926_s8 + $0x30] sm:$0xff]  ;;  %2144 = vmatpush.msra.mxu2 %v2123_v5 }
 0x44e   : > { %v5029_v14 = vpop.eup %3536  ;;  %v1829_v11 = vmul.f32 1.442695, %v1780_v29  ;;  %3326 = vmatpush.msra.mxu3 %v2123_v5 }
 0x44f   : > { %v1847_v10 = vmul.f32 1.442695, %v1789_v3  ;;  %1887 = vadd.xlane.f32.xlu1 %v5026_v51  ;;  %1891 = vadd.xlane.f32.xlu0 %v5029_v14  ;;  %v5045_v23 = vpop.eup %3538 }
 0x450   : > { %3540 = vpow2.f32 %v1829_v11  ;;  %2145 = vmatpush.msra.mxu2 %v2122_v25  ;;  %3327 = vmatpush.msra.mxu3 %v2122_v25 }
 0x451   : > { %3542 = vpow2.f32 %v1847_v10 }
 0x452   : > { %2146 = vmatpush.msra.mxu2 %v2121_v34  ;;  %3328 = vmatpush.msra.mxu3 %v2121_v34 }
 0x454   : > { %2147 = vmatpush.msra.mxu2 %v2120_v21  ;;  %3329 = vmatpush.msra.mxu3 %v2120_v21 }
 0x456   : > { %v5050_v47 = vpop.eup %3540  ;;  %2148 = vmatpush.msra.mxu2 %v2119_v61  ;;  %3330 = vmatpush.msra.mxu3 %v2119_v61 }
 0x457   : > { %v5052_v53 = vpop.eup %3542  ;;  %1889 = vadd.xlane.f32.xlu1 %v5045_v23  ;;  %1893 = vadd.xlane.f32.xlu0 %v5050_v47 }
 0x458   : > { %1911 = vadd.xlane.f32.xlu2 %v5052_v53  ;;  %2149 = vmatpush.msra.mxu2 %v2118_v8 }
 0x459   : > { %3331 = vmatpush.msra.mxu3 %v2118_v8 }
 0x45a   : > { %2150 = vmatpush.msra.mxu2 %v2117_v20 }
 0x45b   : > { %3332 = vmatpush.msra.mxu3 %v2117_v20 }
 0x45c   : > { %v1754_v42 = vpop.xlane.xlu2 %1753  ;;  %2151 = vmatpush.msra.mxu2 %v2116_v58 }
 0x45d   : > { %v1790_v57 = vsub.f32 %v4923_v17, %v1754_v42  ;;  %3333 = vmatpush.msra.mxu3 %v2116_v58 }
 0x45f   : > { %1761 = vmax.xlane.f32.xlu1 %v5067_v1  ;;  %v1849_v59 = vmul.f32 1.442695, %v1790_v57 }
 0x461   : > { %3544 = vpow2.f32 %v1849_v59 }
 0x467   : > { %1745 = vmax.xlane.f32.xlu1 %v5078_v19  ;;  %v5081_v17 = vpop.eup %3544 }
 0x468   : > { %1913 = vadd.xlane.f32.xlu0 %v5081_v17  ;;  %v1736_v39 = vpop.xlane.xlu0 %1735 }
 0x469   : > { %v1781_v52 = vsub.f32 %v4927_v50, %v1736_v39 }
 0x46b   : > { %v1831_v30 = vmul.f32 1.442695, %v1781_v52 }
 0x46d   : > { %3546 = vpow2.f32 %v1831_v30 }
 0x473   : > { %v5085_v60 = vpop.eup %3546 }
 0x474   : > { %1895 = vadd.xlane.f32.xlu1 %v5085_v60 }
 0x475   : > { %v1756_v44 = vpop.xlane.xlu2 %1755 }
 0x476   : > { %v1791_v4 = vsub.f32 %v4936_v40, %v1756_v44 }
 0x477   : > { %v1738_v6 = vpop.xlane.xlu0 %1737 }
 0x478   : > { %v1782_v7 = vsub.f32 %v4933_v46, %v1738_v6  ;;  %v1851_v37 = vmul.f32 1.442695, %v1791_v4 }
 0x479   : > { %v2020_v55 = vpop.f32.mrf.mxu1  ;;  %v1876_v27 = vpop.xlane.xlu1 %1875 }
 0x47a   : > { %v1833_v15 = vmul.f32 1.442695, %v1782_v7  ;;  %3548 = vrcp.f32 %v1876_v27  ;;  %2152 = vmatmul.f32.vlgmr.msra.gmra.mxu2 %v2020_v55 }
 0x47c   : > { %3550 = vpow2.f32 %v1833_v15 }
 0x47d   : > { %3552 = vpow2.f32 %v1851_v37  ;;  %v1758_v48 = vpop.xlane.xlu2 %1757 }
 0x47e   : > { %v1792_v32 = vsub.f32 %v4947_v56, %v1758_v48 }
 0x47f   : > { %v1740_v50 = vpop.xlane.xlu0 %1739 }
 0x480   : > { %v3549_v2 = vpop.eup %3548  ;;  %v1783_v49 = vsub.f32 %v4944_v38, %v1740_v50  ;;  %v1853_v12 = vmul.f32 1.442695, %v1792_v32 }
 0x481   : > { %v1963_v26 = vmul.f32 %v3549_v2, %v4939_v41 }
 0x482   : > { %v5093_v46 = vpop.eup %3550  ;;  %v1835_v40 = vmul.f32 1.442695, %v1783_v49 }
 0x483   : > { %v5095_v9 = vpop.eup %3552  ;;  %1897 = vadd.xlane.f32.xlu2 %v5093_v46  ;;  %2043 = vmatmul.f32.gmra.mxu1 %v1963_v26 }
 0x484   : > { %3554 = vpow2.f32 %v1835_v40  ;;  %1915 = vadd.xlane.f32.xlu1 %v5095_v9 }
 0x485   : > { %3556 = vpow2.f32 %v1853_v12  ;;  %v1760_v43 = vpop.xlane.xlu2 %1759 }
 0x486   : > { %v1793_v56 = vsub.f32 %v4957_v18, %v1760_v43 }
 0x487   : > { %v1742_v29 = vpop.xlane.xlu0 %1741 }
 0x488   : > { %v1784_v38 = vsub.f32 %v4952_v33, %v1742_v29  ;;  %v1855_v13 = vmul.f32 1.442695, %v1793_v56 }
 0x48a   : > { %v5101_v41 = vpop.eup %3554  ;;  %v1837_v3 = vmul.f32 1.442695, %v1784_v38 }
 0x48b   : > { %v5103_v11 = vpop.eup %3556  ;;  %1899 = vadd.xlane.f32.xlu0 %v5101_v41 }
 0x48c   : > { %3558 = vpow2.f32 %v1837_v3  ;;  %1917 = vadd.xlane.f32.xlu2 %v5103_v11 }
 0x48d   : > { %3560 = vpow2.f32 %v1855_v13 }
 0x492   : > { %v5107_v10 = vpop.eup %3558 }
 0x493   : > { %v5109_v45 = vpop.eup %3560  ;;  %1901 = vadd.xlane.f32.xlu1 %v5107_v10 }
 0x494   : > { %1919 = vadd.xlane.f32.xlu0 %v5109_v45 }
 0x499   : > { %v2023_v33 = vpop.f32.mrf.mxu1  ;;  %v1878_v18 = vpop.xlane.xlu1 %1877 }
 0x49a   : > { %3562 = vrcp.f32 %v1878_v18  ;;  %2155 = vmatmul.f32.gmra.mxu2 %v2023_v33 }
 0x49e   : > { %v1744_v5 = vpop.xlane.xlu2 %1743 }
 0x49f   : > { %v1785_v25 = vsub.f32 %v4973_v31, %v1744_v5 }
 0x4a0   : > { %v3563_v34 = vpop.eup %3562 }
 0x4a1   : > { %v1839_v21 = vmul.f32 1.442695, %v1785_v25  ;;  %v1908_v61 = vpop.xlane.xlu0 %1907  ;;  %v1964_v42 = vmul.f32 %v3563_v34, %v4968_v0 }
 0x4a2   : > { %v2026_v63 = vpop.f32.mrf.mxu1  ;;  %v1880_v8 = vpop.xlane.xlu1 %1879  ;;  %3564 = vrcp.f32 %v1908_v61 }
 0x4a3   : > { %3566 = vpow2.f32 %v1839_v21  ;;  %2158 = vmatmul.f32.gmra.mxu2 %v2026_v63  ;;  %2046 = vmatmul.f32.gmra.mxu1 %v1964_v42 }
 0x4a4   : > { %3568 = vrcp.f32 %v1880_v8 }
 0x4a8   : > { %v3565_v20 = vpop.eup %3564 }
 0x4a9   : > { %v5115_v57 = vpop.eup %3566  ;;  %v1910_v58 = vpop.xlane.xlu2 %1909  ;;  %v1979_v59 = vmul.f32 %v3565_v20, %v4978_v54 }
 0x4aa   : > { %v3569_v36 = vpop.eup %3568  ;;  %3570 = vrcp.f32 %v1910_v58  ;;  %v2029_v31 = vpop.f32.mrf.mxu1  ;;  %1903 = vadd.xlane.f32.xlu2 %v5115_v57 }
 0x4ab   : > { %v1882_v39 = vpop.xlane.xlu1 %1881  ;;  %2161 = vmatmul.f32.gmra.mxu2 %v2029_v31  ;;  %v1965_v0 = vmul.f32 %v3569_v36, %v4980_v35  ;;  %2091 = vmatmul.f32.vlgmr.msrb.gmra.mxu3 %v1979_v59 }
 0x4ac   : > { %3572 = vrcp.f32 %v1882_v39 }
 0x4ad   : > { %2049 = vmatmul.f32.gmra.mxu1 %v1965_v0 }
 0x4b0   : > { %v3571_v52 = vpop.eup %3570 }
 0x4b1   : > { %v1980_v6 = vmul.f32 %v3571_v52, %v4986_v28 }
 0x4b2   : > { %v3573_v30 = vpop.eup %3572  ;;  %v2032_v44 = vpop.f32.mrf.mxu1 }
 0x4b3   : > { %v1884_v7 = vpop.xlane.xlu1 %1883  ;;  %v1966_v54 = vmul.f32 %v3573_v30, %v4988_v22  ;;  %2164 = vmatmul.f32.gmra.mxu2 %v2032_v44  ;;  %2094 = vmatmul.f32.gmra.mxu3 %v1980_v6 }
 0x4b4   : > { %3574 = vrcp.f32 %v1884_v7 }
 0x4b5   : > { %2052 = vmatmul.f32.gmra.mxu1 %v1966_v54 }
 0x4ba   : > { %v3575_v4 = vpop.eup %3574  ;;  %v2035_v55 = vpop.f32.mrf.mxu1 }
 0x4bb   : > { %v1886_v27 = vpop.xlane.xlu1 %1885  ;;  %v1967_v15 = vmul.f32 %v3575_v4, %v4998_v16  ;;  %2167 = vmatmul.f32.gmra.mxu2 %v2035_v55 }
 0x4bc   : > { %3576 = vrcp.f32 %v1886_v27 }
 0x4bd   : > { %2055 = vmatmul.f32.gmra.mxu1 %v1967_v15 }
 0x4c2   : > { %v3577_v35 = vpop.eup %3576  ;;  %v2038_v37 = vpop.f32.mrf.mxu1 }
 0x4c3   : > { %v1888_v50 = vpop.xlane.xlu1 %1887  ;;  %v1968_v28 = vmul.f32 %v3577_v35, %v5014_v24  ;;  %2170 = vmatmul.f32.gmra.mxu2 %v2038_v37  ;;  %v1892_v2 = vpop.xlane.xlu0 %1891 }
 0x4c4   : > { %3578 = vrcp.f32 %v1888_v50 }
 0x4c5   : > { %2058 = vmatmul.f32.gmra.mxu1 %v1968_v28 }
 0x4ca   : > { %v3579_v22 = vpop.eup %3578  ;;  %v2041_v48 = vpop.f32.mrf.mxu1 }
 0x4cb   : > { %v1890_v49 = vpop.xlane.xlu1 %1889  ;;  %v1969_v32 = vmul.f32 %v3579_v22, %v5026_v51  ;;  %2173 = vmatmul.f32.gmra.mxu2 %v2041_v48  ;;  %v1912_v16 = vpop.xlane.xlu2 %1911 }
 0x4cc   : > { %3580 = vrcp.f32 %v1890_v49  ;;  %v1894_v43 = vpop.xlane.xlu0 %1893 }
 0x4cd   : > { %3582 = vrcp.f32 %v1912_v16  ;;  %2061 = vmatmul.f32.gmra.mxu1 %v1969_v32 }
 0x4ce   : > { %3584 = vrcp.f32 %v1892_v2 }
 0x4d2   : > { %v3581_v26 = vpop.eup %3580 }
 0x4d3   : > { %v1762_v40 = vpop.xlane.xlu1 %1761  ;;  %v1970_v12 = vmul.f32 %v3581_v26, %v5045_v23  ;;  %v3583_v24 = vpop.eup %3582 }
 0x4d4   : > { %v1794_v29 = vsub.f32 %v5067_v1, %v1762_v40  ;;  %v1981_v38 = vmul.f32 %v3583_v24, %v5052_v53  ;;  %v3585_v51 = vpop.eup %3584 }
 0x4d5   : > { %2064 = vmatmul.f32.gmra.mxu1 %v1970_v12  ;;  %v1971_v33 = vmul.f32 %v3585_v51, %v5029_v14 }
 0x4d6   : > { %v1857_v56 = vmul.f32 1.442695, %v1794_v29  ;;  %2097 = vmatmul.f32.gmra.mxu3 %v1981_v38 }
 0x4d8   : > { %3586 = vpow2.f32 %v1857_v56 }
 0x4d9   : > { %3588 = vrcp.f32 %v1894_v43 }
 0x4db   : > { %v1746_v3 = vpop.xlane.xlu1 %1745  ;;  %v1914_v18 = vpop.xlane.xlu0 %1913 }
 0x4dc   : > { %v1786_v13 = vsub.f32 %v5078_v19, %v1746_v3  ;;  %3590 = vrcp.f32 %v1914_v18 }
 0x4dd   : > { %2067 = vmatmul.f32.gmra.mxu1 %v1971_v33 }
 0x4de   : > { %v5130_v5 = vpop.eup %3586  ;;  %v1841_v23 = vmul.f32 1.442695, %v1786_v13 }
 0x4df   : > { %1921 = vadd.xlane.f32.xlu1 %v5130_v5  ;;  %v3589_v53 = vpop.eup %3588 }
 0x4e0   : > { %3592 = vpow2.f32 %v1841_v23  ;;  %v1972_v25 = vmul.f32 %v3589_v53, %v5050_v47  ;;  %v5142_v47 = vld [vmem:[%s5927_s9] ss:$0 sm:$0xff] }
 0x4e2   : > { %v3591_v1 = vpop.eup %3590 }
 0x4e3   : > { %v1982_v34 = vmul.f32 %v3591_v1, %v5081_v17 }
 0x4e5   : > { %2070 = vmatmul.f32.gmra.mxu1 %v1972_v25  ;;  %2100 = vmatmul.f32.gmra.mxu3 %v1982_v34 }
 0x4e6   : > { %v5135_v21 = vpop.eup %3592 }
 0x4e7   : > { %1905 = vadd.xlane.f32.xlu0 %v5135_v21  ;;  %v1896_v14 = vpop.xlane.xlu1 %1895 }
 0x4e8   : > { %3594 = vrcp.f32 %v1896_v14 }
 0x4ee   : > { %v3595_v19 = vpop.eup %3594 }
 0x4ef   : > { %v1973_v61 = vmul.f32 %v3595_v19, %v5085_v60 }
 0x4f1   : > { %2073 = vmatmul.f32.gmra.mxu1 %v1973_v61 }
 0x4f6   : > { %v1898_v63 = vpop.xlane.xlu2 %1897 }
 0x4f7   : > { %v1916_v8 = vpop.xlane.xlu1 %1915  ;;  %3596 = vrcp.f32 %v1898_v63 }
 0x4f8   : > { %3598 = vrcp.f32 %v1916_v8 }
 0x4fd   : > { %v3597_v17 = vpop.eup %3596  ;;  %v2153_v42 = vpop.f32.mrf.mxu2 }
 0x4fe   : > { %v3599_v20 = vpop.eup %3598  ;;  %v5145_v58 = vadd.f32 %v5142_v47, %v2153_v42  ;;  %v1900_v59 = vpop.xlane.xlu0 %1899  ;;  %v1974_v36 = vmul.f32 %v3597_v17, %v5093_v46 }
 0x4ff   : > { %v1918_v60 = vpop.xlane.xlu2 %1917  ;;  %v1983_v31 = vmul.f32 %v3599_v20, %v5095_v9  ;;  %3600 = vrcp.f32 %v1900_v59 }
 0x500   : > { %3602 = vrcp.f32 %v1918_v60  ;;  %2076 = vmatmul.f32.gmra.mxu1 %v1974_v36  ;;  %v2044_v39 = vpop.f32.mrf.mxu1  ;;  %2251 = vadd.xlane.f32.xlu2 %v5145_v58 }
 0x501   : > { %2103 = vmatmul.f32.gmra.mxu3 %v1983_v31  ;;  %2176 = vmatmul.f32.gmra.mxu2 %v2044_v39 }
 0x505   : > { %v3601_v0 = vpop.eup %3600 }
 0x506   : > { %v3603_v52 = vpop.eup %3602  ;;  %v1902_v30 = vpop.xlane.xlu1 %1901  ;;  %v1975_v6 = vmul.f32 %v3601_v0, %v5101_v41 }
 0x507   : > { %3604 = vrcp.f32 %v1902_v30  ;;  %v1920_v44 = vpop.xlane.xlu0 %1919  ;;  %v1984_v46 = vmul.f32 %v3603_v52, %v5103_v11 }
 0x508   : > { %3606 = vrcp.f32 %v1920_v44  ;;  %2079 = vmatmul.f32.gmra.mxu1 %v1975_v6 }
 0x509   : > { %2106 = vmatmul.f32.gmra.mxu3 %v1984_v46 }
 0x50d   : > { %v3605_v9 = vpop.eup %3604 }
 0x50e   : > { %v3607_v7 = vpop.eup %3606  ;;  %v1976_v54 = vmul.f32 %v3605_v9, %v5107_v10 }
 0x50f   : > { %v1985_v4 = vmul.f32 %v3607_v7, %v5109_v45 }
 0x510   : > { %2082 = vmatmul.f32.gmra.mxu1 %v1976_v54 }
 0x511   : > { %2109 = vmatmul.f32.gmra.mxu3 %v1985_v4 }
 0x51d   : > { %v1904_v55 = vpop.xlane.xlu2 %1903  ;;  %v2156_v27 = vpop.f32.mrf.mxu2 }
 0x51e   : > { %3608 = vrcp.f32 %v1904_v55  ;;  %v5155_v41 = vadd.f32 %v5142_v47, %v2156_v27 }
 0x520   : > { %v2047_v15 = vpop.f32.mrf.mxu1  ;;  %2253 = vadd.xlane.f32.xlu1 %v5155_v41 }
 0x521   : > { %2179 = vmatmul.f32.gmra.mxu2 %v2047_v15 }
 0x524   : > { %v3609_v11 = vpop.eup %3608 }
 0x525   : > { %v1977_v35 = vmul.f32 %v3609_v11, %v5115_v57 }
 0x526   : > { %v2159_v37 = vpop.f32.mrf.mxu2 }
 0x527   : > { %v5160_v10 = vadd.f32 %v5142_v47, %v2159_v37  ;;  %2085 = vmatmul.f32.gmra.mxu1 %v1977_v35 }
 0x529   : > { %2255 = vadd.xlane.f32.xlu0 %v5160_v10 }
 0x52a   : > { %v2050_v45 = vpop.f32.mrf.mxu1 }
 0x52b   : > { %2182 = vmatmul.f32.gmra.mxu2 %v2050_v45 }
 0x52e   : > { %v2092_v12 = vpop.f32.mrf.mxu3  ;;  %v2162_v1 = vpop.f32.mrf.mxu2 }
 0x52f   : > { %v5170_v20 = vadd.f32 %v5142_v47, %v2162_v1 }
 0x532   : > { %v2053_v50 = vpop.f32.mrf.mxu1 }
 0x533   : > { %2185 = vmatmul.f32.gmra.mxu2 %v2053_v50 }
 0x536   : > { %v2095_v43 = vpop.f32.mrf.mxu3  ;;  %v2165_v25 = vpop.f32.mrf.mxu2 }
 0x537   : > { %v5178_v31 = vadd.f32 %v5142_v47, %v2165_v25 }
 0x53a   : > { %v2056_v28 = vpop.f32.mrf.mxu1 }
 0x53b   : > { %2188 = vmatmul.f32.gmra.mxu2 %v2056_v28 }
 0x53e   : > { %v2168_v34 = vpop.f32.mrf.mxu2 }
 0x53f   : > { %v5188_v30 = vadd.f32 %v5142_v47, %v2168_v34 }
 0x542   : > { %v2059_v22 = vpop.f32.mrf.mxu1 }
 0x543   : > { %2191 = vmatmul.f32.gmra.mxu2 %v2059_v22 }
 0x54a   : > { %v2062_v2 = vpop.f32.mrf.mxu1 }
 0x54b   : > { %2194 = vmatmul.f32.gmra.mxu2 %v2062_v2 }
 0x552   : > { %v1922_v48 = vpop.xlane.xlu1 %1921  ;;  %v2065_v49 = vpop.f32.mrf.mxu1 }
 0x553   : > { %3610 = vrcp.f32 %v1922_v48  ;;  %2197 = vmatmul.f32.gmra.mxu2 %v2065_v49 }
 0x559   : > { %v3611_v57 = vpop.eup %3610  ;;  %v2098_v56 = vpop.f32.mrf.mxu3 }
 0x55a   : > { %v1906_v32 = vpop.xlane.xlu0 %1905  ;;  %v1986_v16 = vmul.f32 %v3611_v57, %v5130_v5  ;;  %v2068_v26 = vpop.f32.mrf.mxu1 }
 0x55b   : > { %3612 = vrcp.f32 %v1906_v32  ;;  %2200 = vmatmul.f32.gmra.mxu2 %v2068_v26 }
 0x55c   : > { %2112 = vmatmul.f32.gmra.mxu3 %v1986_v16 }
 0x561   : > { %v3613_v40 = vpop.eup %3612 }
 0x562   : > { %v1978_v24 = vmul.f32 %v3613_v40, %v5135_v21  ;;  %v2071_v29 = vpop.f32.mrf.mxu1  ;;  %v2171_v21 = vpop.f32.mrf.mxu2 }
 0x563   : > { %2203 = vmatmul.f32.gmra.mxu2 %v2071_v29  ;;  %v5196_v46 = vadd.f32 %v5142_v47, %v2171_v21 }
 0x564   : > { %2088 = vmatmul.f32.gmra.mxu1 %v1978_v24  ;;  %2224 = vmatmul.f32.vlgmr.msra.gmra.mxu3 %v2092_v12 }
 0x568   : > { %v2101_v51 = vpop.f32.mrf.mxu3 }
 0x56a   : > { %v2174_v61 = vpop.f32.mrf.mxu2 }
 0x56b   : > { %v5204_v55 = vadd.f32 %v5142_v47, %v2174_v61 }
 0x56c   : > { %2227 = vmatmul.f32.gmra.mxu3 %v2095_v43 }
 0x56e   : > { %v2074_v38 = vpop.f32.mrf.mxu1 }
 0x56f   : > { %2206 = vmatmul.f32.gmra.mxu2 %v2074_v38 }
 0x573   : > { %v2252_v22 = vpop.xlane.xlu2 %2251 }
 0x574   : > { %2230 = vmatmul.f32.gmra.mxu3 %v2098_v56  ;;  %v2315_v2 = vmul.f32 %v2252_v22, %v4021_v62 }
 0x576   : > { %v5237_v57 = vsub.f32 %v5145_v58, %v2315_v2 }
 0x578   : > { %v2379_v12 = vmul.f32 %v5237_v57, %v5237_v57 }
 0x57c   : > { %2233 = vmatmul.f32.gmra.mxu3 %v2101_v51 }
 0x57d   : > { %v2077_v3 = vpop.f32.mrf.mxu1 }
 0x57e   : > { %2209 = vmatmul.f32.gmra.mxu2 %v2077_v3 }
 0x584   : > { %v2104_v13 = vpop.f32.mrf.mxu3  ;;  %v2177_v17 = vpop.f32.mrf.mxu2 }
 0x585   : > { %2236 = vmatmul.f32.gmra.mxu3 %v2104_v13  ;;  %v2080_v33 = vpop.f32.mrf.mxu1  ;;  %v5212_v11 = vadd.f32 %v5142_v47, %v2177_v17 }
 0x586   : > { %2212 = vmatmul.f32.gmra.mxu2 %v2080_v33 }
 0x58c   : > { %v2107_v18 = vpop.f32.mrf.mxu3 }
 0x58d   : > { %2239 = vmatmul.f32.gmra.mxu3 %v2107_v18  ;;  %v2083_v5 = vpop.f32.mrf.mxu1 }
 0x58e   : > { %2215 = vmatmul.f32.gmra.mxu2 %v2083_v5 }
 0x593   : > { %v2254_v32 = vpop.xlane.xlu1 %2253 }
 0x594   : > { %v2110_v23 = vpop.f32.mrf.mxu3  ;;  %v2316_v26 = vmul.f32 %v2254_v32, %v4021_v62 }
 0x595   : > { %2242 = vmatmul.f32.gmra.mxu3 %v2110_v23 }
 0x596   : > { %v5247_v24 = vsub.f32 %v5155_v41, %v2316_v26 }
 0x598   : > { %v2380_v58 = vmul.f32 %v5247_v24, %v5247_v24 }
 0x5a4   : > { %v2086_v53 = vpop.f32.mrf.mxu1  ;;  %v2180_v36 = vpop.f32.mrf.mxu2 }
 0x5a5   : > { %2218 = vmatmul.f32.gmra.mxu2 %v2086_v53  ;;  %v5220_v45 = vadd.f32 %v5142_v47, %v2180_v36 }
 0x5ae   : > { %v5185_v0 = vpop.f32.mrf.mxu2 }
 0x5af   : > { %v5273_v21 = vadd.f32 %v5142_v47, %v5185_v0 }
 0x5b6   : > { %v2186_v44 = vpop.f32.mrf.mxu2 }
 0x5b7   : > { %v5223_v50 = vadd.f32 %v5142_v47, %v2186_v44 }
 0x5be   : > { %v2189_v54 = vpop.f32.mrf.mxu2 }
 0x5bf   : > { %v5229_v48 = vadd.f32 %v5142_v47, %v2189_v54 }
 0x5c6   : > { %v2192_v37 = vpop.f32.mrf.mxu2 }
 0x5ce   : > { %v2195_v28 = vpop.f32.mrf.mxu2 }
 0x5cf   : > { %v5232_v49 = vadd.f32 %v5142_v47, %v2195_v28 }
 0x5d6   : > { %v2198_v16 = vpop.f32.mrf.mxu2 }
 0x5d7   : > { %v5241_v40 = vadd.f32 %v5142_v47, %v2198_v16 }
 0x5de   : > { %v2201_v29 = vpop.f32.mrf.mxu2 }
 0x5df   : > { %v2113_v14 = vpop.f32.mrf.mxu3 }
 0x5e0   : > { %2245 = vmatmul.f32.gmra.mxu3 %v2113_v14 }
 0x5e1   : > { %v2089_v19 = vpop.f32.mrf.mxu1 }
 0x5e2   : > { %2221 = vmatmul.f32.gmra.mxu2 %v2089_v19  ;;  %v2256_v19 = vpop.xlane.xlu0 %2255 }
 0x5e6   : > { %v2204_v43 = vpop.f32.mrf.mxu2 }
 0x5e7   : > { %v2225_v63 = vpop.f32.mrf.mxu3  ;;  %v5266_v1 = vadd.f32 %v5142_v47, %v2204_v43 }
 0x5e8   : > { %v5166_v8 = vadd.f32 %v5142_v47, %v2225_v63 }
 0x5ea   : > { %2299 = vadd.xlane.f32.xlu2 %v5166_v8 }
 0x5ef   : > { %v2228_v42 = vpop.f32.mrf.mxu3 }
 0x5f0   : > { %v5173_v59 = vadd.f32 %v5142_v47, %v2228_v42 }
 0x5f2   : > { %2301 = vadd.xlane.f32.xlu1 %v5173_v59  ;;  %2257 = vadd.xlane.f32.xlu2 %v5170_v20  ;;  %v2207_v33 = vpop.f32.mrf.mxu2 }
 0x5f7   : > { %v2231_v60 = vpop.f32.mrf.mxu3 }
 0x5f8   : > { %v5181_v39 = vadd.f32 %v5142_v47, %v2231_v60 }
 0x5fa   : > { %2303 = vadd.xlane.f32.xlu0 %v5181_v39  ;;  %2259 = vadd.xlane.f32.xlu1 %v5178_v31 }
 0x5ff   : > { %v2234_v52 = vpop.f32.mrf.mxu3 }
 0x600   : > { %v5191_v6 = vadd.f32 %v5142_v47, %v2234_v52 }
 0x601   : > { %v2210_v14 = vpop.f32.mrf.mxu2 }
 0x602   : > { %2261 = vadd.xlane.f32.xlu0 %v5188_v30  ;;  %2305 = vadd.xlane.f32.xlu2 %v5191_v6 }
 0x608   : > { %v2237_v9 = vpop.f32.mrf.mxu3 }
 0x609   : > { %v5199_v7 = vadd.f32 %v5142_v47, %v2237_v9  ;;  %v2213_v60 = vpop.f32.mrf.mxu2 }
 0x60a   : > { %2263 = vadd.xlane.f32.xlu2 %v5196_v46  ;;  %v5315_v16 = vadd.f32 %v5142_v47, %v2213_v60 }
 0x60b   : > { %2307 = vadd.xlane.f32.xlu1 %v5199_v7 }
 0x610   : > { %v2240_v4 = vpop.f32.mrf.mxu3 }
 0x611   : > { %v5207_v27 = vadd.f32 %v5142_v47, %v2240_v4  ;;  %v2317_v4 = vmul.f32 %v2256_v19, %v4021_v62  ;;  %v2216_v28 = vpop.f32.mrf.mxu2 }
 0x613   : > { %2265 = vadd.xlane.f32.xlu1 %v5204_v55  ;;  %2309 = vadd.xlane.f32.xlu0 %v5207_v27 }
 0x618   : > { %v2243_v15 = vpop.f32.mrf.mxu3 }
 0x619   : > { %v5215_v35 = vadd.f32 %v5142_v47, %v2243_v15  ;;  %v5304_v15 = vadd.f32 %v5142_v47, %v2201_v29 }
 0x61b   : > { %2267 = vadd.xlane.f32.xlu0 %v5212_v11  ;;  %2311 = vadd.xlane.f32.xlu2 %v5215_v35 }
 0x623   : > { %2273 = vadd.xlane.f32.xlu0 %v5223_v50  ;;  %2269 = vadd.xlane.f32.xlu2 %v5220_v45 }
 0x628   : > { %v2219_v43 = vpop.f32.mrf.mxu2 }
 0x62b   : > { %2279 = vadd.xlane.f32.xlu0 %v5232_v49  ;;  %2275 = vadd.xlane.f32.xlu2 %v5229_v48 }
 0x633   : > { %2411 = vadd.xlane.f32.xlu0 %v2379_v12  ;;  %2281 = vadd.xlane.f32.xlu2 %v5241_v40 }
 0x63b   : > { %2413 = vadd.xlane.f32.xlu2 %v2380_v58 }
 0x65d   : > { %v2300_v38 = vpop.xlane.xlu2 %2299 }
 0x65e   : > { %v2339_v56 = vmul.f32 %v2300_v38, %v4021_v62 }
 0x660   : > { %v5253_v51 = vsub.f32 %v5166_v8, %v2339_v56  ;;  %v5281_v8 = vadd.f32 %v5142_v47, %v2207_v33 }
 0x662   : > { %v2403_v13 = vmul.f32 %v5253_v51, %v5253_v51 }
 0x663   : > { %v2246_v3 = vpop.f32.mrf.mxu3 }
 0x664   : > { %v5258_v41 = vadd.f32 %v5142_v47, %v2246_v3  ;;  %2459 = vadd.xlane.f32.xlu0 %v2403_v13  ;;  %v5335_v13 = vadd.f32 %v5142_v47, %v2216_v28 }
 0x665   : > { %v2302_v18 = vpop.xlane.xlu1 %2301  ;;  %v2258_v23 = vpop.xlane.xlu2 %2257 }
 0x666   : > { %2313 = vadd.xlane.f32.xlu1 %v5258_v41  ;;  %v2340_v5 = vmul.f32 %v2302_v18, %v4021_v62  ;;  %v2318_v25 = vmul.f32 %v2258_v23, %v4021_v62 }
 0x668   : > { %v5263_v53 = vsub.f32 %v5173_v59, %v2340_v5  ;;  %v5278_v61 = vsub.f32 %v5170_v20, %v2318_v25  ;;  %v5287_v59 = vadd.f32 %v5142_v47, %v2192_v37  ;;  %v2222_v5 = vpop.f32.mrf.mxu2 }
 0x669   : > { %v5347_v25 = vadd.f32 %v5142_v47, %v2222_v5 }
 0x66a   : > { %v2404_v34 = vmul.f32 %v5263_v53, %v5263_v53  ;;  %v2382_v42 = vmul.f32 %v5278_v61, %v5278_v61 }
 0x66c   : > { %2461 = vadd.xlane.f32.xlu2 %v2404_v34  ;;  %2285 = vadd.xlane.f32.xlu0 %v5266_v1  ;;  %v5350_v34 = vadd.f32 %v5142_v47, %v2210_v14 }
 0x66d   : > { %v2260_v63 = vpop.xlane.xlu1 %2259  ;;  %v2304_v36 = vpop.xlane.xlu0 %2303 }
 0x66e   : > { %2271 = vadd.xlane.f32.xlu1 %v5273_v21  ;;  %v2319_v17 = vmul.f32 %v2260_v63, %v4021_v62  ;;  %v2341_v12 = vmul.f32 %v2304_v36, %v4021_v62 }
 0x670   : > { %v5292_v20 = vsub.f32 %v5178_v31, %v2319_v17  ;;  %v5330_v38 = vsub.f32 %v5181_v39, %v2341_v12 }
 0x672   : > { %v2383_v9 = vmul.f32 %v5292_v20, %v5292_v20  ;;  %v2405_v18 = vmul.f32 %v5330_v38, %v5330_v38 }
 0x674   : > { %2287 = vadd.xlane.f32.xlu2 %v5281_v8  ;;  %2417 = vadd.xlane.f32.xlu0 %v2382_v42 }
 0x675   : > { %v2306_v0 = vpop.xlane.xlu2 %2305  ;;  %v2262_v31 = vpop.xlane.xlu0 %2261 }
 0x676   : > { %2277 = vadd.xlane.f32.xlu1 %v5287_v59  ;;  %v2342_v52 = vmul.f32 %v2306_v0, %v4021_v62  ;;  %v2320_v19 = vmul.f32 %v2262_v31, %v4021_v62 }
 0x678   : > { %v5296_v44 = vsub.f32 %v5191_v6, %v2342_v52  ;;  %v5308_v6 = vsub.f32 %v5160_v10, %v2317_v4  ;;  %v5373_v4 = vadd.f32 %v5142_v47, %v2219_v43 }
 0x67a   : > { %v2406_v54 = vmul.f32 %v5296_v44, %v5296_v44  ;;  %v2381_v10 = vmul.f32 %v5308_v6, %v5308_v6 }
 0x67c   : > { %2419 = vadd.xlane.f32.xlu2 %v2383_v9  ;;  %2465 = vadd.xlane.f32.xlu0 %v2406_v54 }
 0x67d   : > { %v2264_v2 = vpop.xlane.xlu2 %2263 }
 0x67e   : > { %2283 = vadd.xlane.f32.xlu1 %v5304_v15  ;;  %v2308_v37 = vpop.xlane.xlu1 %2307  ;;  %v2321_v26 = vmul.f32 %v2264_v2, %v4021_v62 }
 0x67f   : > { %v2343_v22 = vmul.f32 %v2308_v37, %v4021_v62 }
 0x681   : > { %v5312_v32 = vsub.f32 %v5199_v7, %v2343_v22  ;;  %v5325_v7 = vsub.f32 %v5196_v46, %v2321_v26 }
 0x683   : > { %v2407_v58 = vmul.f32 %v5312_v32, %v5312_v32  ;;  %v2385_v3 = vmul.f32 %v5325_v7, %v5325_v7 }
 0x684   : > { %2291 = vadd.xlane.f32.xlu0 %v5315_v16 }
 0x685   : > { %2467 = vadd.xlane.f32.xlu2 %v2407_v58 }
 0x686   : > { %2415 = vadd.xlane.f32.xlu1 %v2381_v10  ;;  %v5327_v29 = vpop.xlane.xlu0 %2309  ;;  %v2266_v56 = vpop.xlane.xlu1 %2265 }
 0x687   : > { %v2322_v33 = vmul.f32 %v2266_v56, %v4021_v62 }
 0x689   : > { %v5344_v23 = vsub.f32 %v5204_v55, %v2322_v33  ;;  %v5358_v55 = vsub.f32 %v5188_v30, %v2320_v19 }
 0x68b   : > { %v2386_v63 = vmul.f32 %v5344_v23, %v5344_v23  ;;  %v2384_v0 = vmul.f32 %v5358_v55, %v5358_v55 }
 0x68c   : > { %2423 = vadd.xlane.f32.xlu0 %v2385_v3 }
 0x68d   : > { %2293 = vadd.xlane.f32.xlu2 %v5335_v13 }
 0x68e   : > { %2463 = vadd.xlane.f32.xlu1 %v2405_v18  ;;  %v5341_v46 = vpop.xlane.xlu2 %2311  ;;  %v2268_v39 = vpop.xlane.xlu0 %2267 }
 0x694   : > { %2297 = vadd.xlane.f32.xlu0 %v5347_v25 }
 0x695   : > { %2425 = vadd.xlane.f32.xlu2 %v2386_v63 }
 0x696   : > { %2289 = vadd.xlane.f32.xlu1 %v5350_v34  ;;  %v2270_v17 = vpop.xlane.xlu2 %2269  ;;  %v2274_v42 = vpop.xlane.xlu0 %2273 }
 0x697   : > { %v2324_v36 = vmul.f32 %v2270_v17, %v4021_v62  ;;  %v2326_v12 = vmul.f32 %v2274_v42, %v4021_v62 }
 0x699   : > { %v5362_v14 = vsub.f32 %v5220_v45, %v2324_v36  ;;  %v2323_v45 = vmul.f32 %v2268_v39, %v4021_v62  ;;  %v5393_v43 = vsub.f32 %v5223_v50, %v2326_v12 }
 0x69b   : > { %v2388_v60 = vmul.f32 %v5362_v14, %v5362_v14  ;;  %v5380_v22 = vsub.f32 %v5212_v11, %v2323_v45  ;;  %v2390_v39 = vmul.f32 %v5393_v43, %v5393_v43 }
 0x69d   : > { %2429 = vadd.xlane.f32.xlu0 %v2388_v60  ;;  %v2387_v10 = vmul.f32 %v5380_v22, %v5380_v22  ;;  %v5405_v60 = vld [vmem:[%s5928_s10] ss:$0 sm:$0xff] }
 0x69e   : > { %2421 = vadd.xlane.f32.xlu1 %v2384_v0  ;;  %v2276_v52 = vpop.xlane.xlu2 %2275  ;;  %v2280_v9 = vpop.xlane.xlu0 %2279 }
 0x69f   : > { %v2327_v54 = vmul.f32 %v2276_v52, %v4021_v62  ;;  %v2329_v18 = vmul.f32 %v2280_v9, %v4021_v62  ;;  %v5413_v9 = vld [vmem:[%s5929_s11] ss:$0 sm:$0xff] }
 0x6a1   : > { %v5370_v30 = vsub.f32 %v5229_v48, %v2327_v54  ;;  %v5400_v63 = vsub.f32 %v5232_v49, %v2329_v18 }
 0x6a3   : > { %v2391_v31 = vmul.f32 %v5370_v30, %v5370_v30  ;;  %v2393_v0 = vmul.f32 %v5400_v63, %v5400_v63 }
 0x6a5   : > { %2435 = vadd.xlane.f32.xlu0 %v2391_v31 }
 0x6a6   : > { %2295 = vadd.xlane.f32.xlu1 %v5373_v4  ;;  %v2282_v37 = vpop.xlane.xlu2 %2281  ;;  %v2412_v28 = vpop.xlane.xlu0 %2411 }
 0x6a7   : > { %v2330_v2 = vmul.f32 %v2282_v37, %v4021_v62  ;;  %v2475_v48 = vmul.f32 %v2412_v28, %v4021_v62 }
 0x6a9   : > { %v5385_v47 = vsub.f32 %v5241_v40, %v2330_v2  ;;  %v2507_v26 = vadd.f32 1e-05, %v2475_v48 }
 0x6ab   : > { %3614 = vrsqrt.f32 %v2507_v26  ;;  %v2394_v58 = vmul.f32 %v5385_v47, %v5385_v47  ;;  %vm2545_vm2 = vweird.f32 %v2507_v26 }
 0x6ad   : > { %2441 = vadd.xlane.f32.xlu0 %v2394_v58 }
 0x6ae   : > { %2427 = vadd.xlane.f32.xlu1 %v2387_v10  ;;  %v2414_v11 = vpop.xlane.xlu2 %2413 }
 0x6af   : > { %v2476_v56 = vmul.f32 %v2414_v11, %v4021_v62 }
 0x6b1   : > { %v3615_v40 = vpop.eup %3614  ;;  %v2508_v3 = vadd.f32 1e-05, %v2476_v56 }
 0x6b2   : > { %v2540_v33 = vmul.f32 %v3615_v40, %v2507_v26  ;;  %vm2546_vm1 = vweird.f32 %v3615_v40 }
 0x6b3   : > { %3616 = vrsqrt.f32 %v2508_v3  ;;  %vm2547_vm3 = vmor %vm2545_vm2, %vm2546_vm1  ;;  %vm2555_vm5 = vweird.f32 %v2508_v3 }
 0x6b4   : > { %v2541_v5 = vmul.f32 %v3615_v40, %v2540_v33 }
 0x6b6   : > { %2433 = vadd.xlane.f32.xlu1 %v2390_v39  ;;  %v2542_v19 = vmul.f32 0.5, %v2541_v5 }
 0x6b8   : > { %v2543_v50 = vsub.f32 1.5, %v2542_v19 }
 0x6b9   : > { %v3617_v17 = vpop.eup %3616 }
 0x6ba   : > { %v2544_v42 = vmul.f32 %v3615_v40, %v2543_v50  ;;  %v2550_v36 = vmul.f32 %v3617_v17, %v2508_v3  ;;  %vm2556_vm4 = vweird.f32 %v3617_v17 }
 0x6bb   : > { %vm2557_vm7 = vmor %vm2555_vm5, %vm2556_vm4 }
 0x6bc   : > { %v2548_v52 = vsel %vm2547_vm3, %v3615_v40, %v2544_v42  ;;  %v2551_v49 = vmul.f32 %v3617_v17, %v2550_v36  ;;  %v3058_v40 = vld [vmem:[%s5421_s24 + $0x8] sm:$0xff] }
 0x6bd   : > { %v2859_v54 = vmul.f32 %v2548_v52, %v5237_v57  ;;  %v3057_v57 = vld [vmem:[%s5421_s24] sm:$0xff] }
 0x6be   : > { %2439 = vadd.xlane.f32.xlu1 %v2393_v0  ;;  %v2552_v45 = vmul.f32 0.5, %v2551_v49 }
 0x6bf   : > { %v2894_v31 = vmul.f32 %v5405_v60, %v2859_v54 }
 0x6c0   : > { %v2553_v37 = vsub.f32 1.5, %v2552_v45 }
 0x6c1   : > { %v2929_v28 = vadd.f32 %v5413_v9, %v2894_v31 }
 0x6c2   : > { %v2554_v2 = vmul.f32 %v3617_v17, %v2553_v37 }
 0x6c3   : > { %vm2961_vm6 = vcmp.ge.f32.partialorder %v2929_v28, 0.0  ;;  %v2993_v48 = vmul.f32 0.01, %v2929_v28 }
 0x6c4   : > { %v2558_v26 = vsel %vm2557_vm7, %v3617_v17, %v2554_v2 }
 0x6c5   : > { %v3025_v12 = vsel %vm2961_vm6, %v2929_v28, %v2993_v48  ;;  %v2860_v58 = vmul.f32 %v2558_v26, %v5247_v24 }
 0x6c6   : > { %v3089_v10 = vadd.f32 %v3057_v57, %v3025_v12 }
 0x6c7   : > { %v2895_v11 = vmul.f32 %v5405_v60, %v2860_v58 }
 0x6c8   : > { %3121 = vst [vmem:[%s5429_s14] sm:$0xff] %v3089_v10 }
 0x6c9   : > { %v2930_v56 = vadd.f32 %v5413_v9, %v2895_v11 }
 0x6cb   : > { %vm2962_vm8 = vcmp.ge.f32.partialorder %v2930_v56, 0.0  ;;  %v2994_v3 = vmul.f32 0.01, %v2930_v56 }
 0x6cd   : > { %v3026_v33 = vsel %vm2962_vm8, %v2930_v56, %v2994_v3 }
 0x6ce   : > { %v3090_v18 = vadd.f32 %v3058_v40, %v3026_v33 }
 0x6d0   : > { %3122 = vst [vmem:[%s5429_s14 + $0x8] sm:$0xff] %v3090_v18 }
 0x6d7   : > { %v2460_v39 = vpop.xlane.xlu0 %2459 }
 0x6d8   : > { %v2499_v5 = vmul.f32 %v2460_v39, %v4021_v62 }
 0x6d9   : > { %v5436_v24 = vpop.xlane.xlu1 %2313 }
 0x6da   : > { %v2531_v19 = vadd.f32 1e-05, %v2499_v5 }
 0x6dc   : > { %3618 = vrsqrt.f32 %v2531_v19  ;;  %vm2785_vm10 = vweird.f32 %v2531_v19 }
 0x6df   : > { %v2462_v50 = vpop.xlane.xlu2 %2461  ;;  %v2286_v17 = vpop.xlane.xlu0 %2285 }
 0x6e0   : > { %v2500_v42 = vmul.f32 %v2462_v50, %v4021_v62  ;;  %v2332_v36 = vmul.f32 %v2286_v17, %v4021_v62 }
 0x6e1   : > { %v2272_v0 = vpop.xlane.xlu1 %2271 }
 0x6e2   : > { %v2325_v52 = vmul.f32 %v2272_v0, %v4021_v62  ;;  %v3619_v49 = vpop.eup %3618  ;;  %v2532_v54 = vadd.f32 1e-05, %v2500_v42  ;;  %v5442_v45 = vsub.f32 %v5266_v1, %v2332_v36 }
 0x6e3   : > { %v2780_v31 = vmul.f32 %v3619_v49, %v2531_v19  ;;  %vm2786_vm9 = vweird.f32 %v3619_v49 }
 0x6e4   : > { %v5445_v37 = vsub.f32 %v5273_v21, %v2325_v52  ;;  %3620 = vrsqrt.f32 %v2532_v54  ;;  %v2396_v28 = vmul.f32 %v5442_v45, %v5442_v45  ;;  %vm2787_vm11 = vmor %vm2785_vm10, %vm2786_vm9  ;;  %vm2795_vm13 = vweird.f32 %v2532_v54 }
 0x6e5   : > { %v2781_v2 = vmul.f32 %v3619_v49, %v2780_v31 }
 0x6e6   : > { %v2389_v57 = vmul.f32 %v5445_v37, %v5445_v37  ;;  %2445 = vadd.xlane.f32.xlu1 %v2396_v28 }
 0x6e7   : > { %v2782_v48 = vmul.f32 0.5, %v2781_v2  ;;  %v2288_v26 = vpop.xlane.xlu2 %2287  ;;  %v2418_v12 = vpop.xlane.xlu0 %2417 }
 0x6e8   : > { %2431 = vadd.xlane.f32.xlu2 %v2389_v57  ;;  %v2333_v1 = vmul.f32 %v2288_v26, %v4021_v62  ;;  %v2478_v58 = vmul.f32 %v2418_v12, %v4021_v62 }
 0x6e9   : > { %v2278_v10 = vpop.xlane.xlu1 %2277  ;;  %v2783_v21 = vsub.f32 1.5, %v2782_v48 }
 0x6ea   : > { %v2328_v11 = vmul.f32 %v2278_v10, %v4021_v62  ;;  %v3621_v56 = vpop.eup %3620  ;;  %v5455_v40 = vsub.f32 %v5281_v8, %v2333_v1  ;;  %v5457_v3 = vadd.f32 1e-05, %v2478_v58  ;;  %v3081_v10 = vld [vmem:[%s5421_s24 + $0xc0] sm:$0xff] }
 0x6eb   : > { %v2784_v33 = vmul.f32 %v3619_v49, %v2783_v21  ;;  %v2790_v18 = vmul.f32 %v3621_v56, %v2532_v54  ;;  %vm2796_vm12 = vweird.f32 %v3621_v56 }
 0x6ec   : > { %v5460_v39 = vsub.f32 %v5287_v59, %v2328_v11  ;;  %3622 = vrsqrt.f32 %v5457_v3  ;;  %v2397_v5 = vmul.f32 %v5455_v40, %v5455_v40  ;;  %vm2797_vm15 = vmor %vm2795_vm13, %vm2796_vm12  ;;  %vm2575_vm1 = vweird.f32 %v5457_v3 }
 0x6ed   : > { %v2788_v50 = vsel %vm2787_vm11, %v3619_v49, %v2784_v33  ;;  %v2791_v17 = vmul.f32 %v3621_v56, %v2790_v18 }
 0x6ee   : > { %v2392_v8 = vmul.f32 %v5460_v39, %v5460_v39  ;;  %v2883_v42 = vmul.f32 %v2788_v50, %v5253_v51  ;;  %2447 = vadd.xlane.f32.xlu0 %v2397_v5 }
 0x6ef   : > { %v2792_v36 = vmul.f32 0.5, %v2791_v17  ;;  %v2420_v19 = vpop.xlane.xlu2 %2419  ;;  %v2466_v0 = vpop.xlane.xlu0 %2465 }
 0x6f0   : > { %2437 = vadd.xlane.f32.xlu2 %v2392_v8  ;;  %v2918_v59 = vmul.f32 %v5405_v60, %v2883_v42  ;;  %v2479_v52 = vmul.f32 %v2420_v19, %v4021_v62  ;;  %v2502_v31 = vmul.f32 %v2466_v0, %v4021_v62 }
 0x6f1   : > { %v2284_v28 = vpop.xlane.xlu1 %2283  ;;  %v2793_v49 = vsub.f32 1.5, %v2792_v36 }
 0x6f2   : > { %v2331_v2 = vmul.f32 %v2284_v28, %v4021_v62  ;;  %v3623_v57 = vpop.eup %3622  ;;  %v2953_v51 = vadd.f32 %v5413_v9, %v2918_v59  ;;  %v5473_v48 = vadd.f32 1e-05, %v2479_v52  ;;  %v5475_v26 = vadd.f32 1e-05, %v2502_v31 }
 0x6f3   : > { %v2794_v12 = vmul.f32 %v3621_v56, %v2793_v49  ;;  %v2570_v1 = vmul.f32 %v3623_v57, %v5457_v3  ;;  %vm2576_vm0 = vweird.f32 %v3623_v57  ;;  %v2345_v52 = vmul.f32 %v5341_v46, %v4021_v62 }
 0x6f4   : > { %v5479_v58 = vsub.f32 %v5304_v15, %v2331_v2  ;;  %vm2985_vm14 = vcmp.ge.f32.partialorder %v2953_v51, 0.0  ;;  %v3017_v21 = vmul.f32 0.01, %v2953_v51  ;;  %3624 = vrsqrt.f32 %v5473_v48  ;;  %vm2577_vm3 = vmor %vm2575_vm1, %vm2576_vm0 }
 0x6f5   : > { %v2798_v11 = vsel %vm2797_vm15, %v3621_v56, %v2794_v12  ;;  %v2571_v33 = vmul.f32 %v3623_v57, %v2570_v1  ;;  %3626 = vrsqrt.f32 %v5475_v26  ;;  %v2344_v56 = vmul.f32 %v5327_v29, %v4021_v62  ;;  %v3082_v1 = vld [vmem:[%s5421_s24 + $0xc8] sm:$0xff] }
 0x6f6   : > { %v3049_v18 = vsel %vm2985_vm14, %v2953_v51, %v3017_v21  ;;  %v2884_v5 = vmul.f32 %v2798_v11, %v5263_v53  ;;  %v2395_v54 = vmul.f32 %v5479_v58, %v5479_v58  ;;  %vm2585_vm5 = vweird.f32 %v5473_v48 }
 0x6f7   : > { %v3113_v50 = vadd.f32 %v3081_v10, %v3049_v18  ;;  %v2572_v15 = vmul.f32 0.5, %v2571_v33  ;;  %v2292_v17 = vpop.xlane.xlu0 %2291  ;;  %v5511_v3 = vsub.f32 %v5207_v27, %v2344_v56  ;;  %vm2815_vm7 = vweird.f32 %v5475_v26 }
 0x6f8   : > { %v2919_v8 = vmul.f32 %v5405_v60, %v2884_v5  ;;  %v2468_v42 = vpop.xlane.xlu2 %2467  ;;  %v2335_v36 = vmul.f32 %v2292_v17, %v4021_v62  ;;  %2443 = vadd.xlane.f32.xlu2 %v2395_v54  ;;  %v5519_v54 = vsub.f32 %v5215_v35, %v2345_v52 }
 0x6f9   : > { %v2416_v19 = vpop.xlane.xlu1 %2415  ;;  %3145 = vst [vmem:[%s5429_s14 + $0xc0] sm:$0xff] %v3113_v50  ;;  %v2573_v0 = vsub.f32 1.5, %v2572_v15  ;;  %v2503_v53 = vmul.f32 %v2468_v42, %v4021_v62 }
 0x6fa   : > { %v5493_v59 = vpop.eup %3624  ;;  %v2954_v31 = vadd.f32 %v5413_v9, %v2919_v8  ;;  %v2477_v28 = vmul.f32 %v2416_v19, %v4021_v62  ;;  %v5505_v12 = vsub.f32 %v5315_v16, %v2335_v36 }
 0x6fb   : > { %v3627_v49 = vpop.eup %3626  ;;  %v2574_v2 = vmul.f32 %v3623_v57, %v2573_v0  ;;  %v2580_v29 = vmul.f32 %v5493_v59, %v5473_v48  ;;  %v5502_v51 = vadd.f32 1e-05, %v2503_v53  ;;  %vm2586_vm4 = vweird.f32 %v5493_v59 }
 0x6fc   : > { %vm2986_vm2 = vcmp.ge.f32.partialorder %v2954_v31, 0.0  ;;  %v3018_v10 = vmul.f32 0.01, %v2954_v31  ;;  %v2810_v46 = vmul.f32 %v3627_v49, %v5475_v26  ;;  %v5516_v5 = vadd.f32 1e-05, %v2477_v28  ;;  %vm2587_vm9 = vmor %vm2585_vm5, %vm2586_vm4 }
 0x6fd   : > { %v2578_v21 = vsel %vm2577_vm3, %v3623_v57, %v2574_v2  ;;  %v2581_v11 = vmul.f32 %v5493_v59, %v2580_v29  ;;  %3628 = vrsqrt.f32 %v5502_v51  ;;  %v2399_v27 = vmul.f32 %v5505_v12, %v5505_v12  ;;  %v3060_v29 = vld [vmem:[%s5421_s24 + $0x18] sm:$0xff] }
 0x6fe   : > { %v3050_v33 = vsel %vm2986_vm2, %v2954_v31, %v3018_v10  ;;  %v2862_v16 = vmul.f32 %v2578_v21, %v5278_v61  ;;  %v2811_v18 = vmul.f32 %v3627_v49, %v2810_v46  ;;  %3630 = vrsqrt.f32 %v5516_v5 }
 0x6ff   : > { %v3114_v50 = vadd.f32 %v3082_v1, %v3050_v33  ;;  %v2582_v15 = vmul.f32 0.5, %v2581_v11  ;;  %v2424_v57 = vpop.xlane.xlu0 %2423  ;;  %2451 = vadd.xlane.f32.xlu1 %v2399_v27  ;;  %vm2816_vm6 = vweird.f32 %v3627_v49  ;;  %v5552_v26 = vmul.f32 %v5519_v54, %v5519_v54 }
 0x700   : > { %v2897_v17 = vmul.f32 %v5405_v60, %v2862_v16  ;;  %v2812_v8 = vmul.f32 0.5, %v2811_v18  ;;  %v2294_v61 = vpop.xlane.xlu2 %2293  ;;  %v2481_v19 = vmul.f32 %v2424_v57, %v4021_v62  ;;  %vm2817_vm10 = vmor %vm2815_vm7, %vm2816_vm6  ;;  %vm2825_vm11 = vweird.f32 %v5502_v51 }
 0x701   : > { %v2464_v42 = vpop.xlane.xlu1 %2463  ;;  %3146 = vst [vmem:[%s5429_s14 + $0xc8] sm:$0xff] %v3114_v50  ;;  %v2583_v36 = vsub.f32 1.5, %v2582_v15  ;;  %v2336_v35 = vmul.f32 %v2294_v61, %v4021_v62  ;;  %vm2565_vm12 = vweird.f32 %v5516_v5 }
 0x702   : > { %v2501_v56 = vmul.f32 %v2464_v42, %v4021_v62  ;;  %v2932_v0 = vadd.f32 %v5413_v9, %v2897_v17  ;;  %v2813_v53 = vsub.f32 1.5, %v2812_v8  ;;  %v5536_v28 = vadd.f32 1e-05, %v2481_v19 }
 0x703   : > { %v5532_v52 = vpop.eup %3628  ;;  %v2584_v31 = vmul.f32 %v5493_v59, %v2583_v36  ;;  %v5547_v21 = vsub.f32 %v5335_v13, %v2336_v35 }
 0x704   : > { %v5538_v2 = vadd.f32 1e-05, %v2501_v56  ;;  %vm2964_vm8 = vcmp.ge.f32.partialorder %v2932_v0, 0.0  ;;  %v2996_v1 = vmul.f32 0.01, %v2932_v0  ;;  %v2814_v10 = vmul.f32 %v3627_v49, %v2813_v53  ;;  %v5554_v11 = vpop.eup %3630 }
 0x705   : > { %v2820_v48 = vmul.f32 %v5532_v52, %v5502_v51  ;;  %v2588_v46 = vsel %vm2587_vm9, %v5493_v59, %v2584_v31  ;;  %3632 = vrsqrt.f32 %v5536_v28  ;;  %v2560_v13 = vmul.f32 %v5554_v11, %v5516_v5 }
 0x706   : > { %v3028_v33 = vsel %vm2964_vm8, %v2932_v0, %v2996_v1  ;;  %v2863_v16 = vmul.f32 %v2588_v46, %v5292_v20  ;;  %v2818_v18 = vsel %vm2817_vm10, %v3627_v49, %v2814_v10  ;;  %3634 = vrsqrt.f32 %v5538_v2  ;;  %v3084_v46 = vld [vmem:[%s5421_s24 + $0xd8] sm:$0xff] }
 0x707   : > { %v2821_v50 = vmul.f32 %v5532_v52, %v2820_v48  ;;  %v3092_v59 = vadd.f32 %v3060_v29, %v3028_v33  ;;  %v2886_v15 = vmul.f32 %v2818_v18, %v5296_v44  ;;  %v2298_v27 = vpop.xlane.xlu0 %2297  ;;  %v2561_v44 = vmul.f32 %v5554_v11, %v2560_v13  ;;  %v3061_v29 = vld [vmem:[%s5421_s24 + $0x20] sm:$0xff] }
 0x708   : > { %v2898_v57 = vmul.f32 %v5405_v60, %v2863_v16  ;;  %v2426_v20 = vpop.xlane.xlu2 %2425  ;;  %v2400_v61 = vmul.f32 %v5547_v21, %v5547_v21  ;;  %vm2826_vm13 = vweird.f32 %v5532_v52  ;;  %vm2566_vm14 = vweird.f32 %v5554_v11 }
 0x709   : > { %v2822_v17 = vmul.f32 0.5, %v2821_v50  ;;  %v2290_v49 = vpop.xlane.xlu1 %2289  ;;  %3124 = vst [vmem:[%s5429_s14 + $0x18] sm:$0xff] %v3092_v59  ;;  %v2921_v8 = vmul.f32 %v5405_v60, %v2886_v15  ;;  %v2482_v42 = vmul.f32 %v2426_v20, %v4021_v62  ;;  %v2562_v0 = vmul.f32 0.5, %v2561_v44  ;;  %vm2827_vm2 = vmor %vm2825_vm11, %vm2826_vm13 }
 0x70a   : > { %v2933_v36 = vadd.f32 %v5413_v9, %v2898_v57  ;;  %2453 = vadd.xlane.f32.xlu0 %v2400_v61  ;;  %v2338_v31 = vmul.f32 %v2298_v27, %v4021_v62  ;;  %vm2605_vm0 = vweird.f32 %v5536_v28  ;;  %v2334_v18 = vmul.f32 %v2290_v49, %v4021_v62  ;;  %vm2567_vm3 = vmor %vm2565_vm12, %vm2566_vm14 }
 0x70b   : > { %v2823_v35 = vsub.f32 1.5, %v2822_v17  ;;  %v5574_v19 = vpop.eup %3632  ;;  %v2956_v56 = vadd.f32 %v5413_v9, %v2921_v8  ;;  %v5577_v53 = vadd.f32 1e-05, %v2482_v42  ;;  %v2563_v16 = vsub.f32 1.5, %v2562_v0 }
 0x70c   : > { %vm2965_vm15 = vcmp.ge.f32.partialorder %v2933_v36, 0.0  ;;  %v2997_v1 = vmul.f32 0.01, %v2933_v36  ;;  %v2600_v48 = vmul.f32 %v5574_v19, %v5536_v28  ;;  %v5591_v50 = vpop.eup %3634  ;;  %vm2805_vm4 = vweird.f32 %v5538_v2 }
 0x70d   : > { %v2824_v10 = vmul.f32 %v5532_v52, %v2823_v35  ;;  %vm2988_vm1 = vcmp.ge.f32.partialorder %v2956_v56, 0.0  ;;  %v3020_v33 = vmul.f32 0.01, %v2956_v56  ;;  %3636 = vrsqrt.f32 %v5577_v53 }
 0x70e   : > { %v3029_v59 = vsel %vm2965_vm15, %v2933_v36, %v2997_v1  ;;  %v2601_v13 = vmul.f32 %v5574_v19, %v2600_v48  ;;  %v2564_v51 = vmul.f32 %v5554_v11, %v2563_v16  ;;  %vm2606_vm5 = vweird.f32 %v5574_v19  ;;  %v3085_v48 = vld [vmem:[%s5421_s24 + $0xe0] sm:$0xff] }
 0x70f   : > { %v2828_v15 = vsel %vm2827_vm2, %v5532_v52, %v2824_v10  ;;  %v3093_v27 = vadd.f32 %v3061_v29, %v3029_v59  ;;  %v3052_v57 = vsel %vm2988_vm1, %v2956_v56, %v3020_v33  ;;  %v2800_v52 = vmul.f32 %v5591_v50, %v5538_v2  ;;  %vm2607_vm7 = vmor %vm2605_vm0, %vm2606_vm5 }
 0x710   : > { %v2887_v17 = vmul.f32 %v2828_v15, %v5312_v32  ;;  %v3116_v20 = vadd.f32 %v3084_v46, %v3052_v57  ;;  %v2602_v49 = vmul.f32 0.5, %v2601_v13  ;;  %v2430_v8 = vpop.xlane.xlu0 %2429  ;;  %v2568_v32 = vsel %vm2567_vm3, %v5554_v11, %v2564_v51 }
 0x711   : > { %v2422_v44 = vpop.xlane.xlu1 %2421  ;;  %3125 = vst [vmem:[%s5429_s14 + $0x20] sm:$0xff] %v3093_v27  ;;  %v5610_v42 = vsub.f32 %v5347_v25, %v2338_v31  ;;  %v2861_v5 = vmul.f32 %v2568_v32, %v5308_v6  ;;  %v2801_v35 = vmul.f32 %v5591_v50, %v2800_v52  ;;  %v5616_v56 = vsub.f32 %v5350_v34, %v2334_v18 }
 0x712   : > { %v2922_v61 = vmul.f32 %v5405_v60, %v2887_v17  ;;  %3148 = vst [vmem:[%s5429_s14 + $0xd8] sm:$0xff] %v3116_v20  ;;  %v2603_v36 = vsub.f32 1.5, %v2602_v49  ;;  %2471 = vadd.xlane.f32.xlu0 %v5552_v26  ;;  %v2484_v25 = vmul.f32 %v2430_v8, %v4021_v62  ;;  %v2480_v31 = vmul.f32 %v2422_v44, %v4021_v62  ;;  %v3059_v17 = vld [vmem:[%s5421_s24 + $0x10] sm:$0xff] }
 0x713   : > { %v2402_v11 = vmul.f32 %v5610_v42, %v5610_v42  ;;  %v3637_v29 = vpop.eup %3636  ;;  %v2896_v6 = vmul.f32 %v5405_v60, %v2861_v5  ;;  %v2802_v10 = vmul.f32 0.5, %v2801_v35  ;;  %v2398_v34 = vmul.f32 %v5616_v56, %v5616_v56 }
 0x714   : > { %v2957_v0 = vadd.f32 %v5413_v9, %v2922_v61  ;;  %v2604_v1 = vmul.f32 %v5574_v19, %v2603_v36  ;;  %vm2806_vm8 = vweird.f32 %v5591_v50  ;;  %v2610_v46 = vmul.f32 %v3637_v29, %v5577_v53 }
 0x715   : > { %2457 = vadd.xlane.f32.xlu1 %v2402_v11  ;;  %v2931_v33 = vadd.f32 %v5413_v9, %v2896_v6  ;;  %v2803_v18 = vsub.f32 1.5, %v2802_v10  ;;  %2449 = vadd.xlane.f32.xlu2 %v2398_v34  ;;  %v5637_v59 = vadd.f32 1e-05, %v2484_v25  ;;  %v5640_v28 = vadd.f32 1e-05, %v2480_v31  ;;  %vm2807_vm10 = vmor %vm2805_vm4, %vm2806_vm8  ;;  %v3063_v11 = vld [vmem:[%s5421_s24 + $0x30] sm:$0xff] }
 0x716   : > { %vm2989_vm6 = vcmp.ge.f32.partialorder %v2957_v0, 0.0  ;;  %v3021_v26 = vmul.f32 0.01, %v2957_v0  ;;  %v2608_v16 = vsel %vm2607_vm7, %v5574_v19, %v2604_v1  ;;  %v2611_v27 = vmul.f32 %v3637_v29, %v2610_v46 }
 0x717   : > { %v2865_v13 = vmul.f32 %v2608_v16, %v5325_v7  ;;  %vm2963_vm9 = vcmp.ge.f32.partialorder %v2931_v33, 0.0  ;;  %v2995_v51 = vmul.f32 0.01, %v2931_v33  ;;  %v2804_v20 = vmul.f32 %v5591_v50, %v2803_v18 }
 0x718   : > { %v3053_v15 = vsel %vm2989_vm6, %v2957_v0, %v3021_v26  ;;  %v2436_v49 = vpop.xlane.xlu0 %2435  ;;  %v2612_v7 = vmul.f32 0.5, %v2611_v27  ;;  %3638 = vrsqrt.f32 %v5637_v59  ;;  %v2408_v8 = vmul.f32 %v5511_v3, %v5511_v3 }
 0x719   : > { %v3117_v57 = vadd.f32 %v3085_v48, %v3053_v15  ;;  %v2296_v52 = vpop.xlane.xlu1 %2295  ;;  %v2900_v19 = vmul.f32 %v5405_v60, %v2865_v13  ;;  %v3027_v44 = vsel %vm2963_vm9, %v2931_v33, %v2995_v51  ;;  %v2808_v61 = vsel %vm2807_vm10, %v5591_v50, %v2804_v20  ;;  %v3083_v13 = vld [vmem:[%s5421_s24 + $0xd0] sm:$0xff] }
 0x71a   : > { %vm2616_vm11 = vweird.f32 %v3637_v29  ;;  %3640 = vrsqrt.f32 %v5640_v28  ;;  %v3091_v32 = vadd.f32 %v3059_v17, %v3027_v44  ;;  %v2885_v2 = vmul.f32 %v2808_v61, %v5330_v38  ;;  %v3064_v61 = vld [vmem:[%s5421_s24 + $0x38] sm:$0xff] }
 0x71b   : > { %3149 = vst [vmem:[%s5429_s14 + $0xe0] sm:$0xff] %v3117_v57  ;;  %v2935_v5 = vadd.f32 %v5413_v9, %v2900_v19  ;;  %v2613_v36 = vsub.f32 1.5, %v2612_v7  ;;  %vm2615_vm12 = vweird.f32 %v5577_v53  ;;  %v2487_v35 = vmul.f32 %v2436_v49, %v4021_v62 }
 0x71c   : > { %v2337_v0 = vmul.f32 %v2296_v52, %v4021_v62  ;;  %3123 = vst [vmem:[%s5429_s14 + $0x10] sm:$0xff] %v3091_v32  ;;  %v2920_v50 = vmul.f32 %v5405_v60, %v2885_v2  ;;  %vm2617_vm14 = vmor %vm2615_vm12, %vm2616_vm11  ;;  %v2346_v15 = vmul.f32 %v5436_v24, %v4021_v62  ;;  %vm2635_vm3 = vweird.f32 %v5637_v59 }
 0x71d   : > { %vm2967_vm13 = vcmp.ge.f32.partialorder %v2935_v5, 0.0  ;;  %v2999_v25 = vmul.f32 0.01, %v2935_v5  ;;  %v2614_v31 = vmul.f32 %v3637_v29, %v2613_v36  ;;  %2469 = vadd.xlane.f32.xlu1 %v2408_v8  ;;  %v5664_v6 = vadd.f32 1e-05, %v2487_v35 }
 0x71e   : > { %v3639_v38 = vpop.eup %3638  ;;  %v2955_v1 = vadd.f32 %v5413_v9, %v2920_v50  ;;  %v5668_v34 = vsub.f32 %v5373_v4, %v2337_v0  ;;  %v5685_v7 = vsub.f32 %v5258_v41, %v2346_v15  ;;  %vm2595_vm5 = vweird.f32 %v5640_v28 }
 0x71f   : > { %v3031_v53 = vsel %vm2967_vm13, %v2935_v5, %v2999_v25  ;;  %v2618_v10 = vsel %vm2617_vm14, %v3637_v29, %v2614_v31  ;;  %v2630_v33 = vmul.f32 %v3639_v38, %v5637_v59  ;;  %3642 = vrsqrt.f32 %v5664_v6 }
 0x720   : > { %v3641_v48 = vpop.eup %3640  ;;  %v3095_v26 = vadd.f32 %v3063_v11, %v3031_v53  ;;  %v2866_v46 = vmul.f32 %v2618_v10, %v5344_v23  ;;  %v2442_v16 = vpop.xlane.xlu0 %2441  ;;  %vm2987_vm15 = vcmp.ge.f32.partialorder %v2955_v1, 0.0  ;;  %v3019_v27 = vmul.f32 0.01, %v2955_v1 }
 0x721   : > { %v2428_v18 = vpop.xlane.xlu1 %2427  ;;  %v2590_v57 = vmul.f32 %v3641_v48, %v5640_v28  ;;  %v2631_v29 = vmul.f32 %v3639_v38, %v2630_v33  ;;  %v2401_v51 = vmul.f32 %v5668_v34, %v5668_v34  ;;  %v2490_v24 = vmul.f32 %v2442_v16, %v4021_v62 }
 0x722   : > { %3127 = vst [vmem:[%s5429_s14 + $0x30] sm:$0xff] %v3095_v26  ;;  %v2901_v4 = vmul.f32 %v5405_v60, %v2866_v46  ;;  %v3051_v23 = vsel %vm2987_vm15, %v2955_v1, %v3019_v27  ;;  %v2483_v19 = vmul.f32 %v2428_v18, %v4021_v62  ;;  %vm2636_vm1 = vweird.f32 %v3639_v38 }
 0x723   : > { %v2591_v17 = vmul.f32 %v3641_v48, %v2590_v57  ;;  %v3115_v20 = vadd.f32 %v3083_v13, %v3051_v23  ;;  %v2632_v52 = vmul.f32 0.5, %v2631_v29  ;;  %2455 = vadd.xlane.f32.xlu2 %v2401_v51  ;;  %v5687_v44 = vadd.f32 1e-05, %v2490_v24  ;;  %vm2637_vm4 = vmor %vm2635_vm3, %vm2636_vm1  ;;  %v3066_v29 = vld [vmem:[%s5421_s24 + $0x48] sm:$0xff] }
 0x724   : > { %v2936_v49 = vadd.f32 %v5413_v9, %v2901_v4  ;;  %vm2596_vm2 = vweird.f32 %v3641_v48  ;;  %v5692_v36 = vadd.f32 1e-05, %v2483_v19  ;;  %v2410_v59 = vmul.f32 %v5685_v7, %v5685_v7  ;;  %v3062_v24 = vld [vmem:[%s5421_s24 + $0x28] sm:$0xff] }
 0x725   : > { %v2592_v8 = vmul.f32 0.5, %v2591_v17  ;;  %3147 = vst [vmem:[%s5429_s14 + $0xd0] sm:$0xff] %v3115_v20  ;;  %v2633_v5 = vsub.f32 1.5, %v2632_v52  ;;  %3644 = vrsqrt.f32 %v5687_v44  ;;  %v3643_v35 = vpop.eup %3642  ;;  %vm2597_vm6 = vmor %vm2595_vm5, %vm2596_vm2  ;;  %vm2665_vm8 = vweird.f32 %v5664_v6 }
 0x726   : > { %vm2968_vm0 = vcmp.ge.f32.partialorder %v2936_v49, 0.0  ;;  %v3000_v32 = vmul.f32 0.01, %v2936_v49  ;;  %v2660_v31 = vmul.f32 %v3643_v35, %v5664_v6  ;;  %3646 = vrsqrt.f32 %v5692_v36 }
 0x727   : > { %v2593_v2 = vsub.f32 1.5, %v2592_v8  ;;  %v2634_v0 = vmul.f32 %v3639_v38, %v2633_v5  ;;  %vm2666_vm7 = vweird.f32 %v3643_v35  ;;  %vm2695_vm13 = vweird.f32 %v5687_v44 }
 0x728   : > { %v3032_v41 = vsel %vm2968_vm0, %v2936_v49, %v3000_v32  ;;  %v2661_v46 = vmul.f32 %v3643_v35, %v2660_v31  ;;  %vm2667_vm11 = vmor %vm2665_vm8, %vm2666_vm7  ;;  %vm2625_vm0 = vweird.f32 %v5692_v36 }
 0x729   : > { %v2434_v11 = vpop.xlane.xlu1 %2433  ;;  %v3096_v25 = vadd.f32 %v3064_v61, %v3032_v41  ;;  %v2594_v50 = vmul.f32 %v3641_v48, %v2593_v2  ;;  %v2638_v53 = vsel %vm2637_vm4, %v3639_v38, %v2634_v0 }
 0x72a   : > { %v2486_v1 = vmul.f32 %v2434_v11, %v4021_v62  ;;  %v2868_v10 = vmul.f32 %v2638_v53, %v5362_v14  ;;  %v2662_v18 = vmul.f32 0.5, %v2661_v46 }
 0x72b   : > { %3128 = vst [vmem:[%s5429_s14 + $0x38] sm:$0xff] %v3096_v25  ;;  %v2598_v26 = vsel %vm2597_vm6, %v3641_v48, %v2594_v50  ;;  %v3645_v28 = vpop.eup %3644  ;;  %2473 = vadd.xlane.f32.xlu2 %v2410_v59 }
 0x72c   : > { %v2864_v33 = vmul.f32 %v2598_v26, %v5358_v55  ;;  %v5704_v16 = vadd.f32 1e-05, %v2486_v1  ;;  %v2903_v38 = vmul.f32 %v5405_v60, %v2868_v10  ;;  %v2690_v14 = vmul.f32 %v3645_v28, %v5687_v44  ;;  %v3647_v55 = vpop.eup %3646 }
 0x72d   : > { %v2663_v13 = vsub.f32 1.5, %v2662_v18  ;;  %v2620_v51 = vmul.f32 %v3647_v55, %v5692_v36  ;;  %vm2696_vm12 = vweird.f32 %v3645_v28  ;;  %vm2626_vm15 = vweird.f32 %v3647_v55 }
 0x72e   : > { %v2899_v15 = vmul.f32 %v5405_v60, %v2864_v33  ;;  %3648 = vrsqrt.f32 %v5704_v16  ;;  %v2938_v48 = vadd.f32 %v5413_v9, %v2903_v38  ;;  %v2691_v57 = vmul.f32 %v3645_v28, %v2690_v14  ;;  %vm2697_vm14 = vmor %vm2695_vm13, %vm2696_vm12  ;;  %v3069_v33 = vld [vmem:[%s5421_s24 + $0x60] sm:$0xff] }
 0x72f   : > { %v2664_v17 = vmul.f32 %v3643_v35, %v2663_v13  ;;  %v2621_v8 = vmul.f32 %v3647_v55, %v2620_v51  ;;  %vm2627_vm2 = vmor %vm2625_vm0, %vm2626_vm15  ;;  %vm2655_vm4 = vweird.f32 %v5704_v16 }
 0x730   : > { %v2934_v27 = vadd.f32 %v5413_v9, %v2899_v15  ;;  %vm2970_vm9 = vcmp.ge.f32.partialorder %v2938_v48, 0.0  ;;  %v3002_v23 = vmul.f32 0.01, %v2938_v48  ;;  %v2692_v49 = vmul.f32 0.5, %v2691_v57  ;;  %v3072_v57 = vld [vmem:[%s5421_s24 + $0x78] sm:$0xff] }
 0x731   : > { %v2440_v4 = vpop.xlane.xlu1 %2439  ;;  %v2668_v19 = vsel %vm2667_vm11, %v3643_v35, %v2664_v17  ;;  %v2622_v11 = vmul.f32 0.5, %v2621_v8 }
 0x732   : > { %vm2966_vm10 = vcmp.ge.f32.partialorder %v2934_v27, 0.0  ;;  %v2998_v20 = vmul.f32 0.01, %v2934_v27  ;;  %v3034_v52 = vsel %vm2970_vm9, %v2938_v48, %v3002_v23  ;;  %v2489_v6 = vmul.f32 %v2440_v4, %v4021_v62 }
 0x733   : > { %v3098_v32 = vadd.f32 %v3066_v29, %v3034_v52  ;;  %v2871_v2 = vmul.f32 %v2668_v19, %v5370_v30  ;;  %v2693_v41 = vsub.f32 1.5, %v2692_v49  ;;  %v2623_v53 = vsub.f32 1.5, %v2622_v11 }
 0x734   : > { %v3649_v61 = vpop.eup %3648  ;;  %v3030_v5 = vsel %vm2966_vm10, %v2934_v27, %v2998_v20  ;;  %v2521_v35 = vadd.f32 1e-05, %v2489_v6 }
 0x735   : > { %v3094_v0 = vadd.f32 %v3062_v24, %v3030_v5  ;;  %v2650_v25 = vmul.f32 %v3649_v61, %v5704_v16  ;;  %3130 = vst [vmem:[%s5429_s14 + $0x48] sm:$0xff] %v3098_v32  ;;  %v2906_v50 = vmul.f32 %v5405_v60, %v2871_v2  ;;  %v2694_v31 = vmul.f32 %v3645_v28, %v2693_v41  ;;  %v3065_v24 = vld [vmem:[%s5421_s24 + $0x40] sm:$0xff] }
 0x736   : > { %3650 = vrsqrt.f32 %v2521_v35  ;;  %v2624_v46 = vmul.f32 %v3647_v55, %v2623_v53  ;;  %vm2656_vm3 = vweird.f32 %v3649_v61  ;;  %vm2685_vm10 = vweird.f32 %v2521_v35 }
 0x737   : > { %3126 = vst [vmem:[%s5429_s14 + $0x28] sm:$0xff] %v3094_v0  ;;  %v2651_v1 = vmul.f32 %v3649_v61, %v2650_v25  ;;  %v2941_v30 = vadd.f32 %v5413_v9, %v2906_v50  ;;  %v2698_v10 = vsel %vm2697_vm14, %v3645_v28, %v2694_v31  ;;  %vm2657_vm5 = vmor %vm2655_vm4, %vm2656_vm3  ;;  %v3071_v31 = vld [vmem:[%s5421_s24 + $0x70] sm:$0xff] }
 0x738   : > { %v2874_v26 = vmul.f32 %v2698_v10, %v5385_v47  ;;  %v2628_v18 = vsel %vm2627_vm2, %v3647_v55, %v2624_v46 }
 0x739   : > { %v2652_v59 = vmul.f32 0.5, %v2651_v1  ;;  %vm2973_vm1 = vcmp.ge.f32.partialorder %v2941_v30, 0.0  ;;  %v3005_v44 = vmul.f32 0.01, %v2941_v30  ;;  %v2867_v28 = vmul.f32 %v2628_v18, %v5380_v22 }
 0x73a   : > { %v2909_v38 = vmul.f32 %v5405_v60, %v2874_v26 }
 0x73b   : > { %v2653_v15 = vsub.f32 1.5, %v2652_v59  ;;  %v3037_v14 = vsel %vm2973_vm1, %v2941_v30, %v3005_v44  ;;  %v2902_v27 = vmul.f32 %v5405_v60, %v2867_v28 }
 0x73c   : > { %v3101_v48 = vadd.f32 %v3069_v33, %v3037_v14  ;;  %v2944_v47 = vadd.f32 %v5413_v9, %v2909_v38  ;;  %v3651_v36 = vpop.eup %3650 }
 0x73d   : > { %v2654_v13 = vmul.f32 %v3649_v61, %v2653_v15  ;;  %v2680_v29 = vmul.f32 %v3651_v36, %v2521_v35  ;;  %v2937_v22 = vadd.f32 %v5413_v9, %v2902_v27  ;;  %vm2686_vm8 = vweird.f32 %v3651_v36 }
 0x73e   : > { %3133 = vst [vmem:[%s5429_s14 + $0x60] sm:$0xff] %v3101_v48  ;;  %vm2976_vm6 = vcmp.ge.f32.partialorder %v2944_v47, 0.0  ;;  %v3008_v55 = vmul.f32 0.01, %v2944_v47  ;;  %vm2687_vm11 = vmor %vm2685_vm10, %vm2686_vm8 }
 0x73f   : > { %v2658_v4 = vsel %vm2657_vm5, %v3649_v61, %v2654_v13  ;;  %v2681_v51 = vmul.f32 %v3651_v36, %v2680_v29  ;;  %vm2969_vm7 = vcmp.ge.f32.partialorder %v2937_v22, 0.0  ;;  %v3001_v20 = vmul.f32 0.01, %v2937_v22 }
 0x740   : > { %v2870_v23 = vmul.f32 %v2658_v4, %v5393_v43  ;;  %v3040_v17 = vsel %vm2976_vm6, %v2944_v47, %v3008_v55  ;;  %v3068_v43 = vld [vmem:[%s5421_s24 + $0x58] sm:$0xff] }
 0x741   : > { %v3104_v16 = vadd.f32 %v3072_v57, %v3040_v17  ;;  %v2682_v52 = vmul.f32 0.5, %v2681_v51  ;;  %v3033_v19 = vsel %vm2969_vm7, %v2937_v22, %v3001_v20 }
 0x742   : > { %v2905_v49 = vmul.f32 %v5405_v60, %v2870_v23  ;;  %v3097_v6 = vadd.f32 %v3065_v24, %v3033_v19 }
 0x743   : > { %3136 = vst [vmem:[%s5429_s14 + $0x78] sm:$0xff] %v3104_v16  ;;  %v2683_v61 = vsub.f32 1.5, %v2682_v52 }
 0x744   : > { %v2940_v8 = vadd.f32 %v5413_v9, %v2905_v49  ;;  %3129 = vst [vmem:[%s5429_s14 + $0x40] sm:$0xff] %v3097_v6 }
 0x745   : > { %v2684_v5 = vmul.f32 %v3651_v36, %v2683_v61 }
 0x746   : > { %vm2972_vm9 = vcmp.ge.f32.partialorder %v2940_v8, 0.0  ;;  %v3004_v32 = vmul.f32 0.01, %v2940_v8 }
 0x747   : > { %v2688_v0 = vsel %vm2687_vm11, %v3651_v36, %v2684_v5 }
 0x748   : > { %v3036_v2 = vsel %vm2972_vm9, %v2940_v8, %v3004_v32  ;;  %v2873_v11 = vmul.f32 %v2688_v0, %v5400_v63  ;;  %v5762_v32 = vld [vmem:[%s5928_s10] ss:$0 sm:$0xff] }
 0x749   : > { %v3100_v41 = vadd.f32 %v3068_v43, %v3036_v2 }
 0x74a   : > { %v2908_v25 = vmul.f32 %v5405_v60, %v2873_v11 }
 0x74b   : > { %3132 = vst [vmem:[%s5429_s14 + $0x58] sm:$0xff] %v3100_v41 }
 0x74c   : > { %v2943_v50 = vadd.f32 %v5413_v9, %v2908_v25 }
 0x74e   : > { %vm2975_vm12 = vcmp.ge.f32.partialorder %v2943_v50, 0.0  ;;  %v3007_v53 = vmul.f32 0.01, %v2943_v50 }
 0x750   : > { %v3039_v1 = vsel %vm2975_vm12, %v2943_v50, %v3007_v53 }
 0x751   : > { %v3103_v30 = vadd.f32 %v3071_v31, %v3039_v1  ;;  %v3074_v1 = vld [vmem:[%s5421_s24 + $0x88] sm:$0xff] }
 0x753   : > { %3135 = vst [vmem:[%s5429_s14 + $0x70] sm:$0xff] %v3103_v30 }
 0x759   : > { %v2446_v10 = vpop.xlane.xlu1 %2445 }
 0x75a   : > { %v2492_v35 = vmul.f32 %v2446_v10, %v4021_v62 }
 0x75b   : > { %v2432_v26 = vpop.xlane.xlu2 %2431 }
 0x75c   : > { %v2485_v46 = vmul.f32 %v2432_v26, %v4021_v62  ;;  %v2524_v59 = vadd.f32 1e-05, %v2492_v35  ;;  %v3067_v26 = vld [vmem:[%s5421_s24 + $0x50] sm:$0xff] }
 0x75e   : > { %v2517_v33 = vadd.f32 1e-05, %v2485_v46  ;;  %3652 = vrsqrt.f32 %v2524_v59  ;;  %vm2715_vm15 = vweird.f32 %v2524_v59 }
 0x760   : > { %3654 = vrsqrt.f32 %v2517_v33  ;;  %vm2645_vm1 = vweird.f32 %v2517_v33 }
 0x761   : > { %v2448_v63 = vpop.xlane.xlu0 %2447 }
 0x762   : > { %v2493_v60 = vmul.f32 %v2448_v63, %v4021_v62 }
 0x763   : > { %v2438_v9 = vpop.xlane.xlu2 %2437 }
 0x764   : > { %v2488_v44 = vmul.f32 %v2438_v9, %v4021_v62  ;;  %v3653_v38 = vpop.eup %3652  ;;  %v2525_v18 = vadd.f32 1e-05, %v2493_v60 }
 0x765   : > { %v2710_v14 = vmul.f32 %v3653_v38, %v2524_v59  ;;  %vm2716_vm13 = vweird.f32 %v3653_v38 }
 0x766   : > { %v3655_v15 = vpop.eup %3654  ;;  %v2520_v28 = vadd.f32 1e-05, %v2488_v44  ;;  %3656 = vrsqrt.f32 %v2525_v18  ;;  %vm2717_vm0 = vmor %vm2715_vm15, %vm2716_vm13  ;;  %vm2725_vm5 = vweird.f32 %v2525_v18 }
 0x767   : > { %v2640_v48 = vmul.f32 %v3655_v15, %v2517_v33  ;;  %v2711_v47 = vmul.f32 %v3653_v38, %v2710_v14  ;;  %vm2646_vm14 = vweird.f32 %v3655_v15 }
 0x768   : > { %3658 = vrsqrt.f32 %v2520_v28  ;;  %vm2647_vm2 = vmor %vm2645_vm1, %vm2646_vm14  ;;  %vm2675_vm6 = vweird.f32 %v2520_v28 }
 0x769   : > { %v2641_v13 = vmul.f32 %v3655_v15, %v2640_v48  ;;  %v2712_v36 = vmul.f32 0.5, %v2711_v47 }
 0x76b   : > { %v2642_v27 = vmul.f32 0.5, %v2641_v13  ;;  %v2713_v57 = vsub.f32 1.5, %v2712_v36  ;;  %v2444_v55 = vpop.xlane.xlu2 %2443 }
 0x76c   : > { %v3657_v4 = vpop.eup %3656  ;;  %v2491_v22 = vmul.f32 %v2444_v55, %v4021_v62 }
 0x76d   : > { %v2643_v29 = vsub.f32 1.5, %v2642_v27  ;;  %v2714_v17 = vmul.f32 %v3653_v38, %v2713_v57  ;;  %v2720_v51 = vmul.f32 %v3657_v4, %v2525_v18  ;;  %vm2726_vm3 = vweird.f32 %v3657_v4  ;;  %v3075_v57 = vld [vmem:[%s5421_s24 + $0x90] sm:$0xff] }
 0x76e   : > { %v3659_v23 = vpop.eup %3658  ;;  %v5754_v20 = vadd.f32 1e-05, %v2491_v22  ;;  %vm2727_vm8 = vmor %vm2725_vm5, %vm2726_vm3 }
 0x76f   : > { %v2644_v16 = vmul.f32 %v3655_v15, %v2643_v29  ;;  %v2670_v24 = vmul.f32 %v3659_v23, %v2520_v28  ;;  %v2718_v49 = vsel %vm2717_vm0, %v3653_v38, %v2714_v17  ;;  %v2721_v52 = vmul.f32 %v3657_v4, %v2720_v51 }
 0x770   : > { %v2876_v19 = vmul.f32 %v2718_v49, %v5442_v45  ;;  %3660 = vrsqrt.f32 %v5754_v20  ;;  %v5769_v45 = vld [vmem:[%s5929_s11] ss:$0 sm:$0xff]  ;;  %vm2676_vm4 = vweird.f32 %v3659_v23  ;;  %vm2705_vm13 = vweird.f32 %v5754_v20 }
 0x771   : > { %v2648_v8 = vsel %vm2647_vm2, %v3655_v15, %v2644_v16  ;;  %v2671_v6 = vmul.f32 %v3659_v23, %v2670_v24  ;;  %v2722_v43 = vmul.f32 0.5, %v2721_v52  ;;  %vm2677_vm10 = vmor %vm2675_vm6, %vm2676_vm4 }
 0x772   : > { %v2869_v61 = vmul.f32 %v2648_v8, %v5445_v37  ;;  %v2911_v5 = vmul.f32 %v5762_v32, %v2876_v19  ;;  %v2452_v25 = vpop.xlane.xlu1 %2451 }
 0x773   : > { %v2672_v2 = vmul.f32 0.5, %v2671_v6  ;;  %v2723_v0 = vsub.f32 1.5, %v2722_v43  ;;  %v2495_v35 = vmul.f32 %v2452_v25, %v4021_v62 }
 0x774   : > { %v2904_v41 = vmul.f32 %v5762_v32, %v2869_v61  ;;  %v2946_v37 = vadd.f32 %v5769_v45, %v2911_v5 }
 0x775   : > { %v2673_v11 = vsub.f32 1.5, %v2672_v2  ;;  %v2724_v31 = vmul.f32 %v3657_v4, %v2723_v0  ;;  %v2527_v48 = vadd.f32 1e-05, %v2495_v35  ;;  %v3073_v0 = vld [vmem:[%s5421_s24 + $0x80] sm:$0xff] }
 0x776   : > { %v2939_v50 = vadd.f32 %v5769_v45, %v2904_v41  ;;  %v3661_v53 = vpop.eup %3660  ;;  %vm2978_vm7 = vcmp.ge.f32.partialorder %v2946_v37, 0.0  ;;  %v3010_v30 = vmul.f32 0.01, %v2946_v37 }
 0x777   : > { %v2674_v10 = vmul.f32 %v3659_v23, %v2673_v11  ;;  %v2728_v59 = vsel %vm2727_vm8, %v3657_v4, %v2724_v31  ;;  %v2700_v33 = vmul.f32 %v3661_v53, %v5754_v20  ;;  %3662 = vrsqrt.f32 %v2527_v48  ;;  %v3070_v4 = vld [vmem:[%s5421_s24 + $0x68] sm:$0xff] }
 0x778   : > { %vm2971_vm9 = vcmp.ge.f32.partialorder %v2939_v50, 0.0  ;;  %v3003_v46 = vmul.f32 0.01, %v2939_v50  ;;  %v3042_v63 = vsel %vm2978_vm7, %v2946_v37, %v3010_v30  ;;  %v2877_v60 = vmul.f32 %v2728_v59, %v5455_v40 }
 0x779   : > { %v2678_v9 = vsel %vm2677_vm10, %v3659_v23, %v2674_v10  ;;  %v3106_v44 = vadd.f32 %v3074_v1, %v3042_v63  ;;  %v2701_v15 = vmul.f32 %v3661_v53, %v2700_v33  ;;  %vm2706_vm11 = vweird.f32 %v3661_v53 }
 0x77a   : > { %v3035_v38 = vsel %vm2971_vm9, %v2939_v50, %v3003_v46  ;;  %v2872_v18 = vmul.f32 %v2678_v9, %v5460_v39  ;;  %v2912_v28 = vmul.f32 %v5762_v32, %v2877_v60  ;;  %vm2707_vm15 = vmor %vm2705_vm13, %vm2706_vm11  ;;  %vm2745_vm2 = vweird.f32 %v2527_v48 }
 0x77b   : > { %v3099_v14 = vadd.f32 %v3067_v26, %v3035_v38  ;;  %3138 = vst [vmem:[%s5429_s14 + $0x88] sm:$0xff] %v3106_v44  ;;  %v2702_v13 = vmul.f32 0.5, %v2701_v15 }
 0x77c   : > { %v2907_v47 = vmul.f32 %v5762_v32, %v2872_v18  ;;  %v2947_v36 = vadd.f32 %v5769_v45, %v2912_v28 }
 0x77d   : > { %3131 = vst [vmem:[%s5429_s14 + $0x50] sm:$0xff] %v3099_v14  ;;  %v2703_v27 = vsub.f32 1.5, %v2702_v13  ;;  %v2454_v55 = vpop.xlane.xlu0 %2453  ;;  %v3663_v52 = vpop.eup %3662 }
 0x77e   : > { %v2942_v40 = vadd.f32 %v5769_v45, %v2907_v47  ;;  %vm2979_vm12 = vcmp.ge.f32.partialorder %v2947_v36, 0.0  ;;  %v3011_v39 = vmul.f32 0.01, %v2947_v36  ;;  %v2496_v23 = vmul.f32 %v2454_v55, %v4021_v62 }
 0x77f   : > { %v2704_v22 = vmul.f32 %v3661_v53, %v2703_v27  ;;  %v2740_v8 = vmul.f32 %v3663_v52, %v2527_v48  ;;  %vm2746_vm1 = vweird.f32 %v3663_v52 }
 0x780   : > { %vm2974_vm14 = vcmp.ge.f32.partialorder %v2942_v40, 0.0  ;;  %v3006_v29 = vmul.f32 0.01, %v2942_v40  ;;  %v3043_v17 = vsel %vm2979_vm12, %v2947_v36, %v3011_v39  ;;  %v2528_v49 = vadd.f32 1e-05, %v2496_v23  ;;  %vm2747_vm3 = vmor %vm2745_vm2, %vm2746_vm1 }
 0x781   : > { %v3107_v51 = vadd.f32 %v3075_v57, %v3043_v17  ;;  %v2708_v24 = vsel %vm2707_vm15, %v3661_v53, %v2704_v22  ;;  %v2741_v61 = vmul.f32 %v3663_v52, %v2740_v8 }
 0x782   : > { %v3038_v16 = vsel %vm2974_vm14, %v2942_v40, %v3006_v29  ;;  %v2875_v20 = vmul.f32 %v2708_v24, %v5479_v58  ;;  %3664 = vrsqrt.f32 %v2528_v49  ;;  %vm2755_vm5 = vweird.f32 %v2528_v49  ;;  %v3077_v40 = vld [vmem:[%s5421_s24 + $0xa0] sm:$0xff] }
 0x783   : > { %v3102_v19 = vadd.f32 %v3070_v4, %v3038_v16  ;;  %3139 = vst [vmem:[%s5429_s14 + $0x90] sm:$0xff] %v3107_v51  ;;  %v2742_v2 = vmul.f32 0.5, %v2741_v61  ;;  %v3078_v61 = vld [vmem:[%s5421_s24 + $0xa8] sm:$0xff] }
 0x784   : > { %v2910_v6 = vmul.f32 %v5762_v32, %v2875_v20 }
 0x785   : > { %3134 = vst [vmem:[%s5429_s14 + $0x68] sm:$0xff] %v3102_v19  ;;  %v2472_v5 = vpop.xlane.xlu0 %2471  ;;  %v2743_v50 = vsub.f32 1.5, %v2742_v2 }
 0x786   : > { %v2945_v43 = vadd.f32 %v5769_v45, %v2910_v6  ;;  %v2505_v41 = vmul.f32 %v2472_v5, %v4021_v62 }
 0x787   : > { %v2744_v26 = vmul.f32 %v3663_v52, %v2743_v50 }
 0x788   : > { %vm2977_vm0 = vcmp.ge.f32.partialorder %v2945_v43, 0.0  ;;  %v3009_v37 = vmul.f32 0.01, %v2945_v43  ;;  %v2458_v11 = vpop.xlane.xlu1 %2457  ;;  %v3665_v25 = vpop.eup %3664  ;;  %v5798_v31 = vadd.f32 1e-05, %v2505_v41 }
 0x789   : > { %v2498_v58 = vmul.f32 %v2458_v11, %v4021_v62  ;;  %v2450_v53 = vpop.xlane.xlu2 %2449  ;;  %v2750_v30 = vmul.f32 %v3665_v25, %v2528_v49  ;;  %v2748_v63 = vsel %vm2747_vm3, %v3663_v52, %v2744_v26  ;;  %vm2756_vm4 = vweird.f32 %v3665_v25 }
 0x78a   : > { %v3041_v1 = vsel %vm2977_vm0, %v2945_v43, %v3009_v37  ;;  %v2494_v10 = vmul.f32 %v2450_v53, %v4021_v62  ;;  %3666 = vrsqrt.f32 %v5798_v31  ;;  %v2879_v60 = vmul.f32 %v2748_v63, %v5505_v12  ;;  %vm2757_vm6 = vmor %vm2755_vm5, %vm2756_vm4 }
 0x78b   : > { %v3105_v35 = vadd.f32 %v3073_v0, %v3041_v1  ;;  %v5801_v46 = vadd.f32 1e-05, %v2498_v58  ;;  %v2751_v59 = vmul.f32 %v3665_v25, %v2750_v30  ;;  %vm2845_vm10 = vweird.f32 %v5798_v31 }
 0x78c   : > { %v5804_v33 = vadd.f32 1e-05, %v2494_v10  ;;  %v2914_v44 = vmul.f32 %v5762_v32, %v2879_v60 }
 0x78d   : > { %3137 = vst [vmem:[%s5429_s14 + $0x80] sm:$0xff] %v3105_v35  ;;  %3668 = vrsqrt.f32 %v5801_v46  ;;  %v2752_v9 = vmul.f32 0.5, %v2751_v59  ;;  %vm2775_vm13 = vweird.f32 %v5801_v46 }
 0x78e   : > { %3670 = vrsqrt.f32 %v5804_v33  ;;  %v2949_v28 = vadd.f32 %v5769_v45, %v2914_v44  ;;  %vm2735_vm15 = vweird.f32 %v5804_v33 }
 0x78f   : > { %v2753_v38 = vsub.f32 1.5, %v2752_v9 }
 0x790   : > { %v2470_v18 = vpop.xlane.xlu1 %2469  ;;  %v3667_v15 = vpop.eup %3666  ;;  %vm2981_vm7 = vcmp.ge.f32.partialorder %v2949_v28, 0.0  ;;  %v3013_v27 = vmul.f32 0.01, %v2949_v28 }
 0x791   : > { %v2504_v14 = vmul.f32 %v2470_v18, %v4021_v62  ;;  %v2754_v48 = vmul.f32 %v3665_v25, %v2753_v38  ;;  %v2840_v47 = vmul.f32 %v3667_v15, %v5798_v31  ;;  %vm2846_vm8 = vweird.f32 %v3667_v15  ;;  %v3087_v18 = vld [vmem:[%s5421_s24 + $0xf0] sm:$0xff] }
 0x792   : > { %v3045_v22 = vsel %vm2981_vm7, %v2949_v28, %v3013_v27  ;;  %vm2847_vm14 = vmor %vm2845_vm10, %vm2846_vm8  ;;  %v3080_v28 = vld [vmem:[%s5421_s24 + $0xb8] sm:$0xff] }
 0x793   : > { %v3669_v13 = vpop.eup %3668  ;;  %v5814_v12 = vadd.f32 1e-05, %v2504_v14  ;;  %v2758_v57 = vsel %vm2757_vm6, %v3665_v25, %v2754_v48  ;;  %v2841_v4 = vmul.f32 %v3667_v15, %v2840_v47  ;;  %v3109_v17 = vadd.f32 %v3077_v40, %v3045_v22 }
 0x794   : > { %v3671_v36 = vpop.eup %3670  ;;  %v2770_v39 = vmul.f32 %v3669_v13, %v5801_v46  ;;  %v2880_v55 = vmul.f32 %v2758_v57, %v5547_v21  ;;  %vm2776_vm9 = vweird.f32 %v3669_v13 }
 0x795   : > { %v2730_v29 = vmul.f32 %v3671_v36, %v5804_v33  ;;  %3672 = vrsqrt.f32 %v5814_v12  ;;  %v2842_v16 = vmul.f32 0.5, %v2841_v4  ;;  %3141 = vst [vmem:[%s5429_s14 + $0xa0] sm:$0xff] %v3109_v17  ;;  %vm2736_vm11 = vweird.f32 %v3671_v36  ;;  %vm2777_vm0 = vmor %vm2775_vm13, %vm2776_vm9 }
 0x796   : > { %v2771_v23 = vmul.f32 %v3669_v13, %v2770_v39  ;;  %v2915_v51 = vmul.f32 %v5762_v32, %v2880_v55  ;;  %v2456_v52 = vpop.xlane.xlu2 %2455  ;;  %vm2737_vm1 = vmor %vm2735_vm15, %vm2736_vm11  ;;  %vm2835_vm4 = vweird.f32 %v5814_v12 }
 0x797   : > { %v2731_v24 = vmul.f32 %v3671_v36, %v2730_v29  ;;  %v2843_v21 = vsub.f32 1.5, %v2842_v16  ;;  %v2497_v8 = vmul.f32 %v2456_v52, %v4021_v62 }
 0x798   : > { %v2772_v49 = vmul.f32 0.5, %v2771_v23  ;;  %v2950_v19 = vadd.f32 %v5769_v45, %v2915_v51 }
 0x799   : > { %v2732_v20 = vmul.f32 0.5, %v2731_v24  ;;  %v2844_v5 = vmul.f32 %v3667_v15, %v2843_v21  ;;  %v5830_v37 = vadd.f32 1e-05, %v2497_v8 }
 0x79a   : > { %v2773_v6 = vsub.f32 1.5, %v2772_v49  ;;  %vm2982_vm12 = vcmp.ge.f32.partialorder %v2950_v19, 0.0  ;;  %v3014_v43 = vmul.f32 0.01, %v2950_v19 }
 0x79b   : > { %v2733_v2 = vsub.f32 1.5, %v2732_v20  ;;  %v3673_v41 = vpop.eup %3672  ;;  %v2848_v25 = vsel %vm2847_vm14, %v3667_v15, %v2844_v5  ;;  %3674 = vrsqrt.f32 %v5830_v37  ;;  %vm2765_vm9 = vweird.f32 %v5830_v37 }
 0x79c   : > { %v2774_v0 = vmul.f32 %v3669_v13, %v2773_v6  ;;  %v3046_v11 = vsel %vm2982_vm12, %v2950_v19, %v3014_v43  ;;  %v2830_v58 = vmul.f32 %v3673_v41, %v5814_v12  ;;  %v2889_v1 = vmul.f32 %v2848_v25, %v5519_v54 }
 0x79d   : > { %v2734_v50 = vmul.f32 %v3671_v36, %v2733_v2  ;;  %v3110_v31 = vadd.f32 %v3078_v61, %v3046_v11  ;;  %vm2836_vm2 = vweird.f32 %v3673_v41  ;;  %v3079_v11 = vld [vmem:[%s5421_s24 + $0xb0] sm:$0xff] }
 0x79e   : > { %v2778_v53 = vsel %vm2777_vm0, %v3669_v13, %v2774_v0  ;;  %v2831_v35 = vmul.f32 %v3673_v41, %v2830_v58  ;;  %v2924_v26 = vmul.f32 %v5762_v32, %v2889_v1  ;;  %v2474_v59 = vpop.xlane.xlu2 %2473  ;;  %v3076_v13 = vld [vmem:[%s5421_s24 + $0x98] sm:$0xff]  ;;  %vm2837_vm7 = vmor %vm2835_vm4, %vm2836_vm2 }
 0x79f   : > { %v2882_v30 = vmul.f32 %v2778_v53, %v5610_v42  ;;  %v2738_v10 = vsel %vm2737_vm1, %v3671_v36, %v2734_v50  ;;  %3142 = vst [vmem:[%s5429_s14 + $0xa8] sm:$0xff] %v3110_v31  ;;  %v2506_v54 = vmul.f32 %v2474_v59, %v4021_v62  ;;  %v3088_v1 = vld [vmem:[%s5421_s24 + $0xf8] sm:$0xff] }
 0x7a0   : > { %v2878_v46 = vmul.f32 %v2738_v10, %v5616_v56  ;;  %v2832_v63 = vmul.f32 0.5, %v2831_v35  ;;  %v2959_v60 = vadd.f32 %v5769_v45, %v2924_v26 }
 0x7a1   : > { %v2917_v33 = vmul.f32 %v5762_v32, %v2882_v30  ;;  %v2538_v38 = vadd.f32 1e-05, %v2506_v54  ;;  %v3675_v14 = vpop.eup %3674 }
 0x7a2   : > { %v2913_v42 = vmul.f32 %v5762_v32, %v2878_v46  ;;  %v2833_v44 = vsub.f32 1.5, %v2832_v63  ;;  %vm2991_vm3 = vcmp.ge.f32.partialorder %v2959_v60, 0.0  ;;  %v3023_v56 = vmul.f32 0.01, %v2959_v60 }
 0x7a3   : > { %v2952_v9 = vadd.f32 %v5769_v45, %v2917_v33  ;;  %3676 = vrsqrt.f32 %v2538_v38  ;;  %v2760_v40 = vmul.f32 %v3675_v14, %v5830_v37  ;;  %vm2766_vm8 = vweird.f32 %v3675_v14 }
 0x7a4   : > { %v2948_v15 = vadd.f32 %v5769_v45, %v2913_v42  ;;  %v2834_v48 = vmul.f32 %v3673_v41, %v2833_v44  ;;  %v3055_v47 = vsel %vm2991_vm3, %v2959_v60, %v3023_v56  ;;  %vm2767_vm11 = vmor %vm2765_vm9, %vm2766_vm8  ;;  %vm2855_vm13 = vweird.f32 %v2538_v38 }
 0x7a5   : > { %vm2984_vm5 = vcmp.ge.f32.partialorder %v2952_v9, 0.0  ;;  %v3016_v62 = vmul.f32 0.01, %v2952_v9  ;;  %v3119_v57 = vadd.f32 %v3087_v18, %v3055_v47  ;;  %v2761_v29 = vmul.f32 %v3675_v14, %v2760_v40 }
 0x7a6   : > { %vm2980_vm6 = vcmp.ge.f32.partialorder %v2948_v15, 0.0  ;;  %v3012_v36 = vmul.f32 0.01, %v2948_v15  ;;  %v2838_v12 = vsel %vm2837_vm7, %v3673_v41, %v2834_v48 }
 0x7a7   : > { %v3048_v27 = vsel %vm2984_vm5, %v2952_v9, %v3016_v62  ;;  %v2888_v4 = vmul.f32 %v2838_v12, %v5511_v3  ;;  %3151 = vst [vmem:[%s5429_s14 + $0xf0] sm:$0xff] %v3119_v57  ;;  %v2762_v17 = vmul.f32 0.5, %v2761_v29  ;;  %v3086_v3 = vld [vmem:[%s5421_s24 + $0xe8] sm:$0xff]  ;;  %s3705_s24 = scalar_lea.hbm %s5931_s13, 1024 }
 0x7a8   : > { %v3112_v39 = vadd.f32 %v3080_v28, %v3048_v27  ;;  %v3044_v55 = vsel %vm2980_vm6, %v2948_v15, %v3012_v36  ;;  %p3707_p5 = scmp.lt.s32.totalorder %s3705_s24, %s3701_s30 }
 0x7a9   : > { %v3108_v22 = vadd.f32 %v3076_v13, %v3044_v55  ;;  %v2923_v23 = vmul.f32 %v5762_v32, %v2888_v4  ;;  %v3677_v51 = vpop.eup %3676  ;;  %v2763_v24 = vsub.f32 1.5, %v2762_v17 }
 0x7aa   : > { %3144 = vst [vmem:[%s5429_s14 + $0xb8] sm:$0xff] %v3112_v39  ;;  %v2850_v49 = vmul.f32 %v3677_v51, %v2538_v38  ;;  %vm2856_vm12 = vweird.f32 %v3677_v51  ;;  %p3708_p6 = por %p3707_p5, %p3706_p4 }
 0x7ab   : > { %3140 = vst [vmem:[%s5429_s14 + $0x98] sm:$0xff] %v3108_v22  ;;  %v2958_v16 = vadd.f32 %v5769_v45, %v2923_v23  ;;  %v2764_v19 = vmul.f32 %v3675_v14, %v2763_v24  ;;  %vm2857_vm14 = vmor %vm2855_vm13, %vm2856_vm12 }
 0x7ac   : > { %v2851_v21 = vmul.f32 %v3677_v51, %v2850_v49  ;;  %p3709_p7 = pnand %p3708_p6, %p3704_p2 }
 0x7ad   : > { %vm2990_vm10 = vcmp.ge.f32.partialorder %v2958_v16, 0.0  ;;  %v3022_v52 = vmul.f32 0.01, %v2958_v16  ;;  %v2768_v8 = vsel %vm2767_vm11, %v3675_v14, %v2764_v19 }
 0x7ae   : > { %v2852_v6 = vmul.f32 0.5, %v2851_v21  ;;  %v2881_v43 = vmul.f32 %v2768_v8, %v5668_v34 }
 0x7af   : > { %v3054_v20 = vsel %vm2990_vm10, %v2958_v16, %v3022_v52 }
 0x7b0   : > { %v3118_v61 = vadd.f32 %v3086_v3, %v3054_v20  ;;  %v2853_v5 = vsub.f32 1.5, %v2852_v6  ;;  %v2916_v2 = vmul.f32 %v5762_v32, %v2881_v43 }
 0x7b2   : > { %3150 = vst [vmem:[%s5429_s14 + $0xe8] sm:$0xff] %v3118_v61  ;;  %v2854_v41 = vmul.f32 %v3677_v51, %v2853_v5  ;;  %v2951_v0 = vadd.f32 %v5769_v45, %v2916_v2 }
 0x7b4   : > { %v2858_v37 = vsel %vm2857_vm14, %v3677_v51, %v2854_v41  ;;  %vm2983_vm15 = vcmp.ge.f32.partialorder %v2951_v0, 0.0  ;;  %v3015_v34 = vmul.f32 0.01, %v2951_v0 }
 0x7b5   : > { %v2890_v25 = vmul.f32 %v2858_v37, %v5685_v7 }
 0x7b6   : > { %v3047_v50 = vsel %vm2983_vm15, %v2951_v0, %v3015_v34 }
 0x7b7   : > { %v2925_v58 = vmul.f32 %v5762_v32, %v2890_v25  ;;  %v3111_v31 = vadd.f32 %v3079_v11, %v3047_v50 }
 0x7b9   : > { %v2960_v53 = vadd.f32 %v5769_v45, %v2925_v58  ;;  %3143 = vst [vmem:[%s5429_s14 + $0xb0] sm:$0xff] %v3111_v31 }
 0x7bb   : > { %vm2992_vm0 = vcmp.ge.f32.partialorder %v2960_v53, 0.0  ;;  %v3024_v30 = vmul.f32 0.01, %v2960_v53 }
 0x7bd   : > { %v3056_v7 = vsel %vm2992_vm0, %v2960_v53, %v3024_v30 }
 0x7be   : > { %v3120_v10 = vadd.f32 %v3088_v1, %v3056_v7 }
 0x7c0   : > { %3152 = vst [vmem:[%s5429_s14 + $0xf8] sm:$0xff] %v3120_v10 }
 0x7c1   : > { %3712 = shalt.err (!%p3709_p7)
}
 0x7c2   : > { %s3783_s0 = smov 128   ;;  %s3784_s14 = smov 8  }
 0x7c3   : > { %3334 = dma.vmem_to_hbm [thread:$0]  (%p3906_p3), %s3169_s18, 4096, %s3171_s20, %s3154_s23, %s3783_s0, %s3783_s0, %s3784_s14  }
 0x7c4 PF: > { %p3340_p9 = scmp.ge.s32.totalorder %s3779_s15, 2  ;;  %s3185_s28 = sand.u32 1, %s3751_s25  }
 0x7c5   : > { %s3186_s29 = scalar_lea.sflag [#allocation3], %s3185_s28 }
 0x7c6   : > { %p3337_p10 = pnand %p3340_p9, %p3915_p8 }
 0x7c8   : > { %p3338_p11 = pneg %p3337_p10 }
 0x7ca   : > { %3746 = dma.done.wait (%p3338_p11), %s3186_s29, 4096  }
 0x7cb   : > { %3748 = vsyncadd (%p3338_p11), %s3186_s29, 4294963200  ;;  %s26_s15 = sadd.s32 1, %s3779_s15   ;;  %s5959_s16 = sld [smem:[#allocation9_spill]] }
 0x7cc   : > { %p23_p12 = scmp.ge.s32.totalorder %s26_s15, 6   ;;  %s5960_s28 = sld [smem:[#allocation5_spill]] }
 0x7cd   : > { %s5961_s29 = sld [smem:[#allocation6_spill]]  ;;  %s5964_s25 = smov %s3755_s26 }
 0x7ce   : > { %s5962_s30 = sld [smem:[#allocation7_spill]]  ;;  %s5965_s26 = smov %s3759_s27 }
 0x7cf   : > { %s5963_s14 = sld [smem:[#allocation8_spill]]  ;;  %25 = sbr.rel (!%p23_p12) target bundleno = 7 (0x7), region = 110 }
 0x7d1   : > { %s5966_s27 = smov %s5959_s16 }
 0x7d4   :  { %3192 = vsyncpa [#allocation3], 1 }
 0x7d5   :  { %3194 = vsyncpa [#allocation3 + $0x1], 1 }

</bundles_post_ra>
